<compile_context>
chip_gen: v7x
topology: tpu7x:2x2x1
jax: 0.10.0
libtpu: 0.0.40
codegen_flags: <defaults>
</compile_context>

<pallas_src>
import math
import functools

import jax
import jax.numpy as jnp
from jax import lax
from jax.experimental import pallas as pl
from jax.experimental.pallas import tpu as pltpu


def _round_up(x, m):
    return (x + m - 1) // m * m


# ---------------------------------------------------------------------------
# Fused whole-model kernel: one grid step = one batch element.
# ---------------------------------------------------------------------------
def _model_kernel(x_ref, peb_ref, embw_ref,
                  wqkv_ref, bqkv_ref, wo_ref, bo_ref, ln1g_ref, ln1b_ref,
                  w1_ref, b1_ref, w2_ref, b2_ref, ln2g_ref, ln2b_ref,
                  clsw_ref, clsb_ref, o_ref, *, L, H, eps):
    S, E = peb_ref.shape

    def layernorm(y, g, b):                       # f32 math (v5e has no bf16 VALU/EUP)
        mean = jnp.mean(y, axis=-1, keepdims=True)
        c = y - mean
        var = jnp.mean(c * c, axis=-1, keepdims=True)
        return c * lax.rsqrt(var + eps) * g + b

    # ---- embedding + positional encoding (emb bias pre-folded into peb) ----
    h = jnp.dot(x_ref[...].astype(jnp.bfloat16), embw_ref[...],
                preferred_element_type=jnp.float32) + peb_ref[...]          # (S, E) f32

    for l in range(L):                            # static unroll over layers
        # ---- multi-head self-attention (head-batched matmuls) ----
        hb = h.astype(jnp.bfloat16)
        xb3 = jnp.broadcast_to(hb[None, :, :], (3 * H, S, E))               # (3H, S, E) bf16
        # Q/K/V projections for all heads in one batched GEMM; 1/sqrt(Dh) is
        # already folded into the Q weights/bias.
        qkv = lax.dot_general(xb3, wqkv_ref[l], (((2,), (1,)), ((0,), (0,))),
                              preferred_element_type=jnp.float32) + bqkv_ref[l]  # (3H, S, Dh)
        q = qkv[:H]
        k = qkv[H:2 * H]
        v = qkv[2 * H:]
        # scores: contract last dims of q and k (no explicit transpose), batched over heads
        sc = lax.dot_general(q.astype(jnp.bfloat16), k.astype(jnp.bfloat16),
                             (((2,), (2,)), ((0,), (0,))),
                             preferred_element_type=jnp.float32)            # (H, S, S)
        sc = sc - jnp.max(sc, axis=-1, keepdims=True)
        p = jnp.exp(sc)
        p = p * pl.reciprocal(jnp.sum(p, axis=-1, keepdims=True), approx=True)
        attn = lax.dot_general(p.astype(jnp.bfloat16), v.astype(jnp.bfloat16),
                               (((2,), (1,)), ((0,), (0,))),
                               preferred_element_type=jnp.float32)          # (H, S, Dh)
        # head-concat folded into the output projection: per-head GEMM + sum over heads
        proj = lax.dot_general(attn.astype(jnp.bfloat16), wo_ref[l],
                               (((2,), (1,)), ((0,), (0,))),
                               preferred_element_type=jnp.float32)          # (H, S, E)
        y = h + jnp.sum(proj, axis=0) + bo_ref[l]                           # residual
        h = layernorm(y, ln1g_ref[l], ln1b_ref[l])

        # ---- feed-forward (full dim_ff in one step; intermediate never hits HBM) ----
        t = jnp.dot(h.astype(jnp.bfloat16), w1_ref[l],
                    preferred_element_type=jnp.float32) + b1_ref[l]         # (S, F) f32
        t = jnp.maximum(t, 0.0)                                             # ReLU
        f = jnp.dot(t.astype(jnp.bfloat16), w2_ref[l],
                    preferred_element_type=jnp.float32) + b2_ref[l]         # (S, E) f32
        h = layernorm(h + f, ln2g_ref[l], ln2b_ref[l])

    # ---- classifier (lane-dense padded output) ----
    o_ref[...] = jnp.dot(h.astype(jnp.bfloat16), clsw_ref[...],
                         preferred_element_type=jnp.float32) + clsb_ref[...]


def fused_forward(x2d, pe_b, p, *, B, S):
    M, In = x2d.shape
    E = pe_b.shape[1]
    L, threeH, _, Dh = p["wqkv_h"].shape
    H = threeH // 3
    F = p["w1"].shape[2]
    Ncp = p["cls_w"].shape[1]
    assert M == B * S

    kernel = functools.partial(_model_kernel, L=L, H=H, eps=1e-5)

    def full(shape):
        n = len(shape)
        return pl.BlockSpec(shape, lambda b, n=n: (0,) * n)

    return pl.pallas_call(
        kernel,
        out_shape=jax.ShapeDtypeStruct((M, Ncp), jnp.float32),
        grid=(B,),
        in_specs=[
            pl.BlockSpec((S, In), lambda b: (b, 0)),     # x rows of this batch element
            full((S, E)),                                # PE (+ embedding bias)
            full((In, E)),                               # embedding weight
            full((L, threeH, E, Dh)),                    # per-head QKV weights
            full((L, threeH, 1, Dh)),                    # per-head QKV biases
            full((L, H, Dh, E)),                         # per-head out-proj weights
            full((L, 1, E)),                             # out-proj bias
            full((L, 1, E)), full((L, 1, E)),            # LN1 gamma/beta
            full((L, E, F)), full((L, 1, F)),            # FFN w1/b1
            full((L, F, E)), full((L, 1, E)),            # FFN w2/b2
            full((L, 1, E)), full((L, 1, E)),            # LN2 gamma/beta
            full((E, Ncp)), full((1, Ncp)),              # classifier (padded to 128 cols)
        ],
        out_specs=pl.BlockSpec((S, Ncp), lambda b: (b, 0)),
        compiler_params=pltpu.CompilerParams(dimension_semantics=("parallel",)),
    )(x2d, pe_b, p["emb_w"],
      p["wqkv_h"], p["bqkv_h"], p["wo_h"], p["bo"], p["ln1_g"], p["ln1_b"],
      p["w1"], p["b1"], p["w2"], p["b2"], p["ln2_g"], p["ln2_b"],
      p["cls_w"], p["cls_b"])


# ---------------------------------------------------------------------------
# Parameters / glue
# ---------------------------------------------------------------------------
def make_positional_encoding(d_model, max_len=1000):
    position = jnp.arange(max_len, dtype=jnp.float32)[:, None]
    div_term = jnp.exp(jnp.arange(0, d_model, 2, dtype=jnp.float32)
                       * (-math.log(10000.0) / d_model))
    ang = position * div_term                                    # (max_len, d_model/2)
    # interleave sin (even cols) / cos (odd cols), matching the PyTorch module
    return jnp.stack([jnp.sin(ang), jnp.cos(ang)], axis=-1).reshape(max_len, d_model)


def init_params(key, input_dim, d_model, nhead, num_layers, num_classes, dim_ff=2048):
    E, H, L, F = d_model, nhead, num_layers, dim_ff
    assert E % H == 0
    Dh = E // H
    scale = 1.0 / math.sqrt(Dh)

    def dense(k, fi, fo):
        kw, kb = jax.random.split(k)
        w = jax.random.normal(kw, (fi, fo), jnp.float32) * 0.05
        b = jax.random.normal(kb, (fo,), jnp.float32) * 0.05
        return w, b

    keys = jax.random.split(key, 2 + L)
    params = {}
    emb_w, emb_b = dense(keys[0], input_dim, E)
    params["emb_w"] = emb_w.astype(jnp.bfloat16)
    params["emb_b"] = emb_b
    params["pe"] = make_positional_encoding(E, max_len=1000)

    # classifier padded to a lane-dense 128-multiple; zero columns sliced off outside
    Ncp = _round_up(num_classes, 128)
    cw, cb = dense(keys[1], E, num_classes)
    params["cls_w"] = jnp.pad(cw, ((0, 0), (0, Ncp - num_classes))).astype(jnp.bfloat16)
    params["cls_b"] = jnp.pad(cb, (0, Ncp - num_classes)).reshape(1, Ncp)

    def heads_cols(w):            # (E, E) -> (H, E, Dh): output columns grouped per head
        return w.reshape(E, H, Dh).transpose(1, 0, 2)

    wqkv_h, bqkv_h, wo_h, bo_l = [], [], [], []
    ln1g, ln1b, ln2g, ln2b = [], [], [], []
    w1s, b1s, w2s, b2s = [], [], [], []
    for li in range(L):
        lk = jax.random.split(keys[2 + li], 6)
        wq, bq = dense(lk[0], E, E)
        wk, bk = dense(lk[1], E, E)
        wv, bv = dense(lk[2], E, E)
        wq, bq = wq * scale, bq * scale          # fold 1/sqrt(Dh) into Q projection
        wqkv_h.append(jnp.concatenate([heads_cols(wq), heads_cols(wk), heads_cols(wv)], 0))
        bqkv_h.append(jnp.concatenate([bq.reshape(H, 1, Dh), bk.reshape(H, 1, Dh),
                                       bv.reshape(H, 1, Dh)], 0))
        wo, bo = dense(lk[3], E, E)
        wo_h.append(wo.reshape(H, Dh, E))        # per-head rows of the out projection
        bo_l.append(bo.reshape(1, E))
        w1, b1 = dense(lk[4], E, F)
        w2, b2 = dense(lk[5], F, E)
        w1s.append(w1); b1s.append(b1.reshape(1, F))
        w2s.append(w2); b2s.append(b2.reshape(1, E))
        ln1g.append(jnp.ones((1, E), jnp.float32)); ln1b.append(jnp.zeros((1, E), jnp.float32))
        ln2g.append(jnp.ones((1, E), jnp.float32)); ln2b.append(jnp.zeros((1, E), jnp.float32))

    params["wqkv_h"] = jnp.stack(wqkv_h).astype(jnp.bfloat16)    # (L, 3H, E, Dh)
    params["bqkv_h"] = jnp.stack(bqkv_h)                         # (L, 3H, 1, Dh)
    params["wo_h"] = jnp.stack(wo_h).astype(jnp.bfloat16)        # (L, H, Dh, E)
    params["bo"] = jnp.stack(bo_l)                               # (L, 1, E)
    params["ln1_g"] = jnp.stack(ln1g); params["ln1_b"] = jnp.stack(ln1b)
    params["w1"] = jnp.stack(w1s).astype(jnp.bfloat16)           # (L, E, F)
    params["b1"] = jnp.stack(b1s)                                # (L, 1, F)
    params["w2"] = jnp.stack(w2s).astype(jnp.bfloat16)           # (L, F, E)
    params["b2"] = jnp.stack(b2s)                                # (L, 1, E)
    params["ln2_g"] = jnp.stack(ln2g); params["ln2_b"] = jnp.stack(ln2b)
    return params


def action_transformer_forward(src, params, *, num_classes):
    S, B, In = src.shape
    # batch-major internal layout: one transpose in, one transpose out
    xb = jnp.transpose(src, (1, 0, 2)).reshape(B * S, In)
    # PE for the first S positions, embedding bias folded in (no (B*S, E) broadcast in HBM)
    pe_b = params["pe"][:S] + params["emb_b"][None, :]
    logits = fused_forward(xb, pe_b, params, B=B, S=S)[:, :num_classes]
    return jnp.transpose(logits.reshape(B, S, num_classes), (1, 0, 2))      # (S, B, C)


# ---------------------------------------------------------------------------
# Main
# ---------------------------------------------------------------------------
if __name__ == "__main__":
    S, B = 8, 2
    input_dim = 16
    d_model = 32
    nhead = 4
    num_layers = 2
    num_classes = 10
    dim_ff = 2048          # nn.TransformerEncoderLayer default dim_feedforward

    key = jax.random.PRNGKey(0)
    k_x, k_p = jax.random.split(key)
    src = jax.random.normal(k_x, (S, B, input_dim), jnp.float32)
    params = init_params(k_p, input_dim, d_model, nhead, num_layers, num_classes, dim_ff)

    fwd = jax.jit(functools.partial(action_transformer_forward, num_classes=num_classes))
    out = fwd(src, params)
    out = jax.block_until_ready(out)
    assert out.shape == (S, B, num_classes)
    assert bool(jnp.all(jnp.isfinite(out)))
    print("KERNEL_OK")
</pallas_src>

<mosaic_0001>
module attributes {stable_mosaic.version = 11 : i64} {
  func.func @_model_kernel(%arg0: i32, %arg1: memref<8x16xf32, #tpu.memory_space<vmem>>, %arg2: memref<8x32xf32, #tpu.memory_space<vmem>>, %arg3: memref<16x32xbf16, #tpu.memory_space<vmem>>, %arg4: memref<2x12x32x8xbf16, #tpu.memory_space<vmem>>, %arg5: memref<2x12x1x8xf32, #tpu.memory_space<vmem>>, %arg6: memref<2x4x8x32xbf16, #tpu.memory_space<vmem>>, %arg7: memref<2x1x32xf32, #tpu.memory_space<vmem>>, %arg8: memref<2x1x32xf32, #tpu.memory_space<vmem>>, %arg9: memref<2x1x32xf32, #tpu.memory_space<vmem>>, %arg10: memref<2x32x2048xbf16, #tpu.memory_space<vmem>>, %arg11: memref<2x1x2048xf32, #tpu.memory_space<vmem>>, %arg12: memref<2x2048x32xbf16, #tpu.memory_space<vmem>>, %arg13: memref<2x1x32xf32, #tpu.memory_space<vmem>>, %arg14: memref<2x1x32xf32, #tpu.memory_space<vmem>>, %arg15: memref<2x1x32xf32, #tpu.memory_space<vmem>>, %arg16: memref<32x128xbf16, #tpu.memory_space<vmem>>, %arg17: memref<1x128xf32, #tpu.memory_space<vmem>>, %arg18: memref<8x128xf32, #tpu.memory_space<vmem>>) attributes {dimension_semantics = [#tpu.dimension_semantics<parallel>], iteration_bounds = array<i64: 2>, scalar_prefetch = 0 : i64, scratch_operands = 0 : i64, tpu.core_type = #tpu.core_type<tc>, window_params = [{transform_indices = @transform_0, window_bounds = array<i64: 8, 16>}, {pipeline_mode = #tpu.pipeline_mode<synchronous>, transform_indices = @transform_1, window_bounds = array<i64: 8, 32>}, {pipeline_mode = #tpu.pipeline_mode<synchronous>, transform_indices = @transform_2, window_bounds = array<i64: 16, 32>}, {pipeline_mode = #tpu.pipeline_mode<synchronous>, transform_indices = @transform_3, window_bounds = array<i64: 2, 12, 32, 8>}, {pipeline_mode = #tpu.pipeline_mode<synchronous>, transform_indices = @transform_4, window_bounds = array<i64: 2, 12, 1, 8>}, {pipeline_mode = #tpu.pipeline_mode<synchronous>, transform_indices = @transform_5, window_bounds = array<i64: 2, 4, 8, 32>}, {pipeline_mode = #tpu.pipeline_mode<synchronous>, transform_indices = @transform_6, window_bounds = array<i64: 2, 1, 32>}, {pipeline_mode = #tpu.pipeline_mode<synchronous>, transform_indices = @transform_7, window_bounds = array<i64: 2, 1, 32>}, {pipeline_mode = #tpu.pipeline_mode<synchronous>, transform_indices = @transform_8, window_bounds = array<i64: 2, 1, 32>}, {pipeline_mode = #tpu.pipeline_mode<synchronous>, transform_indices = @transform_9, window_bounds = array<i64: 2, 32, 2048>}, {pipeline_mode = #tpu.pipeline_mode<synchronous>, transform_indices = @transform_10, window_bounds = array<i64: 2, 1, 2048>}, {pipeline_mode = #tpu.pipeline_mode<synchronous>, transform_indices = @transform_11, window_bounds = array<i64: 2, 2048, 32>}, {pipeline_mode = #tpu.pipeline_mode<synchronous>, transform_indices = @transform_12, window_bounds = array<i64: 2, 1, 32>}, {pipeline_mode = #tpu.pipeline_mode<synchronous>, transform_indices = @transform_13, window_bounds = array<i64: 2, 1, 32>}, {pipeline_mode = #tpu.pipeline_mode<synchronous>, transform_indices = @transform_14, window_bounds = array<i64: 2, 1, 32>}, {pipeline_mode = #tpu.pipeline_mode<synchronous>, transform_indices = @transform_15, window_bounds = array<i64: 32, 128>}, {pipeline_mode = #tpu.pipeline_mode<synchronous>, transform_indices = @transform_16, window_bounds = array<i64: 1, 128>}, {transform_indices = @transform_17, window_bounds = array<i64: 8, 128>}]} {
    %c0 = arith.constant 0 : index
    %c0_0 = arith.constant 0 : index
    %0 = vector.load %arg1[%c0, %c0_0] : memref<8x16xf32, #tpu.memory_space<vmem>>, vector<8x16xf32>
    %1 = arith.truncf %0 : vector<8x16xf32> to vector<8x16xbf16>
    %c0_1 = arith.constant 0 : index
    %c0_2 = arith.constant 0 : index
    %2 = vector.load %arg3[%c0_1, %c0_2] : memref<16x32xbf16, #tpu.memory_space<vmem>>, vector<16x32xbf16>
    %cst = arith.constant dense<0.000000e+00> : vector<8x32xf32>
    %3 = tpu.matmul %1, %2, %cst {dimension_numbers = #tpu.dot_dimension_numbers<[1], [0], [0], [1], [0, 0, 1, 1], [], []>} : vector<8x16xbf16>, vector<16x32xbf16>, vector<8x32xf32> -> vector<8x32xf32>
    %c0_3 = arith.constant 0 : index
    %c0_4 = arith.constant 0 : index
    %4 = vector.load %arg2[%c0_3, %c0_4] : memref<8x32xf32, #tpu.memory_space<vmem>>, vector<8x32xf32>
    %5 = arith.addf %3, %4 : vector<8x32xf32>
    %6 = arith.truncf %5 : vector<8x32xf32> to vector<8x32xbf16>
    %7 = vector.shape_cast %6 : vector<8x32xbf16> to vector<1x8x32xbf16>
    %8 = vector.shape_cast %7 : vector<1x8x32xbf16> to vector<1x8x32xbf16>
    %9 = vector.broadcast %8 : vector<1x8x32xbf16> to vector<12x8x32xbf16>
    %c0_5 = arith.constant 0 : index
    %c0_6 = arith.constant 0 : index
    %c0_7 = arith.constant 0 : index
    %c0_8 = arith.constant 0 : index
    %10 = vector.load %arg4[%c0_5, %c0_6, %c0_7, %c0_8] : memref<2x12x32x8xbf16, #tpu.memory_space<vmem>>, vector<1x12x32x8xbf16>
    %11 = vector.shape_cast %10 : vector<1x12x32x8xbf16> to vector<12x32x8xbf16>
    %cst_9 = arith.constant dense<0.000000e+00> : vector<12x8x8xf32>
    %12 = tpu.matmul %9, %11, %cst_9 {dimension_numbers = #tpu.dot_dimension_numbers<[2], [1], [1], [2], [0, 0, 0, 1, 1, 2], [0], [0]>} : vector<12x8x32xbf16>, vector<12x32x8xbf16>, vector<12x8x8xf32> -> vector<12x8x8xf32>
    %c0_10 = arith.constant 0 : index
    %c0_11 = arith.constant 0 : index
    %c0_12 = arith.constant 0 : index
    %c0_13 = arith.constant 0 : index
    %13 = vector.load %arg5[%c0_10, %c0_11, %c0_12, %c0_13] : memref<2x12x1x8xf32, #tpu.memory_space<vmem>>, vector<1x12x1x8xf32>
    %14 = vector.shape_cast %13 : vector<1x12x1x8xf32> to vector<12x1x8xf32>
    %15 = vector.broadcast %14 : vector<12x1x8xf32> to vector<12x8x8xf32>
    %16 = arith.addf %12, %15 : vector<12x8x8xf32>
    %17 = vector.extract_strided_slice %16 {offsets = [0, 0, 0], sizes = [4, 8, 8], strides = [1, 1, 1]} : vector<12x8x8xf32> to vector<4x8x8xf32>
    %18 = vector.extract_strided_slice %16 {offsets = [4, 0, 0], sizes = [4, 8, 8], strides = [1, 1, 1]} : vector<12x8x8xf32> to vector<4x8x8xf32>
    %19 = vector.extract_strided_slice %16 {offsets = [8, 0, 0], sizes = [4, 8, 8], strides = [1, 1, 1]} : vector<12x8x8xf32> to vector<4x8x8xf32>
    %20 = arith.truncf %17 : vector<4x8x8xf32> to vector<4x8x8xbf16>
    %21 = arith.truncf %18 : vector<4x8x8xf32> to vector<4x8x8xbf16>
    %cst_14 = arith.constant dense<0.000000e+00> : vector<4x8x8xf32>
    %22 = tpu.matmul %20, %21, %cst_14 {dimension_numbers = #tpu.dot_dimension_numbers<[2], [2], [1], [1], [0, 0, 0, 1, 1, 1], [0], [0]>} : vector<4x8x8xbf16>, vector<4x8x8xbf16>, vector<4x8x8xf32> -> vector<4x8x8xf32>
    %cst_15 = arith.constant dense<0xFF800000> : vector<4x8xf32>
    %23 = vector.multi_reduction <maximumf>, %22, %cst_15 [2] : vector<4x8x8xf32> to vector<4x8xf32>
    %24 = vector.shape_cast %23 : vector<4x8xf32> to vector<4x8x1xf32>
    %25 = vector.broadcast %24 : vector<4x8x1xf32> to vector<4x8x8xf32>
    %26 = arith.subf %22, %25 : vector<4x8x8xf32>
    %27 = math.exp %26 : vector<4x8x8xf32>
    %cst_16 = arith.constant dense<0.000000e+00> : vector<4x8xf32>
    %28 = vector.multi_reduction <add>, %27, %cst_16 [2] : vector<4x8x8xf32> to vector<4x8xf32>
    %29 = vector.shape_cast %28 : vector<4x8xf32> to vector<4x8x1xf32>
    %30 = tpu.reciprocal %29 {approx = true} : vector<4x8x1xf32> -> vector<4x8x1xf32>
    %31 = vector.broadcast %30 : vector<4x8x1xf32> to vector<4x8x8xf32>
    %32 = arith.mulf %27, %31 : vector<4x8x8xf32>
    %33 = arith.truncf %32 : vector<4x8x8xf32> to vector<4x8x8xbf16>
    %34 = arith.truncf %19 : vector<4x8x8xf32> to vector<4x8x8xbf16>
    %cst_17 = arith.constant dense<0.000000e+00> : vector<4x8x8xf32>
    %35 = tpu.matmul %33, %34, %cst_17 {dimension_numbers = #tpu.dot_dimension_numbers<[2], [1], [1], [2], [0, 0, 0, 1, 1, 2], [0], [0]>} : vector<4x8x8xbf16>, vector<4x8x8xbf16>, vector<4x8x8xf32> -> vector<4x8x8xf32>
    %36 = arith.truncf %35 : vector<4x8x8xf32> to vector<4x8x8xbf16>
    %c0_18 = arith.constant 0 : index
    %c0_19 = arith.constant 0 : index
    %c0_20 = arith.constant 0 : index
    %c0_21 = arith.constant 0 : index
    %37 = vector.load %arg6[%c0_18, %c0_19, %c0_20, %c0_21] : memref<2x4x8x32xbf16, #tpu.memory_space<vmem>>, vector<1x4x8x32xbf16>
    %38 = vector.shape_cast %37 : vector<1x4x8x32xbf16> to vector<4x8x32xbf16>
    %cst_22 = arith.constant dense<0.000000e+00> : vector<4x8x32xf32>
    %39 = tpu.matmul %36, %38, %cst_22 {dimension_numbers = #tpu.dot_dimension_numbers<[2], [1], [1], [2], [0, 0, 0, 1, 1, 2], [0], [0]>} : vector<4x8x8xbf16>, vector<4x8x32xbf16>, vector<4x8x32xf32> -> vector<4x8x32xf32>
    %cst_23 = arith.constant dense<0.000000e+00> : vector<8x32xf32>
    %40 = vector.multi_reduction <add>, %39, %cst_23 [0] : vector<4x8x32xf32> to vector<8x32xf32>
    %41 = arith.addf %5, %40 : vector<8x32xf32>
    %c0_24 = arith.constant 0 : index
    %c0_25 = arith.constant 0 : index
    %c0_26 = arith.constant 0 : index
    %42 = vector.load %arg7[%c0_24, %c0_25, %c0_26] : memref<2x1x32xf32, #tpu.memory_space<vmem>>, vector<1x1x32xf32>
    %43 = vector.shape_cast %42 : vector<1x1x32xf32> to vector<1x32xf32>
    %44 = vector.broadcast %43 : vector<1x32xf32> to vector<8x32xf32>
    %45 = arith.addf %41, %44 : vector<8x32xf32>
    %c0_27 = arith.constant 0 : index
    %c0_28 = arith.constant 0 : index
    %c0_29 = arith.constant 0 : index
    %46 = vector.load %arg8[%c0_27, %c0_28, %c0_29] : memref<2x1x32xf32, #tpu.memory_space<vmem>>, vector<1x1x32xf32>
    %47 = vector.shape_cast %46 : vector<1x1x32xf32> to vector<1x32xf32>
    %c0_30 = arith.constant 0 : index
    %c0_31 = arith.constant 0 : index
    %c0_32 = arith.constant 0 : index
    %48 = vector.load %arg9[%c0_30, %c0_31, %c0_32] : memref<2x1x32xf32, #tpu.memory_space<vmem>>, vector<1x1x32xf32>
    %49 = vector.shape_cast %48 : vector<1x1x32xf32> to vector<1x32xf32>
    %cst_33 = arith.constant dense<0.000000e+00> : vector<8xf32>
    %50 = vector.multi_reduction <add>, %45, %cst_33 [1] : vector<8x32xf32> to vector<8xf32>
    %51 = vector.shape_cast %50 : vector<8xf32> to vector<8x1xf32>
    %cst_34 = arith.constant 3.200000e+01 : f32
    %52 = vector.broadcast %cst_34 : f32 to vector<8x1xf32>
    %53 = arith.divf %51, %52 : vector<8x1xf32>
    %54 = vector.broadcast %53 : vector<8x1xf32> to vector<8x32xf32>
    %55 = arith.subf %45, %54 : vector<8x32xf32>
    %56 = arith.mulf %55, %55 : vector<8x32xf32>
    %cst_35 = arith.constant dense<0.000000e+00> : vector<8xf32>
    %57 = vector.multi_reduction <add>, %56, %cst_35 [1] : vector<8x32xf32> to vector<8xf32>
    %58 = vector.shape_cast %57 : vector<8xf32> to vector<8x1xf32>
    %cst_36 = arith.constant 3.200000e+01 : f32
    %59 = vector.broadcast %cst_36 : f32 to vector<8x1xf32>
    %60 = arith.divf %58, %59 : vector<8x1xf32>
    %cst_37 = arith.constant 9.99999974E-6 : f32
    %61 = vector.broadcast %cst_37 : f32 to vector<8x1xf32>
    %62 = arith.addf %60, %61 : vector<8x1xf32>
    %63 = math.rsqrt %62 : vector<8x1xf32>
    %64 = vector.broadcast %63 : vector<8x1xf32> to vector<8x32xf32>
    %65 = arith.mulf %55, %64 : vector<8x32xf32>
    %66 = vector.broadcast %47 : vector<1x32xf32> to vector<8x32xf32>
    %67 = arith.mulf %65, %66 : vector<8x32xf32>
    %68 = vector.broadcast %49 : vector<1x32xf32> to vector<8x32xf32>
    %69 = arith.addf %67, %68 : vector<8x32xf32>
    %70 = arith.truncf %69 : vector<8x32xf32> to vector<8x32xbf16>
    %c0_38 = arith.constant 0 : index
    %c0_39 = arith.constant 0 : index
    %c0_40 = arith.constant 0 : index
    %71 = vector.load %arg10[%c0_38, %c0_39, %c0_40] : memref<2x32x2048xbf16, #tpu.memory_space<vmem>>, vector<1x32x2048xbf16>
    %72 = vector.shape_cast %71 : vector<1x32x2048xbf16> to vector<32x2048xbf16>
    %cst_41 = arith.constant dense<0.000000e+00> : vector<8x2048xf32>
    %73 = tpu.matmul %70, %72, %cst_41 {dimension_numbers = #tpu.dot_dimension_numbers<[1], [0], [0], [1], [0, 0, 1, 1], [], []>} : vector<8x32xbf16>, vector<32x2048xbf16>, vector<8x2048xf32> -> vector<8x2048xf32>
    %c0_42 = arith.constant 0 : index
    %c0_43 = arith.constant 0 : index
    %c0_44 = arith.constant 0 : index
    %74 = vector.load %arg11[%c0_42, %c0_43, %c0_44] : memref<2x1x2048xf32, #tpu.memory_space<vmem>>, vector<1x1x2048xf32>
    %75 = vector.shape_cast %74 : vector<1x1x2048xf32> to vector<1x2048xf32>
    %76 = vector.broadcast %75 : vector<1x2048xf32> to vector<8x2048xf32>
    %77 = arith.addf %73, %76 : vector<8x2048xf32>
    %cst_45 = arith.constant 0.000000e+00 : f32
    %78 = vector.broadcast %cst_45 : f32 to vector<8x2048xf32>
    %79 = arith.maximumf %77, %78 : vector<8x2048xf32>
    %80 = arith.truncf %79 : vector<8x2048xf32> to vector<8x2048xbf16>
    %c0_46 = arith.constant 0 : index
    %c0_47 = arith.constant 0 : index
    %c0_48 = arith.constant 0 : index
    %81 = vector.load %arg12[%c0_46, %c0_47, %c0_48] : memref<2x2048x32xbf16, #tpu.memory_space<vmem>>, vector<1x2048x32xbf16>
    %82 = vector.shape_cast %81 : vector<1x2048x32xbf16> to vector<2048x32xbf16>
    %cst_49 = arith.constant dense<0.000000e+00> : vector<8x32xf32>
    %83 = tpu.matmul %80, %82, %cst_49 {dimension_numbers = #tpu.dot_dimension_numbers<[1], [0], [0], [1], [0, 0, 1, 1], [], []>} : vector<8x2048xbf16>, vector<2048x32xbf16>, vector<8x32xf32> -> vector<8x32xf32>
    %c0_50 = arith.constant 0 : index
    %c0_51 = arith.constant 0 : index
    %c0_52 = arith.constant 0 : index
    %84 = vector.load %arg13[%c0_50, %c0_51, %c0_52] : memref<2x1x32xf32, #tpu.memory_space<vmem>>, vector<1x1x32xf32>
    %85 = vector.shape_cast %84 : vector<1x1x32xf32> to vector<1x32xf32>
    %86 = vector.broadcast %85 : vector<1x32xf32> to vector<8x32xf32>
    %87 = arith.addf %83, %86 : vector<8x32xf32>
    %88 = arith.addf %69, %87 : vector<8x32xf32>
    %c0_53 = arith.constant 0 : index
    %c0_54 = arith.constant 0 : index
    %c0_55 = arith.constant 0 : index
    %89 = vector.load %arg14[%c0_53, %c0_54, %c0_55] : memref<2x1x32xf32, #tpu.memory_space<vmem>>, vector<1x1x32xf32>
    %90 = vector.shape_cast %89 : vector<1x1x32xf32> to vector<1x32xf32>
    %c0_56 = arith.constant 0 : index
    %c0_57 = arith.constant 0 : index
    %c0_58 = arith.constant 0 : index
    %91 = vector.load %arg15[%c0_56, %c0_57, %c0_58] : memref<2x1x32xf32, #tpu.memory_space<vmem>>, vector<1x1x32xf32>
    %92 = vector.shape_cast %91 : vector<1x1x32xf32> to vector<1x32xf32>
    %cst_59 = arith.constant dense<0.000000e+00> : vector<8xf32>
    %93 = vector.multi_reduction <add>, %88, %cst_59 [1] : vector<8x32xf32> to vector<8xf32>
    %94 = vector.shape_cast %93 : vector<8xf32> to vector<8x1xf32>
    %cst_60 = arith.constant 3.200000e+01 : f32
    %95 = vector.broadcast %cst_60 : f32 to vector<8x1xf32>
    %96 = arith.divf %94, %95 : vector<8x1xf32>
    %97 = vector.broadcast %96 : vector<8x1xf32> to vector<8x32xf32>
    %98 = arith.subf %88, %97 : vector<8x32xf32>
    %99 = arith.mulf %98, %98 : vector<8x32xf32>
    %cst_61 = arith.constant dense<0.000000e+00> : vector<8xf32>
    %100 = vector.multi_reduction <add>, %99, %cst_61 [1] : vector<8x32xf32> to vector<8xf32>
    %101 = vector.shape_cast %100 : vector<8xf32> to vector<8x1xf32>
    %cst_62 = arith.constant 3.200000e+01 : f32
    %102 = vector.broadcast %cst_62 : f32 to vector<8x1xf32>
    %103 = arith.divf %101, %102 : vector<8x1xf32>
    %cst_63 = arith.constant 9.99999974E-6 : f32
    %104 = vector.broadcast %cst_63 : f32 to vector<8x1xf32>
    %105 = arith.addf %103, %104 : vector<8x1xf32>
    %106 = math.rsqrt %105 : vector<8x1xf32>
    %107 = vector.broadcast %106 : vector<8x1xf32> to vector<8x32xf32>
    %108 = arith.mulf %98, %107 : vector<8x32xf32>
    %109 = vector.broadcast %90 : vector<1x32xf32> to vector<8x32xf32>
    %110 = arith.mulf %108, %109 : vector<8x32xf32>
    %111 = vector.broadcast %92 : vector<1x32xf32> to vector<8x32xf32>
    %112 = arith.addf %110, %111 : vector<8x32xf32>
    %113 = arith.truncf %112 : vector<8x32xf32> to vector<8x32xbf16>
    %114 = vector.shape_cast %113 : vector<8x32xbf16> to vector<1x8x32xbf16>
    %115 = vector.shape_cast %114 : vector<1x8x32xbf16> to vector<1x8x32xbf16>
    %116 = vector.broadcast %115 : vector<1x8x32xbf16> to vector<12x8x32xbf16>
    %c1 = arith.constant 1 : index
    %c0_64 = arith.constant 0 : index
    %c0_65 = arith.constant 0 : index
    %c0_66 = arith.constant 0 : index
    %117 = vector.load %arg4[%c1, %c0_64, %c0_65, %c0_66] : memref<2x12x32x8xbf16, #tpu.memory_space<vmem>>, vector<1x12x32x8xbf16>
    %118 = vector.shape_cast %117 : vector<1x12x32x8xbf16> to vector<12x32x8xbf16>
    %cst_67 = arith.constant dense<0.000000e+00> : vector<12x8x8xf32>
    %119 = tpu.matmul %116, %118, %cst_67 {dimension_numbers = #tpu.dot_dimension_numbers<[2], [1], [1], [2], [0, 0, 0, 1, 1, 2], [0], [0]>} : vector<12x8x32xbf16>, vector<12x32x8xbf16>, vector<12x8x8xf32> -> vector<12x8x8xf32>
    %c1_68 = arith.constant 1 : index
    %c0_69 = arith.constant 0 : index
    %c0_70 = arith.constant 0 : index
    %c0_71 = arith.constant 0 : index
    %120 = vector.load %arg5[%c1_68, %c0_69, %c0_70, %c0_71] : memref<2x12x1x8xf32, #tpu.memory_space<vmem>>, vector<1x12x1x8xf32>
    %121 = vector.shape_cast %120 : vector<1x12x1x8xf32> to vector<12x1x8xf32>
    %122 = vector.broadcast %121 : vector<12x1x8xf32> to vector<12x8x8xf32>
    %123 = arith.addf %119, %122 : vector<12x8x8xf32>
    %124 = vector.extract_strided_slice %123 {offsets = [0, 0, 0], sizes = [4, 8, 8], strides = [1, 1, 1]} : vector<12x8x8xf32> to vector<4x8x8xf32>
    %125 = vector.extract_strided_slice %123 {offsets = [4, 0, 0], sizes = [4, 8, 8], strides = [1, 1, 1]} : vector<12x8x8xf32> to vector<4x8x8xf32>
    %126 = vector.extract_strided_slice %123 {offsets = [8, 0, 0], sizes = [4, 8, 8], strides = [1, 1, 1]} : vector<12x8x8xf32> to vector<4x8x8xf32>
    %127 = arith.truncf %124 : vector<4x8x8xf32> to vector<4x8x8xbf16>
    %128 = arith.truncf %125 : vector<4x8x8xf32> to vector<4x8x8xbf16>
    %cst_72 = arith.constant dense<0.000000e+00> : vector<4x8x8xf32>
    %129 = tpu.matmul %127, %128, %cst_72 {dimension_numbers = #tpu.dot_dimension_numbers<[2], [2], [1], [1], [0, 0, 0, 1, 1, 1], [0], [0]>} : vector<4x8x8xbf16>, vector<4x8x8xbf16>, vector<4x8x8xf32> -> vector<4x8x8xf32>
    %cst_73 = arith.constant dense<0xFF800000> : vector<4x8xf32>
    %130 = vector.multi_reduction <maximumf>, %129, %cst_73 [2] : vector<4x8x8xf32> to vector<4x8xf32>
    %131 = vector.shape_cast %130 : vector<4x8xf32> to vector<4x8x1xf32>
    %132 = vector.broadcast %131 : vector<4x8x1xf32> to vector<4x8x8xf32>
    %133 = arith.subf %129, %132 : vector<4x8x8xf32>
    %134 = math.exp %133 : vector<4x8x8xf32>
    %cst_74 = arith.constant dense<0.000000e+00> : vector<4x8xf32>
    %135 = vector.multi_reduction <add>, %134, %cst_74 [2] : vector<4x8x8xf32> to vector<4x8xf32>
    %136 = vector.shape_cast %135 : vector<4x8xf32> to vector<4x8x1xf32>
    %137 = tpu.reciprocal %136 {approx = true} : vector<4x8x1xf32> -> vector<4x8x1xf32>
    %138 = vector.broadcast %137 : vector<4x8x1xf32> to vector<4x8x8xf32>
    %139 = arith.mulf %134, %138 : vector<4x8x8xf32>
    %140 = arith.truncf %139 : vector<4x8x8xf32> to vector<4x8x8xbf16>
    %141 = arith.truncf %126 : vector<4x8x8xf32> to vector<4x8x8xbf16>
    %cst_75 = arith.constant dense<0.000000e+00> : vector<4x8x8xf32>
    %142 = tpu.matmul %140, %141, %cst_75 {dimension_numbers = #tpu.dot_dimension_numbers<[2], [1], [1], [2], [0, 0, 0, 1, 1, 2], [0], [0]>} : vector<4x8x8xbf16>, vector<4x8x8xbf16>, vector<4x8x8xf32> -> vector<4x8x8xf32>
    %143 = arith.truncf %142 : vector<4x8x8xf32> to vector<4x8x8xbf16>
    %c1_76 = arith.constant 1 : index
    %c0_77 = arith.constant 0 : index
    %c0_78 = arith.constant 0 : index
    %c0_79 = arith.constant 0 : index
    %144 = vector.load %arg6[%c1_76, %c0_77, %c0_78, %c0_79] : memref<2x4x8x32xbf16, #tpu.memory_space<vmem>>, vector<1x4x8x32xbf16>
    %145 = vector.shape_cast %144 : vector<1x4x8x32xbf16> to vector<4x8x32xbf16>
    %cst_80 = arith.constant dense<0.000000e+00> : vector<4x8x32xf32>
    %146 = tpu.matmul %143, %145, %cst_80 {dimension_numbers = #tpu.dot_dimension_numbers<[2], [1], [1], [2], [0, 0, 0, 1, 1, 2], [0], [0]>} : vector<4x8x8xbf16>, vector<4x8x32xbf16>, vector<4x8x32xf32> -> vector<4x8x32xf32>
    %cst_81 = arith.constant dense<0.000000e+00> : vector<8x32xf32>
    %147 = vector.multi_reduction <add>, %146, %cst_81 [0] : vector<4x8x32xf32> to vector<8x32xf32>
    %148 = arith.addf %112, %147 : vector<8x32xf32>
    %c1_82 = arith.constant 1 : index
    %c0_83 = arith.constant 0 : index
    %c0_84 = arith.constant 0 : index
    %149 = vector.load %arg7[%c1_82, %c0_83, %c0_84] : memref<2x1x32xf32, #tpu.memory_space<vmem>>, vector<1x1x32xf32>
    %150 = vector.shape_cast %149 : vector<1x1x32xf32> to vector<1x32xf32>
    %151 = vector.broadcast %150 : vector<1x32xf32> to vector<8x32xf32>
    %152 = arith.addf %148, %151 : vector<8x32xf32>
    %c1_85 = arith.constant 1 : index
    %c0_86 = arith.constant 0 : index
    %c0_87 = arith.constant 0 : index
    %153 = vector.load %arg8[%c1_85, %c0_86, %c0_87] : memref<2x1x32xf32, #tpu.memory_space<vmem>>, vector<1x1x32xf32>
    %154 = vector.shape_cast %153 : vector<1x1x32xf32> to vector<1x32xf32>
    %c1_88 = arith.constant 1 : index
    %c0_89 = arith.constant 0 : index
    %c0_90 = arith.constant 0 : index
    %155 = vector.load %arg9[%c1_88, %c0_89, %c0_90] : memref<2x1x32xf32, #tpu.memory_space<vmem>>, vector<1x1x32xf32>
    %156 = vector.shape_cast %155 : vector<1x1x32xf32> to vector<1x32xf32>
    %cst_91 = arith.constant dense<0.000000e+00> : vector<8xf32>
    %157 = vector.multi_reduction <add>, %152, %cst_91 [1] : vector<8x32xf32> to vector<8xf32>
    %158 = vector.shape_cast %157 : vector<8xf32> to vector<8x1xf32>
    %cst_92 = arith.constant 3.200000e+01 : f32
    %159 = vector.broadcast %cst_92 : f32 to vector<8x1xf32>
    %160 = arith.divf %158, %159 : vector<8x1xf32>
    %161 = vector.broadcast %160 : vector<8x1xf32> to vector<8x32xf32>
    %162 = arith.subf %152, %161 : vector<8x32xf32>
    %163 = arith.mulf %162, %162 : vector<8x32xf32>
    %cst_93 = arith.constant dense<0.000000e+00> : vector<8xf32>
    %164 = vector.multi_reduction <add>, %163, %cst_93 [1] : vector<8x32xf32> to vector<8xf32>
    %165 = vector.shape_cast %164 : vector<8xf32> to vector<8x1xf32>
    %cst_94 = arith.constant 3.200000e+01 : f32
    %166 = vector.broadcast %cst_94 : f32 to vector<8x1xf32>
    %167 = arith.divf %165, %166 : vector<8x1xf32>
    %cst_95 = arith.constant 9.99999974E-6 : f32
    %168 = vector.broadcast %cst_95 : f32 to vector<8x1xf32>
    %169 = arith.addf %167, %168 : vector<8x1xf32>
    %170 = math.rsqrt %169 : vector<8x1xf32>
    %171 = vector.broadcast %170 : vector<8x1xf32> to vector<8x32xf32>
    %172 = arith.mulf %162, %171 : vector<8x32xf32>
    %173 = vector.broadcast %154 : vector<1x32xf32> to vector<8x32xf32>
    %174 = arith.mulf %172, %173 : vector<8x32xf32>
    %175 = vector.broadcast %156 : vector<1x32xf32> to vector<8x32xf32>
    %176 = arith.addf %174, %175 : vector<8x32xf32>
    %177 = arith.truncf %176 : vector<8x32xf32> to vector<8x32xbf16>
    %c1_96 = arith.constant 1 : index
    %c0_97 = arith.constant 0 : index
    %c0_98 = arith.constant 0 : index
    %178 = vector.load %arg10[%c1_96, %c0_97, %c0_98] : memref<2x32x2048xbf16, #tpu.memory_space<vmem>>, vector<1x32x2048xbf16>
    %179 = vector.shape_cast %178 : vector<1x32x2048xbf16> to vector<32x2048xbf16>
    %cst_99 = arith.constant dense<0.000000e+00> : vector<8x2048xf32>
    %180 = tpu.matmul %177, %179, %cst_99 {dimension_numbers = #tpu.dot_dimension_numbers<[1], [0], [0], [1], [0, 0, 1, 1], [], []>} : vector<8x32xbf16>, vector<32x2048xbf16>, vector<8x2048xf32> -> vector<8x2048xf32>
    %c1_100 = arith.constant 1 : index
    %c0_101 = arith.constant 0 : index
    %c0_102 = arith.constant 0 : index
    %181 = vector.load %arg11[%c1_100, %c0_101, %c0_102] : memref<2x1x2048xf32, #tpu.memory_space<vmem>>, vector<1x1x2048xf32>
    %182 = vector.shape_cast %181 : vector<1x1x2048xf32> to vector<1x2048xf32>
    %183 = vector.broadcast %182 : vector<1x2048xf32> to vector<8x2048xf32>
    %184 = arith.addf %180, %183 : vector<8x2048xf32>
    %cst_103 = arith.constant 0.000000e+00 : f32
    %185 = vector.broadcast %cst_103 : f32 to vector<8x2048xf32>
    %186 = arith.maximumf %184, %185 : vector<8x2048xf32>
    %187 = arith.truncf %186 : vector<8x2048xf32> to vector<8x2048xbf16>
    %c1_104 = arith.constant 1 : index
    %c0_105 = arith.constant 0 : index
    %c0_106 = arith.constant 0 : index
    %188 = vector.load %arg12[%c1_104, %c0_105, %c0_106] : memref<2x2048x32xbf16, #tpu.memory_space<vmem>>, vector<1x2048x32xbf16>
    %189 = vector.shape_cast %188 : vector<1x2048x32xbf16> to vector<2048x32xbf16>
    %cst_107 = arith.constant dense<0.000000e+00> : vector<8x32xf32>
    %190 = tpu.matmul %187, %189, %cst_107 {dimension_numbers = #tpu.dot_dimension_numbers<[1], [0], [0], [1], [0, 0, 1, 1], [], []>} : vector<8x2048xbf16>, vector<2048x32xbf16>, vector<8x32xf32> -> vector<8x32xf32>
    %c1_108 = arith.constant 1 : index
    %c0_109 = arith.constant 0 : index
    %c0_110 = arith.constant 0 : index
    %191 = vector.load %arg13[%c1_108, %c0_109, %c0_110] : memref<2x1x32xf32, #tpu.memory_space<vmem>>, vector<1x1x32xf32>
    %192 = vector.shape_cast %191 : vector<1x1x32xf32> to vector<1x32xf32>
    %193 = vector.broadcast %192 : vector<1x32xf32> to vector<8x32xf32>
    %194 = arith.addf %190, %193 : vector<8x32xf32>
    %195 = arith.addf %176, %194 : vector<8x32xf32>
    %c1_111 = arith.constant 1 : index
    %c0_112 = arith.constant 0 : index
    %c0_113 = arith.constant 0 : index
    %196 = vector.load %arg14[%c1_111, %c0_112, %c0_113] : memref<2x1x32xf32, #tpu.memory_space<vmem>>, vector<1x1x32xf32>
    %197 = vector.shape_cast %196 : vector<1x1x32xf32> to vector<1x32xf32>
    %c1_114 = arith.constant 1 : index
    %c0_115 = arith.constant 0 : index
    %c0_116 = arith.constant 0 : index
    %198 = vector.load %arg15[%c1_114, %c0_115, %c0_116] : memref<2x1x32xf32, #tpu.memory_space<vmem>>, vector<1x1x32xf32>
    %199 = vector.shape_cast %198 : vector<1x1x32xf32> to vector<1x32xf32>
    %cst_117 = arith.constant dense<0.000000e+00> : vector<8xf32>
    %200 = vector.multi_reduction <add>, %195, %cst_117 [1] : vector<8x32xf32> to vector<8xf32>
    %201 = vector.shape_cast %200 : vector<8xf32> to vector<8x1xf32>
    %cst_118 = arith.constant 3.200000e+01 : f32
    %202 = vector.broadcast %cst_118 : f32 to vector<8x1xf32>
    %203 = arith.divf %201, %202 : vector<8x1xf32>
    %204 = vector.broadcast %203 : vector<8x1xf32> to vector<8x32xf32>
    %205 = arith.subf %195, %204 : vector<8x32xf32>
    %206 = arith.mulf %205, %205 : vector<8x32xf32>
    %cst_119 = arith.constant dense<0.000000e+00> : vector<8xf32>
    %207 = vector.multi_reduction <add>, %206, %cst_119 [1] : vector<8x32xf32> to vector<8xf32>
    %208 = vector.shape_cast %207 : vector<8xf32> to vector<8x1xf32>
    %cst_120 = arith.constant 3.200000e+01 : f32
    %209 = vector.broadcast %cst_120 : f32 to vector<8x1xf32>
    %210 = arith.divf %208, %209 : vector<8x1xf32>
    %cst_121 = arith.constant 9.99999974E-6 : f32
    %211 = vector.broadcast %cst_121 : f32 to vector<8x1xf32>
    %212 = arith.addf %210, %211 : vector<8x1xf32>
    %213 = math.rsqrt %212 : vector<8x1xf32>
    %214 = vector.broadcast %213 : vector<8x1xf32> to vector<8x32xf32>
    %215 = arith.mulf %205, %214 : vector<8x32xf32>
    %216 = vector.broadcast %197 : vector<1x32xf32> to vector<8x32xf32>
    %217 = arith.mulf %215, %216 : vector<8x32xf32>
    %218 = vector.broadcast %199 : vector<1x32xf32> to vector<8x32xf32>
    %219 = arith.addf %217, %218 : vector<8x32xf32>
    %220 = arith.truncf %219 : vector<8x32xf32> to vector<8x32xbf16>
    %c0_122 = arith.constant 0 : index
    %c0_123 = arith.constant 0 : index
    %221 = vector.load %arg16[%c0_122, %c0_123] : memref<32x128xbf16, #tpu.memory_space<vmem>>, vector<32x128xbf16>
    %cst_124 = arith.constant dense<0.000000e+00> : vector<8x128xf32>
    %222 = tpu.matmul %220, %221, %cst_124 {dimension_numbers = #tpu.dot_dimension_numbers<[1], [0], [0], [1], [0, 0, 1, 1], [], []>} : vector<8x32xbf16>, vector<32x128xbf16>, vector<8x128xf32> -> vector<8x128xf32>
    %c0_125 = arith.constant 0 : index
    %c0_126 = arith.constant 0 : index
    %223 = vector.load %arg17[%c0_125, %c0_126] : memref<1x128xf32, #tpu.memory_space<vmem>>, vector<1x128xf32>
    %224 = vector.broadcast %223 : vector<1x128xf32> to vector<8x128xf32>
    %225 = arith.addf %222, %224 : vector<8x128xf32>
    %c0_127 = arith.constant 0 : index
    %c0_128 = arith.constant 0 : index
    %226 = vector.load %arg18[%c0_127, %c0_128] : memref<8x128xf32, #tpu.memory_space<vmem>>, vector<8x128xf32>
    tpu.vector_store %arg18[%c0_127, %c0_128], %225 {strides = array<i32>} : memref<8x128xf32, #tpu.memory_space<vmem>>, vector<8x128xf32>,
    return
  }
  func.func @transform_0(%arg0: i32) -> (i32, i32) {
    %c0_i32 = arith.constant 0 : i32
    %c0_i32_0 = arith.constant 0 : i32
    return %arg0, %c0_i32 : i32, i32
  }
  func.func @transform_1(%arg0: i32) -> (i32, i32) {
    %c0_i32 = arith.constant 0 : i32
    %c0_i32_0 = arith.constant 0 : i32
    %c0_i32_1 = arith.constant 0 : i32
    return %c0_i32, %c0_i32_0 : i32, i32
  }
  func.func @transform_2(%arg0: i32) -> (i32, i32) {
    %c0_i32 = arith.constant 0 : i32
    %c0_i32_0 = arith.constant 0 : i32
    %c0_i32_1 = arith.constant 0 : i32
    return %c0_i32, %c0_i32_0 : i32, i32
  }
  func.func @transform_3(%arg0: i32) -> (i32, i32, i32, i32) {
    %c0_i32 = arith.constant 0 : i32
    %c0_i32_0 = arith.constant 0 : i32
    %c0_i32_1 = arith.constant 0 : i32
    %c0_i32_2 = arith.constant 0 : i32
    %c0_i32_3 = arith.constant 0 : i32
    return %c0_i32, %c0_i32_0, %c0_i32_1, %c0_i32_2 : i32, i32, i32, i32
  }
  func.func @transform_4(%arg0: i32) -> (i32, i32, i32, i32) {
    %c0_i32 = arith.constant 0 : i32
    %c0_i32_0 = arith.constant 0 : i32
    %c0_i32_1 = arith.constant 0 : i32
    %c0_i32_2 = arith.constant 0 : i32
    %c0_i32_3 = arith.constant 0 : i32
    return %c0_i32, %c0_i32_0, %c0_i32_1, %c0_i32_2 : i32, i32, i32, i32
  }
  func.func @transform_5(%arg0: i32) -> (i32, i32, i32, i32) {
    %c0_i32 = arith.constant 0 : i32
    %c0_i32_0 = arith.constant 0 : i32
    %c0_i32_1 = arith.constant 0 : i32
    %c0_i32_2 = arith.constant 0 : i32
    %c0_i32_3 = arith.constant 0 : i32
    return %c0_i32, %c0_i32_0, %c0_i32_1, %c0_i32_2 : i32, i32, i32, i32
  }
  func.func @transform_6(%arg0: i32) -> (i32, i32, i32) {
    %c0_i32 = arith.constant 0 : i32
    %c0_i32_0 = arith.constant 0 : i32
    %c0_i32_1 = arith.constant 0 : i32
    %c0_i32_2 = arith.constant 0 : i32
    return %c0_i32, %c0_i32_0, %c0_i32_1 : i32, i32, i32
  }
  func.func @transform_7(%arg0: i32) -> (i32, i32, i32) {
    %c0_i32 = arith.constant 0 : i32
    %c0_i32_0 = arith.constant 0 : i32
    %c0_i32_1 = arith.constant 0 : i32
    %c0_i32_2 = arith.constant 0 : i32
    return %c0_i32, %c0_i32_0, %c0_i32_1 : i32, i32, i32
  }
  func.func @transform_8(%arg0: i32) -> (i32, i32, i32) {
    %c0_i32 = arith.constant 0 : i32
    %c0_i32_0 = arith.constant 0 : i32
    %c0_i32_1 = arith.constant 0 : i32
    %c0_i32_2 = arith.constant 0 : i32
    return %c0_i32, %c0_i32_0, %c0_i32_1 : i32, i32, i32
  }
  func.func @transform_9(%arg0: i32) -> (i32, i32, i32) {
    %c0_i32 = arith.constant 0 : i32
    %c0_i32_0 = arith.constant 0 : i32
    %c0_i32_1 = arith.constant 0 : i32
    %c0_i32_2 = arith.constant 0 : i32
    return %c0_i32, %c0_i32_0, %c0_i32_1 : i32, i32, i32
  }
  func.func @transform_10(%arg0: i32) -> (i32, i32, i32) {
    %c0_i32 = arith.constant 0 : i32
    %c0_i32_0 = arith.constant 0 : i32
    %c0_i32_1 = arith.constant 0 : i32
    %c0_i32_2 = arith.constant 0 : i32
    return %c0_i32, %c0_i32_0, %c0_i32_1 : i32, i32, i32
  }
  func.func @transform_11(%arg0: i32) -> (i32, i32, i32) {
    %c0_i32 = arith.constant 0 : i32
    %c0_i32_0 = arith.constant 0 : i32
    %c0_i32_1 = arith.constant 0 : i32
    %c0_i32_2 = arith.constant 0 : i32
    return %c0_i32, %c0_i32_0, %c0_i32_1 : i32, i32, i32
  }
  func.func @transform_12(%arg0: i32) -> (i32, i32, i32) {
    %c0_i32 = arith.constant 0 : i32
    %c0_i32_0 = arith.constant 0 : i32
    %c0_i32_1 = arith.constant 0 : i32
    %c0_i32_2 = arith.constant 0 : i32
    return %c0_i32, %c0_i32_0, %c0_i32_1 : i32, i32, i32
  }
  func.func @transform_13(%arg0: i32) -> (i32, i32, i32) {
    %c0_i32 = arith.constant 0 : i32
    %c0_i32_0 = arith.constant 0 : i32
    %c0_i32_1 = arith.constant 0 : i32
    %c0_i32_2 = arith.constant 0 : i32
    return %c0_i32, %c0_i32_0, %c0_i32_1 : i32, i32, i32
  }
  func.func @transform_14(%arg0: i32) -> (i32, i32, i32) {
    %c0_i32 = arith.constant 0 : i32
    %c0_i32_0 = arith.constant 0 : i32
    %c0_i32_1 = arith.constant 0 : i32
    %c0_i32_2 = arith.constant 0 : i32
    return %c0_i32, %c0_i32_0, %c0_i32_1 : i32, i32, i32
  }
  func.func @transform_15(%arg0: i32) -> (i32, i32) {
    %c0_i32 = arith.constant 0 : i32
    %c0_i32_0 = arith.constant 0 : i32
    %c0_i32_1 = arith.constant 0 : i32
    return %c0_i32, %c0_i32_0 : i32, i32
  }
  func.func @transform_16(%arg0: i32) -> (i32, i32) {
    %c0_i32 = arith.constant 0 : i32
    %c0_i32_0 = arith.constant 0 : i32
    %c0_i32_1 = arith.constant 0 : i32
    return %c0_i32, %c0_i32_0 : i32, i32
  }
  func.func @transform_17(%arg0: i32) -> (i32, i32) {
    %c0_i32 = arith.constant 0 : i32
    %c0_i32_0 = arith.constant 0 : i32
    return %arg0, %c0_i32 : i32, i32
  }
}

</mosaic_0001>

<bundles_post_ra>
// kernel: action_transformer_forward.1
= control target key start
LH: loop header
LB: loop body
LE: loop exit
PB: predicated region body
PF: predicated region fallthrough
CT: control target
= control target key end

     0   :  { %s9758_s24 = smov 0   ;;  %s11583_s0 = inlined_call_operand.vmem [shape: f32[16,16], index: 0, kind: input, shape index: {}]   ;;  %s11584_s1 = inlined_call_operand.vmem [shape: f32[8,32], index: 1, kind: input, shape index: {}]   ;;  %s11585_s2 = inlined_call_operand.vmem [shape: bf16[16,32], index: 2, kind: input, shape index: {}]   ;;  %s11586_s3 = inlined_call_operand.vmem [shape: bf16[2,12,32,8], index: 3, kind: input, shape index: {}]   ;;  %s11587_s4 = inlined_call_operand.vmem [shape: f32[2,12,1,8], index: 4, kind: input, shape index: {}]   ;;  %s11588_s5 = inlined_call_operand.vmem [shape: bf16[2,4,8,32], index: 5, kind: input, shape index: {}]   ;;  %s11589_s6 = inlined_call_operand.vmem [shape: f32[2,1,32], index: 6, kind: input, shape index: {}]   ;;  %s11590_s7 = inlined_call_operand.vmem [shape: f32[2,1,32], index: 7, kind: input, shape index: {}]   ;;  %s11591_s8 = inlined_call_operand.vmem [shape: f32[2,1,32], index: 8, kind: input, shape index: {}]   ;;  %s11592_s9 = inlined_call_operand.vmem [shape: bf16[2,32,2048], index: 9, kind: input, shape index: {}]   ;;  %s11593_s10 = inlined_call_operand.vmem [shape: f32[2,1,2048], index: 10, kind: input, shape index: {}]   ;;  %s11594_s11 = inlined_call_operand.vmem [shape: bf16[2,2048,32], index: 11, kind: input, shape index: {}]   ;;  %s11595_s12 = inlined_call_operand.vmem [shape: f32[2,1,32], index: 12, kind: input, shape index: {}]   ;;  %s11596_s13 = inlined_call_operand.vmem [shape: f32[2,1,32], index: 13, kind: input, shape index: {}]   ;;  %s11597_s14 = inlined_call_operand.vmem [shape: f32[2,1,32], index: 14, kind: input, shape index: {}]   ;;  %s11598_s15 = inlined_call_operand.vmem [shape: bf16[32,128], index: 15, kind: input, shape index: {}]   ;;  %s11599_s16 = inlined_call_operand.vmem [shape: f32[1,128], index: 16, kind: input, shape index: {}]   ;;  %s11600_s17 = inlined_call_operand.vmem [shape: f32[16,128], index: 17, kind: output, shape index: {}]  }
   0x1   :  { %11601 = sst [smem:[#allocation2_spill]] %s11583_s0 }
   0x2   :  { %11602 = sst [smem:[#allocation3_spill]] %s11584_s1 }
   0x3 LB: > { %s7629_s25 = sadd.s32 4294967295, %s9663_s24   ;;  %p7633_p0 = scmp.ge.s32.totalorder %s9663_s24, 1  ;;  %s9663_s24 = sphi %s9758_s24, %s27_s24  }
   0x4   : > { %p486_p1 = scmp.lt.s32.totalorder %s9663_s24, 3 }
   0x6   : > { %p487_p2 = pnand %p7633_p0, %p486_p1 }
   0x7   : > { %v9310_v0 = vld [vmem:[%s11585_s2] sm:$0xff] (!%p487_p2)   ;;  %v9665_v1 = vmov (!%p487_p2), 0.0   ;;  %p536_p3 = scmp.lt.s32.totalorder (!%p487_p2), %s7629_s25, 1  ;;  %vm9666_vm0 = vmmov (!%p487_p2), 0   ;;  %v9312_v3 = vld [vmem:[%s11586_s3 + $0x10] sm:$0xff] (!%p487_p2)   ;;  %s11603_s20 = sld [smem:[#allocation2_spill]] (!%p487_p2) }
   0x8   : > { %490 = sbr.rel (%p487_p2) target bundleno = 5211 (0x145b), region = 88  ;;  %8949 = vmatprep.subr.bf16.mxu0 (!%p487_p2), %v9665_v1  ;;  %8955 = vmatprep.subr.bf16.mxu1 (!%p487_p2), %v9665_v1  ;;  %v9311_v2 = vld [vmem:[%s11586_s3] sm:$0xff] (!%p487_p2)   ;;  %vm556_vm1 = vcmask (!%p487_p2), 130048   ;;  %v9313_v6 = vld [vmem:[%s11586_s3 + $0x8] sm:$0xff] (!%p487_p2)   ;;  %v9314_v7 = vld [vmem:[%s11586_s3 + $0x18] sm:$0xff] (!%p487_p2)   ;;  %s11604_s30 = sld [smem:[#allocation3_spill]] (!%p487_p2) }
   0x9   : > { %8950 = vmatpush3.bf16.msra.mxu0 (!%p487_p2), %v9310_v0  ;;  %8951 = vmatprep.mubr.msk.bf16.mxu0 (!%p487_p2), %vm9666_vm0, %v9665_v1  ;;  %vm745_vm2 = vcmask (!%p487_p2), 261120   ;;  %v9315_v13 = vld [vmem:[%s11586_s3 + $0x20] sm:$0xff] (!%p487_p2)   ;;  %v9316_v14 = vld [vmem:[%s11586_s3 + $0x30] sm:$0xff] (!%p487_p2)   ;;  %v9317_v17 = vld [vmem:[%s11586_s3 + $0x28] sm:$0xff] (!%p487_p2)   ;;  %vm1369_vm3 = vcmask (!%p487_p2), 64512   ;;  %vm1609_vm4 = vcmask (!%p487_p2), 1043456  }
   0xa   : > { %8963 = vmatprep.subr.bf16.mxu0 (!%p487_p2), %v9665_v1  ;;  %8956 = vmatpush3.bf16.msra.mxu1 (!%p487_p2), %v9311_v2  ;;  %v9318_v18 = vld [vmem:[%s11586_s3 + $0x38] sm:$0xff] (!%p487_p2)   ;;  %v9319_v19 = vld [vmem:[%s11586_s3 + $0x40] sm:$0xff] (!%p487_p2)   ;;  %v9320_v20 = vld [vmem:[%s11586_s3 + $0x50] sm:$0xff] (!%p487_p2)  }
   0xb   : > { %8957 = vmatprep.subr.bf16.mxu1 (!%p487_p2), %v9665_v1  ;;  %8959 = vmatprep.mubr.msk.bf16.mxu1 (!%p487_p2), %vm9666_vm0, %v9665_v1  ;;  %v9321_v21 = vld [vmem:[%s11586_s3 + $0x48] sm:$0xff] (!%p487_p2)   ;;  %v9322_v22 = vld [vmem:[%s11586_s3 + $0x58] sm:$0xff] (!%p487_p2)   ;;  %v9323_v23 = vld [vmem:[%s11586_s3 + $0x60] sm:$0xff] (!%p487_p2)  }
   0xc   : > { %v9324_v24 = vld [vmem:[%s11586_s3 + $0x70] sm:$0xff] (!%p487_p2)   ;;  %v9325_v25 = vld [vmem:[%s11586_s3 + $0x68] sm:$0xff] (!%p487_p2)   ;;  %v9326_v26 = vld [vmem:[%s11586_s3 + $0x78] sm:$0xff] (!%p487_p2)  }
   0xd   : > { %v9327_v27 = vld [vmem:[%s11586_s3 + $0x80] sm:$0xff] (!%p487_p2)   ;;  %v9328_v28 = vld [vmem:[%s11586_s3 + $0x90] sm:$0xff] (!%p487_p2)   ;;  %v9329_v29 = vld [vmem:[%s11586_s3 + $0x88] sm:$0xff] (!%p487_p2)  }
   0xe   : > { %8958 = vmatpush3.bf16.msra.mxu1 (!%p487_p2), %v9313_v6  ;;  %v549_v8 = vld [vmem:[%s11604_s30] sm:$0xff] (!%p487_p2)  ;;  %v9330_v30 = vld [vmem:[%s11586_s3 + $0x98] sm:$0xff] (!%p487_p2)   ;;  %v9332_v32 = vld [vmem:[%s11586_s3 + $0xb0] sm:$0xff] (!%p487_p2)  }
   0xf   : > { %s11606_s25 = smov (!%p536_p3, %s7629_s25), 1  ;;  %8971 = vmatprep.subr.bf16.mxu1 %v9665_v1  ;;  %v9331_v31 = vld [vmem:[%s11586_s3 + $0xa0] sm:$0xff]   ;;  %v9333_v33 = vld [vmem:[%s11586_s3 + $0xa8] sm:$0xff]   ;;  %v9334_v34 = vld [vmem:[%s11586_s3 + $0xb8] sm:$0xff]  }
  0x10   : > { %s7634_s0 = sshll.u32 %s11606_s25, 3  ;;  %v7642_v51 = vld [vmem:[%s11587_s4 + $0x4] ss:$0 sm:$0xff]  ;;  %v7643_v52 = vld [vmem:[%s11587_s4 + $0x5] ss:$0 sm:$0xff] }
  0x11   : > { %s539_s21 = scalar_lea.vmem %s11603_s20, %s7634_s0  ;;  %v7638_v2 = vld [vmem:[%s11587_s4] ss:$0 sm:$0xff]  ;;  %v7644_v6 = vld [vmem:[%s11587_s4 + $0x6] ss:$0 sm:$0xff] }
  0x12   : > { %v545_v4 = vld [vmem:[%s539_s21] sm:$0xff]  ;;  %s543_s21 = scalar_lea.vmem %s11600_s17, %s7634_s0 }
  0x13   : > { %v546_v5 = vpack.c.bf16 %v545_v4, %v545_v4 }
  0x15   : > { %8952 = vmatmul.mubr.msk.bf16.vlgmr.msra.gmra.mrb[0].mxu0 %vm556_vm1, %v546_v5 }
  0x16   : > { %8964 = vmatpush3.bf16.msra.mxu0 %v9312_v3  ;;  %8967 = vmatprep.mubr.msk.bf16.mxu0 %vm9666_vm0, %v9665_v1  ;;  %v7639_v3 = vld [vmem:[%s11587_s4 + $0x1] ss:$0 sm:$0xff] }
  0x17   : > { %8965 = vmatprep.subr.bf16.mxu0 %v9665_v1 }
  0x1a   : > { %8966 = vmatpush3.bf16.msra.mxu0 %v9314_v7  ;;  %v7645_v7 = vld [vmem:[%s11587_s4 + $0x7] ss:$0 sm:$0xff] }
  0x1b   : > { %8979 = vmatprep.subr.bf16.mxu0 %v9665_v1 }
  0xe8   : > { %v594_v9 = vpop.f32.mrb[0].mxu0 }
  0xe9   : > { %v9805_v10 = vadd.f32 %v594_v9, %v549_v8  ;;  %v8953_v11 = vpop.f32.mrb[1].mxu0 }
  0xea   : > { %v597_v12 = vpop.f32.mrb[2].mxu0 }
  0xeb   : > { %v9815_v15 = vpack.c.bf16 %v9805_v10, %v9805_v10  ;;  %v8954_v16 = vpop.f32.mrb[3].mxu0 }
  0xed   : > { %8960 = vmatmul.mubr.msk.bf16.vlgmr.msra.gmra.mrb[0].mxu1 %vm745_vm2, %v9815_v15  ;;  %8968 = vmatmul.mubr.msk.bf16.vlgmr.msra.gmra.mrb[4].mxu0 %vm745_vm2, %v9815_v15 }
  0xee   : > { %8972 = vmatpush3.bf16.msra.mxu1 %v9315_v13  ;;  %8980 = vmatpush3.bf16.msra.mxu0 %v9316_v14 }
  0xef   : > { %8973 = vmatprep.subr.bf16.mxu1 %v9665_v1  ;;  %8981 = vmatprep.subr.bf16.mxu0 %v9665_v1 }
  0xf0   : > { %8975 = vmatprep.mubr.msk.bf16.mxu1 %vm9666_vm0, %v9665_v1  ;;  %8983 = vmatprep.mubr.msk.bf16.mxu0 %vm9666_vm0, %v9665_v1 }
  0xf2   : > { %8974 = vmatpush3.bf16.msra.mxu1 %v9317_v17  ;;  %8982 = vmatpush3.bf16.msra.mxu0 %v9318_v18 }
  0xf3   : > { %8987 = vmatprep.subr.bf16.mxu1 %v9665_v1  ;;  %8995 = vmatprep.subr.bf16.mxu0 %v9665_v1 }
  0xf5   : > { %8976 = vmatmul.mubr.msk.bf16.vlgmr.msra.gmra.mrb[4].mxu1 %vm745_vm2, %v9815_v15  ;;  %8984 = vmatmul.mubr.msk.bf16.vlgmr.msra.gmra.mrb[8].mxu0 %vm745_vm2, %v9815_v15 }
  0xf6   : > { %8988 = vmatpush3.bf16.msra.mxu1 %v9319_v19  ;;  %8996 = vmatpush3.bf16.msra.mxu0 %v9320_v20 }
  0xf7   : > { %8989 = vmatprep.subr.bf16.mxu1 %v9665_v1  ;;  %8997 = vmatprep.subr.bf16.mxu0 %v9665_v1 }
  0xf8   : > { %8991 = vmatprep.mubr.msk.bf16.mxu1 %vm9666_vm0, %v9665_v1  ;;  %8999 = vmatprep.mubr.msk.bf16.mxu0 %vm9666_vm0, %v9665_v1 }
  0xfa   : > { %8990 = vmatpush3.bf16.msra.mxu1 %v9321_v21  ;;  %8998 = vmatpush3.bf16.msra.mxu0 %v9322_v22 }
  0xfb   : > { %9003 = vmatprep.subr.bf16.mxu1 %v9665_v1  ;;  %9011 = vmatprep.subr.bf16.mxu0 %v9665_v1 }
  0xfd   : > { %8992 = vmatmul.mubr.msk.bf16.vlgmr.msra.gmra.mrb[8].mxu1 %vm745_vm2, %v9815_v15  ;;  %9000 = vmatmul.mubr.msk.bf16.vlgmr.msra.gmra.mrb[12].mxu0 %vm745_vm2, %v9815_v15 }
  0xfe   : > { %9004 = vmatpush3.bf16.msra.mxu1 %v9323_v23  ;;  %9012 = vmatpush3.bf16.msra.mxu0 %v9324_v24 }
  0xff   : > { %9005 = vmatprep.subr.bf16.mxu1 %v9665_v1  ;;  %9013 = vmatprep.subr.bf16.mxu0 %v9665_v1 }
 0x100   : > { %9007 = vmatprep.mubr.msk.bf16.mxu1 %vm9666_vm0, %v9665_v1  ;;  %9015 = vmatprep.mubr.msk.bf16.mxu0 %vm9666_vm0, %v9665_v1 }
 0x102   : > { %9006 = vmatpush3.bf16.msra.mxu1 %v9325_v25  ;;  %9014 = vmatpush3.bf16.msra.mxu0 %v9326_v26  ;;  %v7640_v25 = vld [vmem:[%s11587_s4 + $0x2] ss:$0 sm:$0xff]  ;;  %v7641_v26 = vld [vmem:[%s11587_s4 + $0x3] ss:$0 sm:$0xff] }
 0x103   : > { %9019 = vmatprep.subr.bf16.mxu1 %v9665_v1  ;;  %9027 = vmatprep.subr.bf16.mxu0 %v9665_v1 }
 0x105   : > { %9008 = vmatmul.mubr.msk.bf16.vlgmr.msra.gmra.mrb[12].mxu1 %vm745_vm2, %v9815_v15  ;;  %9016 = vmatmul.mubr.msk.bf16.vlgmr.msra.gmra.mrb[16].mxu0 %vm745_vm2, %v9815_v15 }
 0x106   : > { %9020 = vmatpush3.bf16.msra.mxu1 %v9327_v27  ;;  %9028 = vmatpush3.bf16.msra.mxu0 %v9328_v28 }
 0x107   : > { %9021 = vmatprep.subr.bf16.mxu1 %v9665_v1  ;;  %9029 = vmatprep.subr.bf16.mxu0 %v9665_v1 }
 0x108   : > { %9023 = vmatprep.mubr.msk.bf16.mxu1 %vm9666_vm0, %v9665_v1  ;;  %9031 = vmatprep.mubr.msk.bf16.mxu0 %vm9666_vm0, %v9665_v1 }
 0x10a   : > { %9022 = vmatpush3.bf16.msra.mxu1 %v9329_v29  ;;  %9030 = vmatpush3.bf16.msra.mxu0 %v9330_v30  ;;  %v7646_v29 = vld [vmem:[%s11587_s4 + $0x8] ss:$0 sm:$0xff]  ;;  %v7647_v30 = vld [vmem:[%s11587_s4 + $0x9] ss:$0 sm:$0xff] }
 0x10b   : > { %9035 = vmatprep.subr.bf16.mxu1 %v9665_v1  ;;  %9043 = vmatprep.subr.bf16.mxu0 %v9665_v1 }
 0x10d   : > { %9024 = vmatmul.mubr.msk.bf16.vlgmr.msra.gmra.mrb[16].mxu1 %vm745_vm2, %v9815_v15  ;;  %9032 = vmatmul.mubr.msk.bf16.vlgmr.msra.gmra.mrb[20].mxu0 %vm745_vm2, %v9815_v15 }
 0x10e   : > { %9036 = vmatpush3.bf16.msra.mxu1 %v9331_v31  ;;  %9044 = vmatpush3.bf16.msra.mxu0 %v9332_v32 }
 0x10f   : > { %9037 = vmatprep.subr.bf16.mxu1 %v9665_v1  ;;  %9045 = vmatprep.subr.bf16.mxu0 %v9665_v1 }
 0x110   : > { %9039 = vmatprep.mubr.msk.bf16.mxu1 %vm9666_vm0, %v9665_v1  ;;  %9047 = vmatprep.mubr.msk.bf16.mxu0 %vm9666_vm0, %v9665_v1 }
 0x112   : > { %9038 = vmatpush3.bf16.msra.mxu1 %v9333_v33  ;;  %9046 = vmatpush3.bf16.msra.mxu0 %v9334_v34 }
 0x113   : > { %9051 = vmatprep.subr.bf16.mxu1 %v9665_v1  ;;  %9057 = vmatprep.subr.bf16.mxu0 %v9665_v1 }
 0x115   : > { %9040 = vmatmul.mubr.msk.bf16.vlgmr.msra.gmra.mrb[20].mxu1 %vm745_vm2, %v9815_v15  ;;  %9048 = vmatmul.mubr.msk.bf16.vlgmr.msra.gmra.mrb[24].mxu0 %vm745_vm2, %v9815_v15 }
 0x116   : > { %9053 = vmatprep.mubr.msk.bf16.mxu1 %vm9666_vm0, %v9665_v1  ;;  %9059 = vmatprep.mubr.msk.bf16.mxu0 %vm9666_vm0, %v9665_v1 }
 0x1c0   : > { %v783_v35 = vpop.f32.mrb[0].mxu1  ;;  %v835_v36 = vpop.f32.mrb[4].mxu0 }
 0x1c1   : > { %v8961_v37 = vpop.f32.mrb[1].mxu1  ;;  %v8969_v38 = vpop.f32.mrb[5].mxu0  ;;  %v784_v8 = vadd.f32 %v7638_v2, %v783_v35  ;;  %v836_v9 = vadd.f32 %v7639_v3, %v835_v36 }
 0x1c2   : > { %v786_v39 = vpop.f32.mrb[2].mxu1  ;;  %v838_v40 = vpop.f32.mrb[6].mxu0 }
 0x1c3   : > { %v8962_v41 = vpop.f32.mrb[3].mxu1  ;;  %v8970_v42 = vpop.f32.mrb[7].mxu0  ;;  %v1361_v19 = vpack.c.bf16 %v784_v8, %v784_v8  ;;  %v1362_v20 = vpack.c.bf16 %v836_v9, %v836_v9 }
 0x1c8   : > { %v887_v43 = vpop.f32.mrb[4].mxu1  ;;  %v939_v44 = vpop.f32.mrb[8].mxu0 }
 0x1c9   : > { %v8977_v45 = vpop.f32.mrb[5].mxu1  ;;  %v8985_v46 = vpop.f32.mrb[9].mxu0  ;;  %v888_v31 = vadd.f32 %v7640_v25, %v887_v43  ;;  %v940_v32 = vadd.f32 %v7641_v26, %v939_v44 }
 0x1ca   : > { %v890_v47 = vpop.f32.mrb[6].mxu1  ;;  %v942_v48 = vpop.f32.mrb[10].mxu0 }
 0x1cb   : > { %v8978_v49 = vpop.f32.mrb[7].mxu1  ;;  %v8986_v50 = vpop.f32.mrb[11].mxu0  ;;  %v1363_v41 = vpack.c.bf16 %v888_v31, %v888_v31  ;;  %v1364_v42 = vpack.c.bf16 %v940_v32, %v940_v32 }
 0x1d0   : > { %v991_v53 = vpop.f32.mrb[8].mxu1  ;;  %v1043_v54 = vpop.f32.mrb[12].mxu0 }
 0x1d1   : > { %v992_v55 = vadd.f32 %v7642_v51, %v991_v53  ;;  %v1044_v56 = vadd.f32 %v7643_v52, %v1043_v54  ;;  %v8993_v57 = vpop.f32.mrb[9].mxu1  ;;  %v9001_v58 = vpop.f32.mrb[13].mxu0 }
 0x1d2   : > { %v994_v59 = vpop.f32.mrb[10].mxu1  ;;  %v1046_v60 = vpop.f32.mrb[14].mxu0 }
 0x1d3   : > { %v1365_v61 = vpack.c.bf16 %v992_v55, %v992_v55  ;;  %v1366_v62 = vpack.c.bf16 %v1044_v56, %v1044_v56  ;;  %v8994_v63 = vpop.f32.mrb[11].mxu1  ;;  %v9002_v0 = vpop.f32.mrb[15].mxu0 }
 0x1d5   : > { %v1374_v4 = vsel %vm1369_vm3, %v1365_v61, 0  ;;  %v1420_v5 = vsel %vm1369_vm3, %v1366_v62, 0 }
 0x1d6   : > { %9052 = vmatpush3.bf16.xpose.msra.mxu1 %v1374_v4  ;;  %9058 = vmatpush3.bf16.xpose.msra.mxu0 %v1420_v5 }
 0x1d7   : > { %9063 = vmatprep.subr.bf16.mxu1 %v9665_v1  ;;  %9069 = vmatprep.subr.bf16.mxu0 %v9665_v1 }
 0x1d8   : > { %v1095_v11 = vpop.f32.mrb[12].mxu1  ;;  %v1147_v12 = vpop.f32.mrb[16].mxu0 }
 0x1d9   : > { %v1096_v13 = vadd.f32 %v7644_v6, %v1095_v11  ;;  %v1148_v14 = vadd.f32 %v7645_v7, %v1147_v12  ;;  %v9009_v15 = vpop.f32.mrb[13].mxu1  ;;  %v9017_v16 = vpop.f32.mrb[17].mxu0 }
 0x1da   : > { %v1098_v17 = vpop.f32.mrb[14].mxu1  ;;  %v1150_v18 = vpop.f32.mrb[18].mxu0 }
 0x1db   : > { %v1367_v21 = vpack.c.bf16 %v1096_v13, %v1096_v13  ;;  %v1368_v22 = vpack.c.bf16 %v1148_v14, %v1148_v14  ;;  %v9010_v23 = vpop.f32.mrb[15].mxu1  ;;  %v9018_v24 = vpop.f32.mrb[19].mxu0 }
 0x1dd   : > { %v1466_v27 = vsel %vm1369_vm3, %v1367_v21, 0  ;;  %v1512_v28 = vsel %vm1369_vm3, %v1368_v22, 0  ;;  %9054 = vmatmul.mubr.msk.bf16.vlgmr.msra.gmra.mrb[24].mxu1 %vm1369_vm3, %v1361_v19  ;;  %9060 = vmatmul.mubr.msk.bf16.vlgmr.msra.gmra.mrb[28].mxu0 %vm1369_vm3, %v1362_v20 }
 0x1de   : > { %9064 = vmatpush3.bf16.xpose.msra.mxu1 %v1466_v27  ;;  %9070 = vmatpush3.bf16.xpose.msra.mxu0 %v1512_v28 }
 0x1df   : > { %9065 = vmatprep.mubr.msk.bf16.mxu1 %vm9666_vm0, %v9665_v1  ;;  %9071 = vmatprep.mubr.msk.bf16.mxu0 %vm9666_vm0, %v9665_v1 }
 0x1e0   : > { %v1199_v33 = vpop.f32.mrb[16].mxu1  ;;  %v1251_v34 = vpop.f32.mrb[20].mxu0  ;;  %9075 = vmatprep.subr.bf16.mxu1 %v9665_v1  ;;  %9081 = vmatprep.subr.bf16.mxu0 %v9665_v1 }
 0x1e1   : > { %v1200_v35 = vadd.f32 %v7646_v29, %v1199_v33  ;;  %v1252_v36 = vadd.f32 %v7647_v30, %v1251_v34  ;;  %v9025_v37 = vpop.f32.mrb[17].mxu1  ;;  %v9033_v38 = vpop.f32.mrb[21].mxu0 }
 0x1e2   : > { %v1202_v39 = vpop.f32.mrb[18].mxu1  ;;  %v1254_v40 = vpop.f32.mrb[22].mxu0  ;;  %v7648_v37 = vld [vmem:[%s11587_s4 + $0xa] ss:$0 sm:$0xff] }
 0x1e3   : > { %v1602_v43 = vpack.c.bf16 %v1200_v35, %v1200_v35  ;;  %v1603_v44 = vpack.c.bf16 %v1252_v36, %v1252_v36  ;;  %v9026_v45 = vpop.f32.mrb[19].mxu1  ;;  %v9034_v46 = vpop.f32.mrb[23].mxu0  ;;  %v7649_v40 = vld [vmem:[%s11587_s4 + $0xb] ss:$0 sm:$0xff] }
 0x1e5   : > { %v1611_v47 = vsel %vm1609_vm4, %v1602_v43, 0  ;;  %v1657_v48 = vsel %vm1609_vm4, %v1603_v44, 0  ;;  %9066 = vmatmul.mubr.msk.bf16.vlgmr.msra.gmra.mrb[28].mxu1 %vm1369_vm3, %v1363_v41  ;;  %9072 = vmatmul.mubr.msk.bf16.vlgmr.msra.gmra.mrb[32].mxu0 %vm1369_vm3, %v1364_v42 }
 0x1e6   : > { %9076 = vmatpush3.bf16.msra.mxu1 %v1611_v47  ;;  %9082 = vmatpush3.bf16.msra.mxu0 %v1657_v48 }
 0x1e7   : > { %9077 = vmatprep.mubr.msk.bf16.mxu1 %vm9666_vm0, %v9665_v1  ;;  %9087 = vmatprep.subr.bf16.mxu1 %v9665_v1 }
 0x1e8   : > { %v9990_v49 = vpop.f32.mrb[20].mxu1  ;;  %v9992_v50 = vpop.f32.mrb[24].mxu0  ;;  %9083 = vmatprep.mubr.msk.bf16.mxu0 %vm9666_vm0, %v9665_v1  ;;  %9093 = vmatprep.subr.bf16.mxu0 %v9665_v1 }
 0x1e9   : > { %v9041_v51 = vpop.f32.mrb[21].mxu1  ;;  %v9049_v52 = vpop.f32.mrb[25].mxu0  ;;  %v1304_v38 = vadd.f32 %v7648_v37, %v9990_v49  ;;  %v1356_v43 = vadd.f32 %v7649_v40, %v9992_v50  ;;  %v1795_v50 = vld [vmem:[%s11588_s5] sm:$0xf] }
 0x1ea   : > { %v1306_v53 = vpop.f32.mrb[22].mxu1  ;;  %v1358_v54 = vpop.f32.mrb[26].mxu0 }
 0x1eb   : > { %v9042_v55 = vpop.f32.mrb[23].mxu1  ;;  %v9050_v56 = vpop.f32.mrb[27].mxu0  ;;  %v1604_v42 = vpack.c.bf16 %v1304_v38, %v1304_v38  ;;  %v1605_v51 = vpack.c.bf16 %v1356_v43, %v1356_v43 }
 0x1ed   : > { %v1703_v48 = vsel %vm1609_vm4, %v1604_v42, 0  ;;  %v1749_v54 = vsel %vm1609_vm4, %v1605_v51, 0 }
 0x2b0   : > { %v1410_v57 = vpop.f32.mrb[24].mxu1  ;;  %v1456_v58 = vpop.f32.mrb[28].mxu0 }
 0x2b1   : > { %v9055_v59 = vpop.f32.mrb[25].mxu1  ;;  %v9061_v60 = vpop.f32.mrb[29].mxu0  ;;  %v1554_v61 = vsel %vm1369_vm3, %v1410_v57, -inf  ;;  %v1557_v3 = vsel %vm1369_vm3, %v1456_v58, -inf }
 0x2b2   : > { %1555 = vmax.xlane.f32.xlu0 %v1554_v61  ;;  %v1413_v62 = vpop.f32.mrb[26].mxu1  ;;  %v1459_v63 = vpop.f32.mrb[30].mxu0  ;;  %v1796_v61 = vld [vmem:[%s11588_s5 + $0x4] sm:$0xf] }
 0x2b3   : > { %v9056_v0 = vpop.f32.mrb[27].mxu1  ;;  %v9062_v2 = vpop.f32.mrb[31].mxu0  ;;  %v1849_v62 = vsel %vm1609_vm4, %v1796_v61, 0  ;;  %v1797_v63 = vld [vmem:[%s11588_s5 + $0x8] sm:$0xf] }
 0x2b6   : > { %1558 = vmax.xlane.f32.xlu0 %v1557_v3 }
 0x2b8   : > { %v1502_v4 = vpop.f32.mrb[28].mxu1  ;;  %v1548_v5 = vpop.f32.mrb[32].mxu0 }
 0x2b9   : > { %v9067_v6 = vpop.f32.mrb[29].mxu1  ;;  %v9073_v7 = vpop.f32.mrb[33].mxu0  ;;  %v1560_v8 = vsel %vm1369_vm3, %v1502_v4, -inf  ;;  %v1563_v14 = vsel %vm1369_vm3, %v1548_v5, -inf }
 0x2ba   : > { %1561 = vmax.xlane.f32.xlu1 %v1560_v8  ;;  %v1505_v9 = vpop.f32.mrb[30].mxu1  ;;  %v1551_v11 = vpop.f32.mrb[34].mxu0  ;;  %v1798_v6 = vld [vmem:[%s11588_s5 + $0xc] sm:$0xf] }
 0x2bb   : > { %v9068_v12 = vpop.f32.mrb[31].mxu1  ;;  %v9074_v13 = vpop.f32.mrb[35].mxu0 }
 0x2bc   : > { %v1941_v12 = vsel %vm1609_vm4, %v1798_v6, 0 }
 0x2be   : > { %1564 = vmax.xlane.f32.xlu1 %v1563_v14 }
 0x33f   : > { %v1556_v15 = vpop.xlane.xlu0 %1555 }
 0x340   : > { %v1566_v16 = vsub.f32 %v1410_v57, %v1556_v15  ;;  %v1803_v57 = vsel %vm1609_vm4, %v1795_v50, 0 }
 0x342   : > { %v1570_v17 = vmul.f32 1.442695, %v1566_v16 }
 0x343   : > { %v1559_v18 = vpop.xlane.xlu0 %1558 }
 0x344   : > { %9617 = vpow2.f32 %v1570_v17  ;;  %v1567_v19 = vsub.f32 %v1456_v58, %v1559_v18 }
 0x346   : > { %v1572_v20 = vmul.f32 1.442695, %v1567_v19 }
 0x347   : > { %v1562_v21 = vpop.xlane.xlu1 %1561 }
 0x348   : > { %9619 = vpow2.f32 %v1572_v20  ;;  %v1568_v22 = vsub.f32 %v1502_v4, %v1562_v21  ;;  %v1895_v4 = vsel %vm1609_vm4, %v1797_v63, 0 }
 0x34a   : > { %v1574_v23 = vmul.f32 1.442695, %v1568_v22 }
 0x34b   : > { %v1565_v24 = vpop.xlane.xlu1 %1564 }
 0x34c   : > { %9621 = vpow2.f32 %v1574_v23  ;;  %v1569_v25 = vsub.f32 %v1548_v5, %v1565_v24 }
 0x34e   : > { %v9618_v26 = vpop.eup %9617  ;;  %v1576_v27 = vmul.f32 1.442695, %v1569_v25 }
 0x34f   : > { %v1578_v28 = vsel %vm1369_vm3, %v9618_v26, 0.0 }
 0x350   : > { %9623 = vpow2.f32 %v1576_v27  ;;  %1579 = vadd.xlane.f32.xlu0 %v1578_v28 }
 0x352   : > { %v9620_v29 = vpop.eup %9619 }
 0x353   : > { %v1581_v30 = vsel %vm1369_vm3, %v9620_v29, 0.0 }
 0x354   : > { %1582 = vadd.xlane.f32.xlu1 %v1581_v30 }
 0x356   : > { %v9622_v31 = vpop.eup %9621 }
 0x357   : > { %v1584_v32 = vsel %vm1369_vm3, %v9622_v31, 0.0 }
 0x358   : > { %1585 = vadd.xlane.f32.xlu0 %v1584_v32 }
 0x35a   : > { %v9624_v33 = vpop.eup %9623 }
 0x35b   : > { %v1587_v34 = vsel %vm1369_vm3, %v9624_v33, 0.0 }
 0x35c   : > { %1588 = vadd.xlane.f32.xlu1 %v1587_v34 }
 0x3dd   : > { %v1580_v35 = vpop.xlane.xlu0 %1579 }
 0x3de   : > { %9625 = vrcp.f32 %v1580_v35 }
 0x3e1   : > { %v1583_v36 = vpop.xlane.xlu1 %1582 }
 0x3e2   : > { %9627 = vrcp.f32 %v1583_v36 }
 0x3e5   : > { %v1586_v39 = vpop.xlane.xlu0 %1585 }
 0x3e6   : > { %9629 = vrcp.f32 %v1586_v39 }
 0x3e8   : > { %v9626_v41 = vpop.eup %9625 }
 0x3e9   : > { %v1594_v44 = vmul.f32 %v9626_v41, %v9618_v26  ;;  %v1589_v45 = vpop.xlane.xlu1 %1588 }
 0x3ea   : > { %9631 = vrcp.f32 %v1589_v45 }
 0x3eb   : > { %v1598_v46 = vpack.c.bf16 %v1594_v44, %v1594_v44 }
 0x3ec   : > { %v9628_v47 = vpop.eup %9627 }
 0x3ed   : > { %v1595_v52 = vmul.f32 %v9628_v47, %v9620_v29  ;;  %9078 = vmatmul.mubr.msk.bf16.vlgmr.msra.gmra.mrb[32].mxu1 %vm1369_vm3, %v1598_v46 }
 0x3ee   : > { %9088 = vmatpush3.bf16.msra.mxu1 %v1703_v48  ;;  %9089 = vmatprep.mubr.msk.bf16.mxu1 %vm9666_vm0, %v9665_v1  ;;  %v7698_v48 = vld [vmem:[%s11589_s6] ss:$0 sm:$0xff] }
 0x3ef   : > { %v1599_v49 = vpack.c.bf16 %v1595_v52, %v1595_v52  ;;  %9099 = vmatprep.subr.bf16.mxu1 %v9665_v1 }
 0x3f0   : > { %v9630_v53 = vpop.eup %9629 }
 0x3f1   : > { %v1596_v55 = vmul.f32 %v9630_v53, %v9622_v31  ;;  %9084 = vmatmul.mubr.msk.bf16.vlgmr.msra.gmra.mrb[36].mxu0 %vm1369_vm3, %v1599_v49 }
 0x3f2   : > { %9094 = vmatpush3.bf16.msra.mxu0 %v1749_v54  ;;  %9095 = vmatprep.mubr.msk.bf16.mxu0 %vm9666_vm0, %v9665_v1 }
 0x3f3   : > { %v1600_v56 = vpack.c.bf16 %v1596_v55, %v1596_v55  ;;  %9105 = vmatprep.subr.bf16.mxu0 %v9665_v1 }
 0x3f4   : > { %v9632_v58 = vpop.eup %9631 }
 0x3f5   : > { %v1597_v59 = vmul.f32 %v9632_v58, %v9624_v33  ;;  %9090 = vmatmul.mubr.msk.bf16.vlgmr.msra.gmra.mrb[36].mxu1 %vm1369_vm3, %v1600_v56  ;;  %v2038_v58 = vld [vmem:[%s11592_s9 + $0x40] sm:$0xff] }
 0x3f6   : > { %9100 = vmatpush3.bf16.msra.mxu1 %v1803_v57  ;;  %9101 = vmatprep.mubr.msk.bf16.mxu1 %vm9666_vm0, %v9665_v1  ;;  %v2030_v57 = vld [vmem:[%s11592_s9] sm:$0xff] }
 0x3f7   : > { %v1601_v60 = vpack.c.bf16 %v1597_v59, %v1597_v59  ;;  %9111 = vmatprep.subr.bf16.mxu1 %v9665_v1  ;;  %v7702_v59 = vcombine.high %v2030_v57, %v2038_v58  ;;  %v7701_v61 = vcombine.low %v2030_v57, %v2038_v58 }
 0x3f9   : > { %9096 = vmatmul.mubr.msk.bf16.vlgmr.msra.gmra.mrb[40].mxu0 %vm1369_vm3, %v1601_v60  ;;  %v2039_v60 = vld [vmem:[%s11592_s9 + $0x48] sm:$0xff] }
 0x3fa   : > { %9107 = vmatprep.mubr.msk.bf16.mxu0 %vm9666_vm0, %v9665_v1  ;;  %9106 = vmatpush3.bf16.msra.mxu0 %v1849_v62 }
 0x3fb   : > { %9117 = vmatprep.subr.bf16.mxu0 %v9665_v1 }
 0x4c0   : > { %v1647_v0 = vpop.f32.mrb[32].mxu1 }
 0x4c1   : > { %v1791_v2 = vpack.c.bf16 %v1647_v0, %v1647_v0  ;;  %v9079_v3 = vpop.f32.mrb[33].mxu1  ;;  %v2046_v0 = vld [vmem:[%s11592_s9 + $0x80] sm:$0xff] }
 0x4c2   : > { %v1650_v5 = vpop.f32.mrb[34].mxu1  ;;  %v2047_v3 = vld [vmem:[%s11592_s9 + $0x88] sm:$0xff] }
 0x4c3   : > { %v9080_v7 = vpop.f32.mrb[35].mxu1  ;;  %9102 = vmatmul.mubr.msk.bf16.vlgmr.msra.gmra.mrb[40].mxu1 %vm1369_vm3, %v1791_v2  ;;  %v2054_v2 = vld [vmem:[%s11592_s9 + $0xc0] sm:$0xff]  ;;  %v2055_v5 = vld [vmem:[%s11592_s9 + $0xc8] sm:$0xff] }
 0x4c4   : > { %v1693_v8 = vpop.f32.mrb[36].mxu0  ;;  %9112 = vmatpush3.bf16.msra.mxu1 %v1895_v4  ;;  %9113 = vmatprep.mubr.msk.bf16.mxu1 %vm9666_vm0, %v9665_v1  ;;  %v7718_v4 = vcombine.high %v2046_v0, %v2054_v2  ;;  %v7717_v6 = vcombine.low %v2046_v0, %v2054_v2  ;;  %v7719_v7 = vcombine.low %v2047_v3, %v2055_v5 }
 0x4c5   : > { %v1792_v9 = vpack.c.bf16 %v1693_v8, %v1693_v8  ;;  %v9085_v11 = vpop.f32.mrb[37].mxu0  ;;  %2309 = vmatprep.subr.bf16.mxu1 %v7702_v59  ;;  %v7720_v8 = vcombine.high %v2047_v3, %v2055_v5  ;;  %v2060_v59 = vld [vmem:[%s11592_s9 + $0xf0] sm:$0xff]  ;;  %v9335_v5 = vld [vmem:[%s11594_s11 + $0x40] sm:$0xff]  }
 0x4c6   : > { %v1696_v13 = vpop.f32.mrb[38].mxu0  ;;  %v2040_v11 = vld [vmem:[%s11592_s9 + $0x50] sm:$0xff] }
 0x4c7   : > { %v9086_v14 = vpop.f32.mrb[39].mxu0  ;;  %9108 = vmatmul.mubr.msk.bf16.vlgmr.msra.gmra.mrb[44].mxu0 %vm1369_vm3, %v1792_v9  ;;  %v2032_v9 = vld [vmem:[%s11592_s9 + $0x10] sm:$0xff]  ;;  %v9667_v13 = vmov 0  }
 0x4c8   : > { %v1739_v15 = vpop.f32.mrb[36].mxu1  ;;  %9118 = vmatpush3.bf16.msra.mxu0 %v1941_v12  ;;  %9119 = vmatprep.mubr.msk.bf16.mxu0 %vm9666_vm0, %v9665_v1  ;;  %v2033_v12 = vld [vmem:[%s11592_s9 + $0x18] sm:$0xff]  ;;  %v7706_v14 = vcombine.high %v2032_v9, %v2040_v11 }
 0x4c9   : > { %v1793_v16 = vpack.c.bf16 %v1739_v15, %v1739_v15  ;;  %v9091_v17 = vpop.f32.mrb[37].mxu1  ;;  %v2041_v15 = vld [vmem:[%s11592_s9 + $0x58] sm:$0xff] }
 0x4ca   : > { %v1742_v18 = vpop.f32.mrb[38].mxu1  ;;  %v7707_v17 = vcombine.low %v2033_v12, %v2041_v15 }
 0x4cb   : > { %v9092_v19 = vpop.f32.mrb[39].mxu1  ;;  %9114 = vmatmul.mubr.msk.bf16.vlgmr.msra.gmra.mrb[44].mxu1 %vm1369_vm3, %v1793_v16  ;;  %v7705_v16 = vcombine.low %v2032_v9, %v2040_v11  ;;  %v7708_v18 = vcombine.high %v2033_v12, %v2041_v15  ;;  %v9339_v9 = vld [vmem:[%s11594_s11 + $0x48] sm:$0xff]   ;;  %v9343_v15 = vld [vmem:[%s11594_s11 + $0x50] sm:$0xff]  }
 0x4cc   : > { %v1785_v20 = vpop.f32.mrb[40].mxu0  ;;  %2310 = vmatpush1.bf16.msra.mxu1 %v7701_v61  ;;  %2341 = vmatprep.mubr.bf16.mxu1 %v9667_v13  ;;  %v2061_v61 = vld [vmem:[%s11592_s9 + $0xf8] sm:$0xff]  ;;  %v9340_v11 = vld [vmem:[%s11594_s11 + $0xc8] sm:$0xff]  }
 0x4cd   : > { %v1794_v21 = vpack.c.bf16 %v1785_v20, %v1785_v20  ;;  %v9097_v22 = vpop.f32.mrb[41].mxu0  ;;  %2311 = vmatprep.subr.bf16.mxu1 %v7718_v4  ;;  %v9341_v12 = vld [vmem:[%s11594_s11 + $0x8] sm:$0xff]  }
 0x4ce   : > { %v1788_v23 = vpop.f32.mrb[42].mxu0 }
 0x4cf   : > { %v9098_v24 = vpop.f32.mrb[43].mxu0  ;;  %9120 = vmatmul.mubr.msk.bf16.vlgmr.msra.gmra.mrb[48].mxu0 %vm1369_vm3, %v1794_v21  ;;  %v7699_v23 = vld [vmem:[%s11590_s7] ss:$0 sm:$0xff] }
 0x4d0   : > { %2312 = vmatpush1.bf16.msra.mxu1 %v7717_v6  ;;  %2382 = vmatprep.mubr.bf16.mxu0 %v9667_v13  ;;  %v9336_v6 = vld [vmem:[%s11594_s11 + $0xc0] sm:$0xff]  }
 0x4d1   : > { %2391 = vmatprep.subr.bf16.mxu1 %v7706_v14  ;;  %v9342_v14 = vld [vmem:[%s11594_s11 + $0x88] sm:$0xff]  }
 0x596   : > { %v1839_v25 = vpop.f32.mrb[40].mxu1 }
 0x597   : > { %v9103_v26 = vpop.f32.mrb[41].mxu1  ;;  %v1983_v30 = vsel %vm745_vm2, %v1839_v25, 0.0  ;;  %v7700_v25 = vld [vmem:[%s11591_s8] ss:$0 sm:$0xff] }
 0x598   : > { %v1842_v27 = vpop.f32.mrb[42].mxu1 }
 0x599   : > { %v9104_v28 = vpop.f32.mrb[43].mxu1  ;;  %v2048_v27 = vld [vmem:[%s11592_s9 + $0x90] sm:$0xff] }
 0x59a   : > { %v1885_v29 = vpop.f32.mrb[44].mxu0  ;;  %v2056_v28 = vld [vmem:[%s11592_s9 + $0xd0] sm:$0xff] }
 0x59b   : > { %v1984_v31 = vsel %vm745_vm2, %v1885_v29, 0.0  ;;  %v9109_v32 = vpop.f32.mrb[45].mxu0  ;;  %v2049_v29 = vld [vmem:[%s11592_s9 + $0x98] sm:$0xff] }
 0x59c   : > { %v1985_v33 = vadd.f32 %v1984_v31, %v1983_v30  ;;  %v1888_v34 = vpop.f32.mrb[46].mxu0  ;;  %v2057_v30 = vld [vmem:[%s11592_s9 + $0xd8] sm:$0xff] }
 0x59d   : > { %v9110_v35 = vpop.f32.mrb[47].mxu0  ;;  %v7724_v34 = vcombine.high %v2049_v29, %v2057_v30 }
 0x59e   : > { %v1931_v36 = vpop.f32.mrb[44].mxu1  ;;  %v2034_v35 = vld [vmem:[%s11592_s9 + $0x20] sm:$0xff] }
 0x59f   : > { %v1986_v37 = vsel %vm745_vm2, %v1931_v36, 0.0  ;;  %v9115_v38 = vpop.f32.mrb[45].mxu1  ;;  %v2042_v36 = vld [vmem:[%s11592_s9 + $0x60] sm:$0xff] }
 0x5a0   : > { %v1987_v39 = vadd.f32 %v1986_v37, %v1985_v33  ;;  %v1934_v40 = vpop.f32.mrb[46].mxu1  ;;  %v7722_v33 = vcombine.high %v2048_v27, %v2056_v28  ;;  %v2035_v37 = vld [vmem:[%s11592_s9 + $0x28] sm:$0xff] }
 0x5a1   : > { %v9116_v41 = vpop.f32.mrb[47].mxu1  ;;  %v2043_v38 = vld [vmem:[%s11592_s9 + $0x68] sm:$0xff]  ;;  %v7723_v40 = vcombine.low %v2049_v29, %v2057_v30 }
 0x5a2   : > { %v1977_v42 = vpop.f32.mrb[48].mxu0  ;;  %v7710_v41 = vcombine.high %v2034_v35, %v2042_v36  ;;  %v9357_v29 = vld [vmem:[%s11594_s11 + $0x28] sm:$0xff]  }
 0x5a3   : > { %v1988_v43 = vsel %vm745_vm2, %v1977_v42, 0.0  ;;  %v9121_v44 = vpop.f32.mrb[49].mxu0  ;;  %v7712_v42 = vcombine.high %v2035_v37, %v2043_v38  ;;  %v9358_v30 = vld [vmem:[%s11594_s11 + $0xa8] sm:$0xff]  }
 0x5a4   : > { %v1989_v45 = vadd.f32 %v1988_v43, %v1987_v39  ;;  %v1980_v46 = vpop.f32.mrb[50].mxu0  ;;  %v7721_v39 = vcombine.low %v2048_v27, %v2056_v28  ;;  %v2050_v43 = vld [vmem:[%s11592_s9 + $0xa0] sm:$0xff]  ;;  %v9355_v27 = vld [vmem:[%s11594_s11 + $0x68] sm:$0xff]  }
 0x5a5   : > { %v9122_v47 = vpop.f32.mrb[51].mxu0  ;;  %v2058_v44 = vld [vmem:[%s11592_s9 + $0xe0] sm:$0xff]  ;;  %v2059_v46 = vld [vmem:[%s11592_s9 + $0xe8] sm:$0xff] }
 0x5a6   : > { %v1990_v51 = vadd.f32 %v1989_v45, %v9805_v10  ;;  %v2031_v10 = vld [vmem:[%s11592_s9 + $0x8] sm:$0xff]  ;;  %v7709_v47 = vcombine.low %v2034_v35, %v2042_v36  ;;  %v9362_v35 = vld [vmem:[%s11594_s11 + $0xb0] sm:$0xff]   ;;  %v9363_v36 = vld [vmem:[%s11594_s11 + $0x78] sm:$0xff]  }
 0x5a7   : > { %v7703_v62 = vcombine.low %v2031_v10, %v2039_v60  ;;  %v7704_v63 = vcombine.high %v2031_v10, %v2039_v60  ;;  %v2051_v45 = vld [vmem:[%s11592_s9 + $0xa8] sm:$0xff]  ;;  %v2052_v10 = vld [vmem:[%s11592_s9 + $0xb0] sm:$0xff]  ;;  %v2053_v60 = vld [vmem:[%s11592_s9 + $0xb8] sm:$0xff] }
 0x5a8   : > { %v1998_v52 = vadd.f32 %v7698_v48, %v1990_v51  ;;  %v7711_v48 = vcombine.low %v2035_v37, %v2043_v38  ;;  %v7726_v51 = vcombine.high %v2050_v43, %v2058_v44  ;;  %v7730_v0 = vcombine.high %v2052_v10, %v2060_v59  ;;  %v9356_v28 = vld [vmem:[%s11594_s11 + $0xe8] sm:$0xff]   ;;  %v9364_v37 = vld [vmem:[%s11594_s11 + $0xf8] sm:$0xff]  }
 0x5a9   : > { %2350 = vmatprep.subr.bf16.mxu0 %v7704_v63  ;;  %v7732_v2 = vcombine.high %v2053_v60, %v2061_v61  ;;  %v7729_v3 = vcombine.low %v2052_v10, %v2060_v59  ;;  %v7731_v4 = vcombine.low %v2053_v60, %v2061_v61  ;;  %v9365_v38 = vld [vmem:[%s11594_s11 + $0x38] sm:$0xff]  }
 0x5aa   : > { %v2001_v49 = vsel %vm745_vm2, %v1998_v52, 0.0  ;;  %2351 = vmatpush1.bf16.msra.mxu0 %v7703_v62 }
 0x5ab   : > { %2002 = vadd.xlane.f32.xlu0 %v2001_v49  ;;  %2352 = vmatprep.subr.bf16.mxu0 %v7720_v8  ;;  %v2036_v49 = vld [vmem:[%s11592_s9 + $0x30] sm:$0xff]  ;;  %v9338_v8 = vld [vmem:[%s11594_s11 + $0x80] sm:$0xff]  }
 0x5ae   : > { %2353 = vmatpush1.bf16.msra.mxu0 %v7719_v7  ;;  %v9337_v7 = vld [vmem:[%s11594_s11] sm:$0xff]  }
 0x5af   : > { %2432 = vmatprep.subr.bf16.mxu0 %v7708_v18  ;;  %v9346_v18 = vld [vmem:[%s11594_s11 + $0x90] sm:$0xff]  }
 0x638   : > { %v2003_v53 = vpop.xlane.xlu0 %2002 }
 0x639   : > { %v2005_v50 = vmul.f32 0.03125, %v2003_v53  ;;  %v2044_v53 = vld [vmem:[%s11592_s9 + $0x70] sm:$0xff] }
 0x63a   : > { %v7714_v57 = vcombine.high %v2036_v49, %v2044_v53  ;;  %v7713_v62 = vcombine.low %v2036_v49, %v2044_v53 }
 0x63b   : > { %v2006_v54 = vsub.f32 %v1998_v52, %v2005_v50  ;;  %v7728_v52 = vcombine.high %v2051_v45, %v2059_v46  ;;  %v2037_v50 = vld [vmem:[%s11592_s9 + $0x38] sm:$0xff] }
 0x63d   : > { %v2007_v55 = vmul.f32 %v2006_v54, %v2006_v54 }
 0x63f   : > { %v2008_v56 = vsel %vm745_vm2, %v2007_v55, 0.0  ;;  %v7725_v55 = vcombine.low %v2050_v43, %v2058_v44 }
 0x640   : > { %2009 = vadd.xlane.f32.xlu1 %v2008_v56  ;;  %v7727_v56 = vcombine.low %v2051_v45, %v2059_v46  ;;  %v10310_v46 = vld [vmem:[%s11593_s10] sm:$0xff] }
 0x6cd   : > { %v2010_v19 = vpop.xlane.xlu1 %2009 }
 0x6ce   : > { %v2011_v20 = vmul.f32 0.03125, %v2010_v19  ;;  %v9347_v19 = vld [vmem:[%s11594_s11 + $0x58] sm:$0xff]  }
 0x6d0   : > { %v2012_v21 = vadd.f32 1e-05, %v2011_v20  ;;  %v9348_v20 = vld [vmem:[%s11594_s11 + $0xd8] sm:$0xff]  }
 0x6d2   : > { %9633 = vrsqrt.f32 %v2012_v21  ;;  %v9349_v21 = vld [vmem:[%s11594_s11 + $0x18] sm:$0xff]  }
 0x6dc   : > { %v9634_v22 = vpop.eup %9633 }
 0x6dd   : > { %v2014_v24 = vmul.f32 %v9634_v22, %v2006_v54  ;;  %v2045_v54 = vld [vmem:[%s11592_s9 + $0x78] sm:$0xff] }
 0x6de   : > { %v7716_v58 = vcombine.high %v2037_v50, %v2045_v54  ;;  %v7715_v63 = vcombine.low %v2037_v50, %v2045_v54  ;;  %v9350_v22 = vld [vmem:[%s11594_s11 + $0x98] sm:$0xff]  }
 0x6df   : > { %v2021_v26 = vmul.f32 %v7699_v23, %v2014_v24  ;;  %v9351_v23 = vld [vmem:[%s11594_s11 + $0x60] sm:$0xff]  }
 0x6e0   : > { %v9352_v24 = vld [vmem:[%s11594_s11 + $0xe0] sm:$0xff]  }
 0x6e1   : > { %v10121_v31 = vadd.f32 %v7700_v25, %v2021_v26  ;;  %v9353_v25 = vld [vmem:[%s11594_s11 + $0x20] sm:$0xff]  }
 0x6e2   : > { %v9354_v26 = vld [vmem:[%s11594_s11 + $0xa0] sm:$0xff]  }
 0x6e3   : > { %v10125_v32 = vpack.c.bf16 %v10121_v31, %v10121_v31 }
 0x6e5   : > { %7733 = vmatmul.mubr.msk.bf16.vlgmr.msra.gmra.mrb[48].mxu1 %vm745_vm2, %v10125_v32  ;;  %7734 = vmatmul.mubr.msk.bf16.vlgmr.msra.gmra.mrb[52].mxu0 %vm745_vm2, %v10125_v32 }
 0x6e6   : > { %2392 = vmatpush1.bf16.msra.mxu1 %v7705_v16  ;;  %2433 = vmatpush1.bf16.msra.mxu0 %v7707_v17  ;;  %v9344_v16 = vld [vmem:[%s11594_s11 + $0xd0] sm:$0xff]  }
 0x6e7   : > { %2393 = vmatprep.subr.bf16.mxu1 %v7722_v33  ;;  %2434 = vmatprep.subr.bf16.mxu0 %v7724_v34  ;;  %v9345_v17 = vld [vmem:[%s11594_s11 + $0x10] sm:$0xff]  }
 0x6e8   : > { %2423 = vmatprep.mubr.bf16.mxu1 %v9667_v13  ;;  %2464 = vmatprep.mubr.bf16.mxu0 %v9667_v13  ;;  %v9360_v33 = vld [vmem:[%s11594_s11 + $0xf0] sm:$0xff]  }
 0x6e9   : > { %v9361_v34 = vld [vmem:[%s11594_s11 + $0x30] sm:$0xff]  }
 0x6ea   : > { %2394 = vmatpush1.bf16.msra.mxu1 %v7721_v39  ;;  %2435 = vmatpush1.bf16.msra.mxu0 %v7723_v40  ;;  %v9366_v39 = vld [vmem:[%s11594_s11 + $0xb8] sm:$0xff]   ;;  %v9367_v40 = vld [vmem:[%s11594_s11 + $0x140] sm:$0xff]  }
 0x6eb   : > { %2473 = vmatprep.subr.bf16.mxu1 %v7710_v41  ;;  %2514 = vmatprep.subr.bf16.mxu0 %v7712_v42  ;;  %v9368_v41 = vld [vmem:[%s11594_s11 + $0x1c0] sm:$0xff]   ;;  %v2066_v42 = vlaneseq }
 0x6ed   : > { %7735 = vmatmul.mubr.msk.bf16.vlgmr.msra.gmra.mrb[52].mxu1 %vm745_vm2, %v10125_v32  ;;  %7736 = vmatmul.mubr.msk.bf16.vlgmr.msra.gmra.mrb[56].mxu0 %vm745_vm2, %v10125_v32  ;;  %v10299_v43 = vshrl.u32 %v2066_v42, 7 }
 0x6ee   : > { %2474 = vmatpush1.bf16.msra.mxu1 %v7709_v47  ;;  %2515 = vmatpush1.bf16.msra.mxu0 %v7711_v48 }
 0x6ef   : > { %2475 = vmatprep.subr.bf16.mxu1 %v7726_v51  ;;  %2516 = vmatprep.subr.bf16.mxu0 %v7728_v52  ;;  %v10302_v44 = vsub.s32 0, %v10299_v43  ;;  %v10305_v45 = vsub.s32 2, %v10299_v43  ;;  %v10313_v47 = vsub.s32 1, %v10299_v43  ;;  %v10316_v48 = vsub.s32 3, %v10299_v43 }
 0x6f0   : > { %2505 = vmatprep.mubr.bf16.mxu1 %v9667_v13  ;;  %2546 = vmatprep.mubr.bf16.mxu0 %v9667_v13 }
 0x6f1   : > { %v2069_v51 = vrot.slane %v10310_v46, %v10302_v44  ;;  %v2077_v52 = vrot.slane %v10310_v46, %v10305_v45  ;;  %v2073_v49 = vrot.slane %v10310_v46, %v10313_v47  ;;  %v2081_v53 = vrot.slane %v10310_v46, %v10316_v48 }
 0x6f2   : > { %2476 = vmatpush1.bf16.msra.mxu1 %v7725_v55  ;;  %2517 = vmatpush1.bf16.msra.mxu0 %v7727_v56 }
 0x6f3   : > { %2555 = vmatprep.subr.bf16.mxu1 %v7714_v57  ;;  %2596 = vmatprep.subr.bf16.mxu0 %v7716_v58 }
 0x6f5   : > { %7737 = vmatmul.mubr.msk.bf16.vlgmr.msra.gmra.mrb[56].mxu1 %vm745_vm2, %v10125_v32  ;;  %7738 = vmatmul.mubr.msk.bf16.vlgmr.msra.gmra.mrb[60].mxu0 %vm745_vm2, %v10125_v32 }
 0x6f6   : > { %2556 = vmatpush1.bf16.msra.mxu1 %v7713_v62  ;;  %2597 = vmatpush1.bf16.msra.mxu0 %v7715_v63  ;;  %v10327_v62 = vsub.s32 5, %v10299_v43  ;;  %v10330_v63 = vsub.s32 7, %v10299_v43 }
 0x6f7   : > { %2557 = vmatprep.subr.bf16.mxu1 %v7730_v0  ;;  %2598 = vmatprep.subr.bf16.mxu0 %v7732_v2 }
 0x6f8   : > { %2587 = vmatprep.mubr.bf16.mxu1 %v9667_v13  ;;  %2628 = vmatprep.mubr.bf16.mxu0 %v9667_v13 }
 0x6fa   : > { %2558 = vmatpush1.bf16.msra.mxu1 %v7729_v3  ;;  %2599 = vmatpush1.bf16.msra.mxu0 %v7731_v4 }
 0x6fb   : > { %8534 = vmatprep.subr.bf16.mxu1 %v9335_v5  ;;  %8556 = vmatprep.subr.bf16.mxu0 %v9336_v6 }
 0x6fd   : > { %7739 = vmatmul.mubr.msk.bf16.vlgmr.msra.gmra.mrb[60].mxu1 %vm745_vm2, %v10125_v32  ;;  %7740 = vmatmul.mubr.msk.bf16.vlgmr.msra.gmra.mrb[64].mxu0 %vm745_vm2, %v10125_v32  ;;  %v9359_v32 = vld [vmem:[%s11594_s11 + $0x70] sm:$0xff]  }
 0x6fe   : > { %8535 = vmatpush3.bf16.msra.mxu1 %v9337_v7  ;;  %8557 = vmatpush3.bf16.msra.mxu0 %v9338_v8 }
 0x6ff   : > { %8536 = vmatprep.subr.bf16.mxu1 %v9339_v9  ;;  %8558 = vmatprep.subr.bf16.mxu0 %v9340_v11  ;;  %v2089_v9 = vrot.slane %v10310_v46, %v10327_v62  ;;  %v2097_v11 = vrot.slane %v10310_v46, %v10330_v63 }
 0x702   : > { %8537 = vmatpush3.bf16.msra.mxu1 %v9341_v12  ;;  %8559 = vmatpush3.bf16.msra.mxu0 %v9342_v14  ;;  %v9369_v12 = vld [vmem:[%s11594_s11 + $0x100] sm:$0xff]  }
 0x703   : > { %8538 = vmatprep.subr.bf16.mxu1 %v9343_v15  ;;  %8560 = vmatprep.subr.bf16.mxu0 %v9344_v16  ;;  %v9370_v14 = vld [vmem:[%s11594_s11 + $0x180] sm:$0xff]  }
 0x706   : > { %8539 = vmatpush3.bf16.msra.mxu1 %v9345_v17  ;;  %8561 = vmatpush3.bf16.msra.mxu0 %v9346_v18  ;;  %v9371_v17 = vld [vmem:[%s11594_s11 + $0x148] sm:$0xff]  }
 0x707   : > { %8540 = vmatprep.subr.bf16.mxu1 %v9347_v19  ;;  %8562 = vmatprep.subr.bf16.mxu0 %v9348_v20  ;;  %v9372_v18 = vld [vmem:[%s11594_s11 + $0x1c8] sm:$0xff]  }
 0x70a   : > { %8541 = vmatpush3.bf16.msra.mxu1 %v9349_v21  ;;  %8563 = vmatpush3.bf16.msra.mxu0 %v9350_v22 }
 0x70b   : > { %8542 = vmatprep.subr.bf16.mxu1 %v9351_v23  ;;  %8564 = vmatprep.subr.bf16.mxu0 %v9352_v24 }
 0x70e   : > { %8543 = vmatpush3.bf16.msra.mxu1 %v9353_v25  ;;  %8565 = vmatpush3.bf16.msra.mxu0 %v9354_v26 }
 0x70f   : > { %8544 = vmatprep.subr.bf16.mxu1 %v9355_v27  ;;  %8566 = vmatprep.subr.bf16.mxu0 %v9356_v28  ;;  %v9373_v27 = vld [vmem:[%s11594_s11 + $0x108] sm:$0xff]  }
 0x710   : > { %v9374_v28 = vld [vmem:[%s11594_s11 + $0x188] sm:$0xff]  }
 0x712   : > { %8545 = vmatpush3.bf16.msra.mxu1 %v9357_v29  ;;  %8567 = vmatpush3.bf16.msra.mxu0 %v9358_v30 }
 0x713   : > { %8546 = vmatprep.subr.bf16.mxu1 %v9359_v32  ;;  %8568 = vmatprep.subr.bf16.mxu0 %v9360_v33  ;;  %v9375_v32 = vld [vmem:[%s11594_s11 + $0x150] sm:$0xff]  }
 0x714   : > { %v9376_v33 = vld [vmem:[%s11594_s11 + $0x1d0] sm:$0xff]  }
 0x716   : > { %8547 = vmatpush3.bf16.msra.mxu1 %v9361_v34  ;;  %8569 = vmatpush3.bf16.msra.mxu0 %v9362_v35 }
 0x717   : > { %8548 = vmatprep.subr.bf16.mxu1 %v9363_v36  ;;  %8570 = vmatprep.subr.bf16.mxu0 %v9364_v37 }
 0x71a   : > { %8549 = vmatpush3.bf16.msra.mxu1 %v9365_v38  ;;  %8571 = vmatpush3.bf16.msra.mxu0 %v9366_v39  ;;  %v9377_v38 = vld [vmem:[%s11594_s11 + $0x110] sm:$0xff]  }
 0x71b   : > { %8578 = vmatprep.subr.bf16.mxu1 %v9367_v40  ;;  %8600 = vmatprep.subr.bf16.mxu0 %v9368_v41  ;;  %v9378_v39 = vld [vmem:[%s11594_s11 + $0x190] sm:$0xff]   ;;  %v9379_v40 = vld [vmem:[%s11594_s11 + $0x158] sm:$0xff]  }
 0x71c   : > { %v9380_v41 = vld [vmem:[%s11594_s11 + $0x1d8] sm:$0xff]  }
 0x7b8   : > { %v2343_v50 = vpop.f32.mrb[48].mxu1  ;;  %v2384_v54 = vpop.f32.mrb[52].mxu0 }
 0x7b9   : > { %v2344_v55 = vadd.f32 %v2343_v50, %v2069_v51  ;;  %v2385_v56 = vadd.f32 %v2384_v54, %v2077_v52  ;;  %v2345_v57 = vpop.f32.mrb[49].mxu1  ;;  %v2386_v58 = vpop.f32.mrb[53].mxu0  ;;  %v9381_v54 = vld [vmem:[%s11594_s11 + $0x118] sm:$0xff]  }
 0x7ba   : > { %v2346_v10 = vadd.f32 %v2345_v57, %v2073_v49  ;;  %v2387_v59 = vadd.f32 %v2386_v58, %v2081_v53  ;;  %v2347_v60 = vpop.f32.mrb[50].mxu1  ;;  %v2388_v61 = vpop.f32.mrb[54].mxu0 }
 0x7bb   : > { %v2637_v0 = vmax.f32 %v2344_v55, 0.0  ;;  %v2639_v2 = vmax.f32 %v2385_v56, 0.0  ;;  %v2348_v3 = vpop.f32.mrb[51].mxu1  ;;  %v2389_v4 = vpop.f32.mrb[55].mxu0  ;;  %v9382_v55 = vld [vmem:[%s11594_s11 + $0x198] sm:$0xff]   ;;  %v10387_v56 = vsub.s32 6, %v10299_v43 }
 0x7bc   : > { %v2638_v5 = vmax.f32 %v2346_v10, 0.0  ;;  %v2640_v6 = vmax.f32 %v2387_v59, 0.0  ;;  %v9383_v10 = vld [vmem:[%s11594_s11 + $0x160] sm:$0xff]   ;;  %v10398_v60 = vld [vmem:[%s11593_s10 + $0x8] sm:$0xff]  ;;  %v10409_v3 = vsub.s32 4, %v10299_v43 }
 0x7bd   : > { %v2653_v15 = vpack.c.bf16 %v2637_v0, %v2637_v0  ;;  %v2655_v16 = vpack.c.bf16 %v2639_v2, %v2639_v2  ;;  %v9384_v59 = vld [vmem:[%s11594_s11 + $0x1e0] sm:$0xff]   ;;  %v2125_v61 = vrot.slane %v10398_v60, %v10387_v56  ;;  %v9387_v4 = vld [vmem:[%s11594_s11 + $0x168] sm:$0xff]  }
 0x7be   : > { %v2654_v7 = vpack.c.bf16 %v2638_v5, %v2638_v5  ;;  %v2656_v8 = vpack.c.bf16 %v2640_v6, %v2640_v6  ;;  %v9385_v0 = vld [vmem:[%s11594_s11 + $0x120] sm:$0xff]   ;;  %v9388_v5 = vld [vmem:[%s11594_s11 + $0x1e8] sm:$0xff]  }
 0x7bf   : > { %v9386_v2 = vld [vmem:[%s11594_s11 + $0x1a0] sm:$0xff]  }
 0x7c0   : > { %v10348_v19 = vpop.f32.mrb[52].mxu1  ;;  %v10350_v20 = vpop.f32.mrb[56].mxu0  ;;  %3732 = vmatprep.mubr.bf16.mxu1 %v2654_v7  ;;  %3772 = vmatprep.mubr.bf16.mxu0 %v2656_v8 }
 0x7c1   : > { %v2427_v21 = vpop.f32.mrb[53].mxu1  ;;  %v2468_v22 = vpop.f32.mrb[57].mxu0  ;;  %3733 = vmatmul.mubr.bf16.vlgmr.msra.gmra.mrb[64].mxu1 %v2653_v15  ;;  %3773 = vmatmul.mubr.bf16.vlgmr.msra.gmra.mrb[68].mxu0 %v2655_v16  ;;  %v9390_v15 = vld [vmem:[%s11594_s11 + $0x1a8] sm:$0xff]   ;;  %v2085_v16 = vrot.slane %v10310_v46, %v10409_v3 }
 0x7c2   : > { %v2428_v23 = vadd.f32 %v2427_v21, %v2089_v9  ;;  %v2469_v24 = vadd.f32 %v2468_v22, %v2097_v11  ;;  %8579 = vmatpush3.bf16.msra.mxu1 %v9369_v12  ;;  %8601 = vmatpush3.bf16.msra.mxu0 %v9370_v14  ;;  %v2429_v25 = vpop.f32.mrb[54].mxu1  ;;  %v2470_v26 = vpop.f32.mrb[58].mxu0  ;;  %v9389_v14 = vld [vmem:[%s11594_s11 + $0x128] sm:$0xff]   ;;  %v9391_v22 = vld [vmem:[%s11594_s11 + $0x170] sm:$0xff]  }
 0x7c3   : > { %v2430_v29 = vpop.f32.mrb[55].mxu1  ;;  %v2471_v30 = vpop.f32.mrb[59].mxu0  ;;  %8580 = vmatprep.subr.bf16.mxu1 %v9371_v17  ;;  %8602 = vmatprep.subr.bf16.mxu0 %v9372_v18  ;;  %v2093_v17 = vrot.slane %v10310_v46, %v10387_v56  ;;  %v2113_v25 = vrot.slane %v10398_v60, %v10316_v48  ;;  %v9393_v46 = vld [vmem:[%s11594_s11 + $0x130] sm:$0xff]  }
 0x7c4   : > { %v2642_v34 = vmax.f32 %v2428_v23, 0.0  ;;  %v2644_v35 = vmax.f32 %v2469_v24, 0.0  ;;  %v9392_v23 = vld [vmem:[%s11594_s11 + $0x1f0] sm:$0xff]   ;;  %v2105_v24 = vrot.slane %v10398_v60, %v10313_v47  ;;  %v9395_v29 = vld [vmem:[%s11594_s11 + $0x178] sm:$0xff]  }
 0x7c5   : > { %v9394_v26 = vld [vmem:[%s11594_s11 + $0x1b0] sm:$0xff]   ;;  %v9396_v30 = vld [vmem:[%s11594_s11 + $0x1f8] sm:$0xff]  }
 0x7c6   : > { %v2658_v36 = vpack.c.bf16 %v2642_v34, %v2642_v34  ;;  %v2660_v37 = vpack.c.bf16 %v2644_v35, %v2644_v35  ;;  %8581 = vmatpush3.bf16.msra.mxu1 %v9373_v27  ;;  %8603 = vmatpush3.bf16.msra.mxu0 %v9374_v28  ;;  %v2426_v27 = vadd.f32 %v10348_v19, %v2085_v16  ;;  %v9397_v19 = vld [vmem:[%s11594_s11 + $0x138] sm:$0xff]   ;;  %v9419_v16 = vld [vmem:[%s11594_s11 + $0x268] sm:$0xff]  }
 0x7c7   : > { %8582 = vmatprep.subr.bf16.mxu1 %v9375_v32  ;;  %8604 = vmatprep.subr.bf16.mxu0 %v9376_v33  ;;  %v2467_v28 = vadd.f32 %v10350_v20, %v2093_v17  ;;  %v9398_v20 = vld [vmem:[%s11594_s11 + $0x1b8] sm:$0xff]   ;;  %v9420_v17 = vld [vmem:[%s11594_s11 + $0x2e8] sm:$0xff]  }
 0x7c8   : > { %v10376_v42 = vpop.f32.mrb[56].mxu1  ;;  %v10378_v51 = vpop.f32.mrb[60].mxu0  ;;  %3812 = vmatprep.mubr.bf16.mxu1 %v2658_v36  ;;  %3852 = vmatprep.mubr.bf16.mxu0 %v2660_v37  ;;  %v2641_v34 = vmax.f32 %v2426_v27, 0.0  ;;  %v9399_v36 = vld [vmem:[%s11594_s11 + $0x240] sm:$0xff]   ;;  %v9425_v27 = vld [vmem:[%s11594_s11 + $0x230] sm:$0xff]  }
 0x7c9   : > { %v2509_v52 = vpop.f32.mrb[57].mxu1  ;;  %v2550_v49 = vpop.f32.mrb[61].mxu0  ;;  %v2643_v35 = vmax.f32 %v2467_v28, 0.0  ;;  %v9400_v37 = vld [vmem:[%s11594_s11 + $0x2c0] sm:$0xff]  }
 0x7ca   : > { %8583 = vmatpush3.bf16.msra.mxu1 %v9377_v38  ;;  %8605 = vmatpush3.bf16.msra.mxu0 %v9378_v39  ;;  %v2511_v53 = vpop.f32.mrb[58].mxu1  ;;  %v2552_v50 = vpop.f32.mrb[62].mxu0  ;;  %v2510_v32 = vadd.f32 %v2509_v52, %v2105_v24  ;;  %v2551_v33 = vadd.f32 %v2550_v49, %v2113_v25  ;;  %v9402_v49 = vld [vmem:[%s11594_s11 + $0x280] sm:$0xff]   ;;  %v2109_v24 = vrot.slane %v10398_v60, %v10305_v45  ;;  %v9424_v25 = vld [vmem:[%s11594_s11 + $0x2f0] sm:$0xff]  }
 0x7cb   : > { %v2512_v57 = vpop.f32.mrb[59].mxu1  ;;  %v2553_v58 = vpop.f32.mrb[63].mxu0  ;;  %8584 = vmatprep.subr.bf16.mxu1 %v9379_v40  ;;  %8606 = vmatprep.subr.bf16.mxu0 %v9380_v41  ;;  %v9401_v40 = vld [vmem:[%s11594_s11 + $0x200] sm:$0xff]   ;;  %v2657_v41 = vpack.c.bf16 %v2641_v34, %v2641_v34  ;;  %v2659_v52 = vpack.c.bf16 %v2643_v35, %v2643_v35  ;;  %v9403_v50 = vld [vmem:[%s11594_s11 + $0x248] sm:$0xff]  }
 0x7cc   : > { %v2646_v38 = vmax.f32 %v2510_v32, 0.0  ;;  %v2648_v39 = vmax.f32 %v2551_v33, 0.0  ;;  %v9405_v57 = vld [vmem:[%s11594_s11 + $0x208] sm:$0xff]   ;;  %v2549_v32 = vadd.f32 %v10378_v51, %v2109_v24  ;;  %v9428_v33 = vld [vmem:[%s11594_s11 + $0x2f8] sm:$0xff]   ;;  %v9431_v35 = vld [vmem:[%s11594_s11 + $0x340] sm:$0xff]  }
 0x7cd   : > { %v9406_v58 = vld [vmem:[%s11594_s11 + $0x288] sm:$0xff]   ;;  %v9430_v51 = vld [vmem:[%s11594_s11 + $0x2b8] sm:$0xff]   ;;  %v9458_v24 = vld [vmem:[%s11594_s11 + $0x3b0] sm:$0xff]  }
 0x7ce   : > { %8585 = vmatpush3.bf16.msra.mxu1 %v9381_v54  ;;  %8607 = vmatpush3.bf16.msra.mxu0 %v9382_v55  ;;  %v2662_v53 = vpack.c.bf16 %v2646_v38, %v2646_v38  ;;  %v9404_v54 = vld [vmem:[%s11594_s11 + $0x2c8] sm:$0xff]   ;;  %v2664_v55 = vpack.c.bf16 %v2648_v39, %v2648_v39  ;;  %v9433_v38 = vld [vmem:[%s11594_s11 + $0x300] sm:$0xff]  }
 0x7cf   : > { %8586 = vmatprep.subr.bf16.mxu1 %v9383_v10  ;;  %8608 = vmatprep.subr.bf16.mxu0 %v9384_v59  ;;  %v9407_v10 = vld [vmem:[%s11594_s11 + $0x250] sm:$0xff]  }
 0x7d0   : > { %v10417_v6 = vpop.f32.mrb[60].mxu1  ;;  %v2630_v7 = vpop.f32.mrb[64].mxu0  ;;  %v9408_v59 = vld [vmem:[%s11594_s11 + $0x2d0] sm:$0xff]  }
 0x7d1   : > { %v10419_v8 = vadd.f32 %v2630_v7, %v2125_v61  ;;  %v10421_v9 = vpop.f32.mrb[61].mxu1  ;;  %v10423_v11 = vpop.f32.mrb[65].mxu0  ;;  %v9409_v61 = vld [vmem:[%s11594_s11 + $0x210] sm:$0xff]   ;;  %v9414_v7 = vld [vmem:[%s11594_s11 + $0x298] sm:$0xff]  }
 0x7d2   : > { %8587 = vmatpush3.bf16.msra.mxu1 %v9385_v0  ;;  %8609 = vmatpush3.bf16.msra.mxu0 %v9386_v2  ;;  %v2593_v43 = vpop.f32.mrb[62].mxu1  ;;  %v2634_v12 = vpop.f32.mrb[66].mxu0  ;;  %v9410_v0 = vld [vmem:[%s11594_s11 + $0x290] sm:$0xff]   ;;  %v9411_v2 = vld [vmem:[%s11594_s11 + $0x258] sm:$0xff]  }
 0x7d3   : > { %v2594_v18 = vpop.f32.mrb[63].mxu1  ;;  %v2635_v21 = vpop.f32.mrb[67].mxu0  ;;  %8588 = vmatprep.subr.bf16.mxu1 %v9387_v4  ;;  %8610 = vmatprep.subr.bf16.mxu0 %v9388_v5  ;;  %v9412_v4 = vld [vmem:[%s11594_s11 + $0x2d8] sm:$0xff]   ;;  %v9415_v43 = vld [vmem:[%s11594_s11 + $0x260] sm:$0xff]  }
 0x7d4   : > { %v9413_v5 = vld [vmem:[%s11594_s11 + $0x218] sm:$0xff]   ;;  %v9416_v12 = vld [vmem:[%s11594_s11 + $0x2e0] sm:$0xff]   ;;  %v9421_v18 = vld [vmem:[%s11594_s11 + $0x228] sm:$0xff]   ;;  %v2101_v21 = vrot.slane %v10398_v60, %v10302_v44 }
 0x7d6   : > { %8589 = vmatpush3.bf16.msra.mxu1 %v9389_v14  ;;  %8611 = vmatpush3.bf16.msra.mxu0 %v9390_v15  ;;  %v9417_v14 = vld [vmem:[%s11594_s11 + $0x220] sm:$0xff]   ;;  %v2508_v28 = vadd.f32 %v10376_v42, %v2101_v21  ;;  %v9455_v21 = vld [vmem:[%s11594_s11 + $0x370] sm:$0xff]  }
 0x7d7   : > { %8590 = vmatprep.subr.bf16.mxu1 %v9391_v22  ;;  %8612 = vmatprep.subr.bf16.mxu0 %v9392_v23  ;;  %v9418_v15 = vld [vmem:[%s11594_s11 + $0x2a0] sm:$0xff]   ;;  %v9422_v22 = vld [vmem:[%s11594_s11 + $0x2a8] sm:$0xff]   ;;  %v9423_v23 = vld [vmem:[%s11594_s11 + $0x270] sm:$0xff]  }
 0x7d8   : > { %v2645_v34 = vmax.f32 %v2508_v28, 0.0  ;;  %v2651_v28 = vmax.f32 %v10419_v8, 0.0  ;;  %v7741_v8 = vld [vmem:[%s11595_s12] ss:$0 sm:$0xff] }
 0x7da   : > { %8591 = vmatpush3.bf16.msra.mxu1 %v9393_v46  ;;  %8613 = vmatpush3.bf16.msra.mxu0 %v9394_v26  ;;  %v2121_v46 = vrot.slane %v10398_v60, %v10327_v62  ;;  %v2129_v26 = vrot.slane %v10398_v60, %v10330_v63  ;;  %v2661_v39 = vpack.c.bf16 %v2645_v34, %v2645_v34 }
 0x7db   : > { %8592 = vmatprep.subr.bf16.mxu1 %v9395_v29  ;;  %8614 = vmatprep.subr.bf16.mxu0 %v9396_v30  ;;  %v9426_v29 = vld [vmem:[%s11594_s11 + $0x2b0] sm:$0xff]   ;;  %v9427_v30 = vld [vmem:[%s11594_s11 + $0x278] sm:$0xff]  }
 0x7dc   : > { %v2633_v42 = vadd.f32 %v10423_v11, %v2129_v26 }
 0x7de   : > { %8593 = vmatpush3.bf16.msra.mxu1 %v9397_v19  ;;  %8615 = vmatpush3.bf16.msra.mxu0 %v9398_v20  ;;  %v2592_v19 = vadd.f32 %v10421_v9, %v2121_v46  ;;  %v9429_v20 = vld [vmem:[%s11594_s11 + $0x238] sm:$0xff]   ;;  %v9432_v9 = vld [vmem:[%s11594_s11 + $0x3c0] sm:$0xff]  }
 0x7df   : > { %8622 = vmatprep.subr.bf16.mxu1 %v9399_v36  ;;  %8644 = vmatprep.subr.bf16.mxu0 %v9400_v37  ;;  %v2647_v36 = vmax.f32 %v2549_v32, 0.0  ;;  %v2652_v37 = vmax.f32 %v2633_v42, 0.0  ;;  %v9460_v46 = vld [vmem:[%s11594_s11 + $0x3f8] sm:$0xff]  }
 0x7e0   : > { %v2650_v11 = vmax.f32 %v2592_v19, 0.0 }
 0x7e1   : > { %3813 = vmatmul.mubr.bf16.vlgmr.msra.gmra.mrb[68].mxu1 %v2657_v41  ;;  %3853 = vmatmul.mubr.bf16.vlgmr.msra.gmra.mrb[72].mxu0 %v2659_v52  ;;  %v2663_v41 = vpack.c.bf16 %v2647_v36, %v2647_v36  ;;  %v9435_v52 = vld [vmem:[%s11594_s11 + $0x348] sm:$0xff]  }
 0x7e2   : > { %8623 = vmatpush3.bf16.msra.mxu1 %v9401_v40  ;;  %3892 = vmatprep.mubr.bf16.mxu1 %v2662_v53  ;;  %v9434_v40 = vld [vmem:[%s11594_s11 + $0x380] sm:$0xff]   ;;  %v9436_v53 = vld [vmem:[%s11594_s11 + $0x3c8] sm:$0xff]  }
 0x7e3   : > { %8645 = vmatpush3.bf16.msra.mxu0 %v9402_v49  ;;  %3932 = vmatprep.mubr.bf16.mxu0 %v2664_v55  ;;  %v2666_v49 = vpack.c.bf16 %v2650_v11, %v2650_v11  ;;  %v9438_v55 = vld [vmem:[%s11594_s11 + $0x388] sm:$0xff]  }
 0x7e4   : > { %8624 = vmatprep.subr.bf16.mxu1 %v9403_v50  ;;  %8646 = vmatprep.subr.bf16.mxu0 %v9404_v54  ;;  %v2668_v50 = vpack.c.bf16 %v2652_v37, %v2652_v37  ;;  %v9437_v54 = vld [vmem:[%s11594_s11 + $0x308] sm:$0xff]  }
 0x7e6   : > { %8625 = vmatpush3.bf16.msra.mxu1 %v9405_v57  ;;  %v9439_v57 = vld [vmem:[%s11594_s11 + $0x350] sm:$0xff]  }
 0x7e7   : > { %8647 = vmatpush3.bf16.msra.mxu0 %v9406_v58  ;;  %8626 = vmatprep.subr.bf16.mxu1 %v9407_v10  ;;  %v9440_v58 = vld [vmem:[%s11594_s11 + $0x3d0] sm:$0xff]  }
 0x7e8   : > { %8648 = vmatprep.subr.bf16.mxu0 %v9408_v59  ;;  %v9441_v10 = vld [vmem:[%s11594_s11 + $0x310] sm:$0xff]  }
 0x7e9   : > { %v9442_v59 = vld [vmem:[%s11594_s11 + $0x390] sm:$0xff]  }
 0x7ea   : > { %8627 = vmatpush3.bf16.msra.mxu1 %v9409_v61  ;;  %v9443_v61 = vld [vmem:[%s11594_s11 + $0x358] sm:$0xff]  }
 0x7eb   : > { %8649 = vmatpush3.bf16.msra.mxu0 %v9410_v0  ;;  %8628 = vmatprep.subr.bf16.mxu1 %v9411_v2  ;;  %v9444_v0 = vld [vmem:[%s11594_s11 + $0x3d8] sm:$0xff]  }
 0x7ec   : > { %8650 = vmatprep.subr.bf16.mxu0 %v9412_v4  ;;  %v9445_v2 = vld [vmem:[%s11594_s11 + $0x318] sm:$0xff]  }
 0x7ed   : > { %v9446_v4 = vld [vmem:[%s11594_s11 + $0x398] sm:$0xff]  }
 0x7ee   : > { %8629 = vmatpush3.bf16.msra.mxu1 %v9413_v5  ;;  %v9447_v5 = vld [vmem:[%s11594_s11 + $0x360] sm:$0xff]  }
 0x7ef   : > { %8651 = vmatpush3.bf16.msra.mxu0 %v9414_v7  ;;  %8630 = vmatprep.subr.bf16.mxu1 %v9415_v43  ;;  %v9448_v7 = vld [vmem:[%s11594_s11 + $0x3e0] sm:$0xff]  }
 0x7f0   : > { %8652 = vmatprep.subr.bf16.mxu0 %v9416_v12  ;;  %v9449_v43 = vld [vmem:[%s11594_s11 + $0x320] sm:$0xff]  }
 0x7f1   : > { %v9450_v12 = vld [vmem:[%s11594_s11 + $0x3a0] sm:$0xff]  }
 0x7f2   : > { %8631 = vmatpush3.bf16.msra.mxu1 %v9417_v14  ;;  %v9451_v14 = vld [vmem:[%s11594_s11 + $0x368] sm:$0xff]  }
 0x7f3   : > { %8653 = vmatpush3.bf16.msra.mxu0 %v9418_v15  ;;  %8632 = vmatprep.subr.bf16.mxu1 %v9419_v16  ;;  %v9452_v15 = vld [vmem:[%s11594_s11 + $0x3e8] sm:$0xff]  }
 0x7f4   : > { %8654 = vmatprep.subr.bf16.mxu0 %v9420_v17  ;;  %v9453_v16 = vld [vmem:[%s11594_s11 + $0x328] sm:$0xff]   ;;  %v2117_v17 = vrot.slane %v10398_v60, %v10409_v3  ;;  %v9457_v60 = vld [vmem:[%s11594_s11 + $0x330] sm:$0xff]  }
 0x7f6   : > { %8633 = vmatpush3.bf16.msra.mxu1 %v9421_v18  ;;  %v9454_v18 = vld [vmem:[%s11594_s11 + $0x3a8] sm:$0xff]  }
 0x7f7   : > { %8655 = vmatpush3.bf16.msra.mxu0 %v9422_v22  ;;  %8634 = vmatprep.subr.bf16.mxu1 %v9423_v23  ;;  %v9456_v22 = vld [vmem:[%s11594_s11 + $0x3f0] sm:$0xff]   ;;  %v2590_v23 = vadd.f32 %v10417_v6, %v2117_v17  ;;  %v9461_v6 = vld [vmem:[%s11594_s11 + $0x338] sm:$0xff]  }
 0x7f8   : > { %8656 = vmatprep.subr.bf16.mxu0 %v9424_v25  ;;  %v9459_v25 = vld [vmem:[%s11594_s11 + $0x378] sm:$0xff]  }
 0x7f9   : > { %v2649_v26 = vmax.f32 %v2590_v23, 0.0 }
 0x7fa   : > { %8635 = vmatpush3.bf16.msra.mxu1 %v9425_v27  ;;  %v9462_v27 = vld [vmem:[%s11594_s11 + $0x3b8] sm:$0xff]  }
 0x7fb   : > { %8657 = vmatpush3.bf16.msra.mxu0 %v9426_v29  ;;  %8636 = vmatprep.subr.bf16.mxu1 %v9427_v30  ;;  %v2665_v29 = vpack.c.bf16 %v2649_v26, %v2649_v26  ;;  %v2667_v30 = vpack.c.bf16 %v2651_v28, %v2651_v28 }
 0x7fc   : > { %8658 = vmatprep.subr.bf16.mxu0 %v9428_v33 }
 0x7fe   : > { %8637 = vmatpush3.bf16.msra.mxu1 %v9429_v20 }
 0x7ff   : > { %8659 = vmatpush3.bf16.msra.mxu0 %v9430_v51  ;;  %8666 = vmatprep.subr.bf16.mxu1 %v9431_v35 }
 0x800   : > { %8688 = vmatprep.subr.bf16.mxu0 %v9432_v9 }
 0x801   : > { %3893 = vmatmul.mubr.bf16.vlgmr.msra.gmra.mrb[72].mxu1 %v2661_v39 }
 0x802   : > { %3933 = vmatmul.mubr.bf16.vlgmr.msra.gmra.mrb[76].mxu0 %v2663_v41  ;;  %8667 = vmatpush3.bf16.msra.mxu1 %v9433_v38 }
 0x803   : > { %3972 = vmatprep.mubr.bf16.mxu1 %v2666_v49  ;;  %8689 = vmatpush3.bf16.msra.mxu0 %v9434_v40 }
 0x804   : > { %4012 = vmatprep.mubr.bf16.mxu0 %v2668_v50  ;;  %8668 = vmatprep.subr.bf16.mxu1 %v9435_v52 }
 0x805   : > { %8690 = vmatprep.subr.bf16.mxu0 %v9436_v53 }
 0x806   : > { %8669 = vmatpush3.bf16.msra.mxu1 %v9437_v54 }
 0x807   : > { %8691 = vmatpush3.bf16.msra.mxu0 %v9438_v55  ;;  %8670 = vmatprep.subr.bf16.mxu1 %v9439_v57 }
 0x808   : > { %8692 = vmatprep.subr.bf16.mxu0 %v9440_v58 }
 0x80a   : > { %8671 = vmatpush3.bf16.msra.mxu1 %v9441_v10 }
 0x80b   : > { %8693 = vmatpush3.bf16.msra.mxu0 %v9442_v59  ;;  %8672 = vmatprep.subr.bf16.mxu1 %v9443_v61 }
 0x80c   : > { %8694 = vmatprep.subr.bf16.mxu0 %v9444_v0 }
 0x80e   : > { %8673 = vmatpush3.bf16.msra.mxu1 %v9445_v2 }
 0x80f   : > { %8695 = vmatpush3.bf16.msra.mxu0 %v9446_v4  ;;  %8674 = vmatprep.subr.bf16.mxu1 %v9447_v5 }
 0x810   : > { %8696 = vmatprep.subr.bf16.mxu0 %v9448_v7 }
 0x812   : > { %8675 = vmatpush3.bf16.msra.mxu1 %v9449_v43 }
 0x813   : > { %8697 = vmatpush3.bf16.msra.mxu0 %v9450_v12  ;;  %8676 = vmatprep.subr.bf16.mxu1 %v9451_v14 }
 0x814   : > { %8698 = vmatprep.subr.bf16.mxu0 %v9452_v15 }
 0x816   : > { %8677 = vmatpush3.bf16.msra.mxu1 %v9453_v16 }
 0x817   : > { %8699 = vmatpush3.bf16.msra.mxu0 %v9454_v18  ;;  %8678 = vmatprep.subr.bf16.mxu1 %v9455_v21 }
 0x818   : > { %8700 = vmatprep.subr.bf16.mxu0 %v9456_v22 }
 0x81a   : > { %8679 = vmatpush3.bf16.msra.mxu1 %v9457_v60 }
 0x81b   : > { %8701 = vmatpush3.bf16.msra.mxu0 %v9458_v24  ;;  %8680 = vmatprep.subr.bf16.mxu1 %v9459_v25 }
 0x81c   : > { %8702 = vmatprep.subr.bf16.mxu0 %v9460_v46 }
 0x81e   : > { %8681 = vmatpush3.bf16.msra.mxu1 %v9461_v6 }
 0x81f   : > { %8703 = vmatpush3.bf16.msra.mxu0 %v9462_v27  ;;  %9123 = vmatprep.subr.bf16.mxu1 %v9665_v1 }
 0x820   : > { %9131 = vmatprep.subr.bf16.mxu0 %v9665_v1 }
 0x821   : > { %3973 = vmatmul.mubr.bf16.vlgmr.msra.gmra.mrb[76].mxu1 %v2665_v29 }
 0x822   : > { %4013 = vmatmul.mubr.bf16.vlgmr.msra.gmra.mrb[80].mxu0 %v2667_v30  ;;  %9127 = vmatprep.mubr.msk.bf16.mxu1 %vm9666_vm0, %v9665_v1 }
 0x823   : > { %9135 = vmatprep.mubr.msk.bf16.mxu0 %vm9666_vm0, %v9665_v1 }
 0x894   : > { %v8550_v32 = vpop.f32.mrb[64].mxu1  ;;  %v8572_v33 = vpop.f32.mrb[68].mxu0 }
 0x895   : > { %v8551_v19 = vpop.f32.mrb[65].mxu1  ;;  %v8573_v42 = vpop.f32.mrb[69].mxu0 }
 0x896   : > { %v8552_v20 = vadd.f32 %v8551_v19, %v8550_v32  ;;  %v8574_v34 = vadd.f32 %v8573_v42, %v8572_v33  ;;  %v8553_v51 = vpop.f32.mrb[66].mxu1  ;;  %v8575_v35 = vpop.f32.mrb[70].mxu0  ;;  %v9463_v19 = vld [vmem:[%s11586_s3 + $0xc0] sm:$0xff]   ;;  %v9464_v42 = vld [vmem:[%s11586_s3 + $0xd0] sm:$0xff]  }
 0x897   : > { %v8554_v36 = vpop.f32.mrb[67].mxu1  ;;  %v8576_v9 = vpop.f32.mrb[71].mxu0  ;;  %9124 = vmatpush3.bf16.msra.mxu1 %v9463_v19  ;;  %9132 = vmatpush3.bf16.msra.mxu0 %v9464_v42 }
 0x898   : > { %v3735_v11 = vadd.f32 %v8552_v20, %v7741_v8  ;;  %9125 = vmatprep.subr.bf16.mxu1 %v9665_v1  ;;  %9133 = vmatprep.subr.bf16.mxu0 %v9665_v1  ;;  %v9466_v20 = vld [vmem:[%s11586_s3 + $0xd8] sm:$0xff]   ;;  %v7870_v9 = vld [vmem:[%s11596_s13] ss:$0 sm:$0xff] }
 0x89a   : > { %v3775_v37 = vadd.f32 %v8574_v34, %v3735_v11 }
 0x89b   : > { %9134 = vmatpush3.bf16.msra.mxu0 %v9466_v20 }
 0x89c   : > { %9147 = vmatprep.subr.bf16.mxu0 %v9665_v1 }
 0x8b4   : > { %v8594_v38 = vpop.f32.mrb[68].mxu1  ;;  %v8616_v39 = vpop.f32.mrb[72].mxu0 }
 0x8b5   : > { %v8595_v40 = vpop.f32.mrb[69].mxu1  ;;  %v8617_v41 = vpop.f32.mrb[73].mxu0 }
 0x8b6   : > { %v8596_v52 = vadd.f32 %v8595_v40, %v8594_v38  ;;  %v8618_v49 = vadd.f32 %v8617_v41, %v8616_v39  ;;  %v8597_v53 = vpop.f32.mrb[70].mxu1  ;;  %v8619_v50 = vpop.f32.mrb[74].mxu0  ;;  %v9467_v40 = vld [vmem:[%s11586_s3 + $0xe0] sm:$0xff]   ;;  %v9468_v41 = vld [vmem:[%s11586_s3 + $0xf0] sm:$0xff]  }
 0x8b7   : > { %v8598_v54 = vpop.f32.mrb[71].mxu1  ;;  %v8620_v55 = vpop.f32.mrb[75].mxu0  ;;  %v9470_v53 = vld [vmem:[%s11586_s3 + $0xf8] sm:$0xff]   ;;  %v9471_v50 = vld [vmem:[%s11586_s3 + $0x100] sm:$0xff]  }
 0x8b8   : > { %v3815_v57 = vadd.f32 %v8596_v52, %v3775_v37  ;;  %v7871_v37 = vld [vmem:[%s11597_s14] ss:$0 sm:$0xff]  ;;  %v9472_v54 = vld [vmem:[%s11586_s3 + $0x110] sm:$0xff]   ;;  %v9473_v55 = vld [vmem:[%s11586_s3 + $0x108] sm:$0xff]  }
 0x8ba   : > { %v3855_v58 = vadd.f32 %v8618_v49, %v3815_v57  ;;  %v9469_v49 = vld [vmem:[%s11586_s3 + $0xe8] sm:$0xff]   ;;  %v9474_v57 = vld [vmem:[%s11586_s3 + $0x118] sm:$0xff]  }
 0x8d4   : > { %v8638_v10 = vpop.f32.mrb[72].mxu1 }
 0x8d5   : > { %v8660_v59 = vpop.f32.mrb[76].mxu0  ;;  %v8639_v61 = vpop.f32.mrb[73].mxu1 }
 0x8d6   : > { %v8640_v0 = vadd.f32 %v8639_v61, %v8638_v10  ;;  %v8661_v2 = vpop.f32.mrb[77].mxu0  ;;  %v8641_v4 = vpop.f32.mrb[74].mxu1  ;;  %v9476_v10 = vld [vmem:[%s11586_s3 + $0x130] sm:$0xff]   ;;  %v9478_v61 = vld [vmem:[%s11586_s3 + $0x138] sm:$0xff]  }
 0x8d7   : > { %v8662_v5 = vadd.f32 %v8661_v2, %v8660_v59  ;;  %v8663_v7 = vpop.f32.mrb[78].mxu0  ;;  %v8642_v43 = vpop.f32.mrb[75].mxu1  ;;  %v9477_v59 = vld [vmem:[%s11586_s3 + $0x128] sm:$0xff]   ;;  %v9480_v2 = vld [vmem:[%s11586_s3 + $0x150] sm:$0xff]  }
 0x8d8   : > { %v3895_v12 = vadd.f32 %v8640_v0, %v3855_v58  ;;  %v8664_v14 = vpop.f32.mrb[79].mxu0  ;;  %v9475_v58 = vld [vmem:[%s11586_s3 + $0x120] sm:$0xff]   ;;  %v9481_v4 = vld [vmem:[%s11586_s3 + $0x148] sm:$0xff]   ;;  %v9484_v43 = vld [vmem:[%s11586_s3 + $0x170] sm:$0xff]  }
 0x8d9   : > { %v9479_v0 = vld [vmem:[%s11586_s3 + $0x140] sm:$0xff]   ;;  %v9486_v14 = vld [vmem:[%s11586_s3 + $0x178] sm:$0xff]  }
 0x8da   : > { %v3935_v15 = vadd.f32 %v8662_v5, %v3895_v12  ;;  %v9482_v5 = vld [vmem:[%s11586_s3 + $0x158] sm:$0xff]   ;;  %v9483_v7 = vld [vmem:[%s11586_s3 + $0x160] sm:$0xff]   ;;  %v9485_v12 = vld [vmem:[%s11586_s3 + $0x168] sm:$0xff]  }
 0x8f4   : > { %v8682_v16 = vpop.f32.mrb[76].mxu1 }
 0x8f5   : > { %v8704_v17 = vpop.f32.mrb[80].mxu0  ;;  %v8683_v18 = vpop.f32.mrb[77].mxu1 }
 0x8f6   : > { %v8684_v21 = vadd.f32 %v8683_v18, %v8682_v16  ;;  %v8705_v22 = vpop.f32.mrb[81].mxu0  ;;  %v8685_v60 = vpop.f32.mrb[78].mxu1 }
 0x8f7   : > { %v8706_v23 = vadd.f32 %v8705_v22, %v8704_v17  ;;  %v8707_v24 = vpop.f32.mrb[82].mxu0  ;;  %v8686_v25 = vpop.f32.mrb[79].mxu1 }
 0x8f8   : > { %v3975_v46 = vadd.f32 %v8684_v21, %v3935_v15  ;;  %v8708_v6 = vpop.f32.mrb[83].mxu0 }
 0x8fa   : > { %v4015_v26 = vadd.f32 %v8706_v23, %v3975_v46 }
 0x8fc   : > { %v4020_v27 = vadd.f32 %v4015_v26, %v10121_v31  ;;  %v9465_v31 = vld [vmem:[%s11586_s3 + $0xc8] sm:$0xff]  }
 0x8fd   : > { %9126 = vmatpush3.bf16.msra.mxu1 %v9465_v31 }
 0x8fe   : > { %v4023_v28 = vsel %vm745_vm2, %v4020_v27, 0.0  ;;  %9139 = vmatprep.subr.bf16.mxu1 %v9665_v1 }
 0x8ff   : > { %4024 = vadd.xlane.f32.xlu0 %v4023_v28 }
 0x98c   : > { %v4025_v29 = vpop.xlane.xlu0 %4024 }
 0x98d   : > { %v4026_v30 = vmul.f32 0.03125, %v4025_v29 }
 0x98f   : > { %v4027_v32 = vsub.f32 %v4020_v27, %v4026_v30  ;;  %v7936_v30 = vld [vmem:[%s11587_s4 + $0x10] ss:$0 sm:$0xff] }
 0x991   : > { %v4028_v33 = vmul.f32 %v4027_v32, %v4027_v32 }
 0x993   : > { %v4029_v8 = vsel %vm745_vm2, %v4028_v33, 0.0 }
 0x994   : > { %4030 = vadd.xlane.f32.xlu1 %v4029_v8 }
 0xa21   : > { %v4031_v34 = vpop.xlane.xlu1 %4030 }
 0xa22   : > { %v4032_v51 = vmul.f32 0.03125, %v4031_v34 }
 0xa24   : > { %v4033_v35 = vadd.f32 1e-05, %v4032_v51 }
 0xa26   : > { %9635 = vrsqrt.f32 %v4033_v35 }
 0xa30   : > { %v9636_v36 = vpop.eup %9635 }
 0xa31   : > { %v4035_v11 = vmul.f32 %v9636_v36, %v4027_v32  ;;  %v7937_v32 = vld [vmem:[%s11587_s4 + $0x11] ss:$0 sm:$0xff] }
 0xa33   : > { %v4042_v38 = vmul.f32 %v7870_v9, %v4035_v11 }
 0xa35   : > { %v10707_v39 = vadd.f32 %v7871_v37, %v4042_v38  ;;  %v7932_v37 = vld [vmem:[%s11587_s4 + $0xc] ss:$0 sm:$0xff]  ;;  %v7933_v38 = vld [vmem:[%s11587_s4 + $0xd] ss:$0 sm:$0xff] }
 0xa37   : > { %v10717_v52 = vpack.c.bf16 %v10707_v39, %v10707_v39 }
 0xa39   : > { %9128 = vmatmul.mubr.msk.bf16.vlgmr.msra.gmra.mrb[80].mxu1 %vm745_vm2, %v10717_v52  ;;  %9136 = vmatmul.mubr.msk.bf16.vlgmr.msra.gmra.mrb[84].mxu0 %vm745_vm2, %v10717_v52 }
 0xa3a   : > { %9140 = vmatpush3.bf16.msra.mxu1 %v9467_v40  ;;  %9148 = vmatpush3.bf16.msra.mxu0 %v9468_v41 }
 0xa3b   : > { %9141 = vmatprep.subr.bf16.mxu1 %v9665_v1  ;;  %9149 = vmatprep.subr.bf16.mxu0 %v9665_v1 }
 0xa3c   : > { %9143 = vmatprep.mubr.msk.bf16.mxu1 %vm9666_vm0, %v9665_v1  ;;  %9151 = vmatprep.mubr.msk.bf16.mxu0 %vm9666_vm0, %v9665_v1 }
 0xa3e   : > { %9142 = vmatpush3.bf16.msra.mxu1 %v9469_v49  ;;  %9150 = vmatpush3.bf16.msra.mxu0 %v9470_v53  ;;  %v7939_v49 = vld [vmem:[%s11587_s4 + $0x13] ss:$0 sm:$0xff] }
 0xa3f   : > { %9155 = vmatprep.subr.bf16.mxu1 %v9665_v1  ;;  %9163 = vmatprep.subr.bf16.mxu0 %v9665_v1 }
 0xa41   : > { %9144 = vmatmul.mubr.msk.bf16.vlgmr.msra.gmra.mrb[84].mxu1 %vm745_vm2, %v10717_v52  ;;  %9152 = vmatmul.mubr.msk.bf16.vlgmr.msra.gmra.mrb[88].mxu0 %vm745_vm2, %v10717_v52 }
 0xa42   : > { %9156 = vmatpush3.bf16.msra.mxu1 %v9471_v50  ;;  %9164 = vmatpush3.bf16.msra.mxu0 %v9472_v54 }
 0xa43   : > { %9157 = vmatprep.subr.bf16.mxu1 %v9665_v1  ;;  %9165 = vmatprep.subr.bf16.mxu0 %v9665_v1 }
 0xa44   : > { %9159 = vmatprep.mubr.msk.bf16.mxu1 %vm9666_vm0, %v9665_v1  ;;  %9167 = vmatprep.mubr.msk.bf16.mxu0 %vm9666_vm0, %v9665_v1 }
 0xa46   : > { %9158 = vmatpush3.bf16.msra.mxu1 %v9473_v55  ;;  %9166 = vmatpush3.bf16.msra.mxu0 %v9474_v57 }
 0xa47   : > { %9171 = vmatprep.subr.bf16.mxu1 %v9665_v1  ;;  %9179 = vmatprep.subr.bf16.mxu0 %v9665_v1 }
 0xa49   : > { %9160 = vmatmul.mubr.msk.bf16.vlgmr.msra.gmra.mrb[88].mxu1 %vm745_vm2, %v10717_v52  ;;  %9168 = vmatmul.mubr.msk.bf16.vlgmr.msra.gmra.mrb[92].mxu0 %vm745_vm2, %v10717_v52 }
 0xa4a   : > { %9172 = vmatpush3.bf16.msra.mxu1 %v9475_v58  ;;  %9180 = vmatpush3.bf16.msra.mxu0 %v9476_v10 }
 0xa4b   : > { %9173 = vmatprep.subr.bf16.mxu1 %v9665_v1  ;;  %9181 = vmatprep.subr.bf16.mxu0 %v9665_v1 }
 0xa4c   : > { %9175 = vmatprep.mubr.msk.bf16.mxu1 %vm9666_vm0, %v9665_v1  ;;  %9183 = vmatprep.mubr.msk.bf16.mxu0 %vm9666_vm0, %v9665_v1 }
 0xa4e   : > { %9174 = vmatpush3.bf16.msra.mxu1 %v9477_v59  ;;  %9182 = vmatpush3.bf16.msra.mxu0 %v9478_v61 }
 0xa4f   : > { %9187 = vmatprep.subr.bf16.mxu1 %v9665_v1  ;;  %9195 = vmatprep.subr.bf16.mxu0 %v9665_v1 }
 0xa51   : > { %9176 = vmatmul.mubr.msk.bf16.vlgmr.msra.gmra.mrb[92].mxu1 %vm745_vm2, %v10717_v52  ;;  %9184 = vmatmul.mubr.msk.bf16.vlgmr.msra.gmra.mrb[96].mxu0 %vm745_vm2, %v10717_v52 }
 0xa52   : > { %9188 = vmatpush3.bf16.msra.mxu1 %v9479_v0  ;;  %9196 = vmatpush3.bf16.msra.mxu0 %v9480_v2 }
 0xa53   : > { %9189 = vmatprep.subr.bf16.mxu1 %v9665_v1  ;;  %9197 = vmatprep.subr.bf16.mxu0 %v9665_v1 }
 0xa54   : > { %9191 = vmatprep.mubr.msk.bf16.mxu1 %vm9666_vm0, %v9665_v1  ;;  %9199 = vmatprep.mubr.msk.bf16.mxu0 %vm9666_vm0, %v9665_v1 }
 0xa56   : > { %9190 = vmatpush3.bf16.msra.mxu1 %v9481_v4  ;;  %9198 = vmatpush3.bf16.msra.mxu0 %v9482_v5 }
 0xa57   : > { %9203 = vmatprep.subr.bf16.mxu1 %v9665_v1  ;;  %9211 = vmatprep.subr.bf16.mxu0 %v9665_v1 }
 0xa59   : > { %9192 = vmatmul.mubr.msk.bf16.vlgmr.msra.gmra.mrb[96].mxu1 %vm745_vm2, %v10717_v52  ;;  %9200 = vmatmul.mubr.msk.bf16.vlgmr.msra.gmra.mrb[100].mxu0 %vm745_vm2, %v10717_v52 }
 0xa5a   : > { %9204 = vmatpush3.bf16.msra.mxu1 %v9483_v7  ;;  %9212 = vmatpush3.bf16.msra.mxu0 %v9484_v43 }
 0xa5b   : > { %9205 = vmatprep.subr.bf16.mxu1 %v9665_v1  ;;  %9213 = vmatprep.subr.bf16.mxu0 %v9665_v1 }
 0xa5c   : > { %9207 = vmatprep.mubr.msk.bf16.mxu1 %vm9666_vm0, %v9665_v1  ;;  %9215 = vmatprep.mubr.msk.bf16.mxu0 %vm9666_vm0, %v9665_v1 }
 0xa5e   : > { %9206 = vmatpush3.bf16.msra.mxu1 %v9485_v12  ;;  %9214 = vmatpush3.bf16.msra.mxu0 %v9486_v14  ;;  %v7934_v14 = vld [vmem:[%s11587_s4 + $0xe] ss:$0 sm:$0xff] }
 0xa5f   : > { %9219 = vmatprep.subr.bf16.mxu1 %v9665_v1  ;;  %9225 = vmatprep.subr.bf16.mxu0 %v9665_v1 }
 0xa61   : > { %9208 = vmatmul.mubr.msk.bf16.vlgmr.msra.gmra.mrb[100].mxu1 %vm745_vm2, %v10717_v52  ;;  %9216 = vmatmul.mubr.msk.bf16.vlgmr.msra.gmra.mrb[104].mxu0 %vm745_vm2, %v10717_v52  ;;  %v7938_v52 = vld [vmem:[%s11587_s4 + $0x12] ss:$0 sm:$0xff] }
 0xa62   : > { %9221 = vmatprep.mubr.msk.bf16.mxu1 %vm9666_vm0, %v9665_v1  ;;  %9227 = vmatprep.mubr.msk.bf16.mxu0 %vm9666_vm0, %v9665_v1 }
 0xb0c   : > { %v4234_v15 = vpop.f32.mrb[80].mxu1  ;;  %v4286_v16 = vpop.f32.mrb[84].mxu0 }
 0xb0d   : > { %v9129_v17 = vpop.f32.mrb[81].mxu1  ;;  %v9137_v18 = vpop.f32.mrb[85].mxu0  ;;  %v4235_v53 = vadd.f32 %v7932_v37, %v4234_v15  ;;  %v4287_v50 = vadd.f32 %v7933_v38, %v4286_v16  ;;  %v7935_v15 = vld [vmem:[%s11587_s4 + $0xf] ss:$0 sm:$0xff] }
 0xb0e   : > { %v4237_v21 = vpop.f32.mrb[82].mxu1  ;;  %v4289_v22 = vpop.f32.mrb[86].mxu0  ;;  %v7940_v18 = vld [vmem:[%s11587_s4 + $0x14] ss:$0 sm:$0xff] }
 0xb0f   : > { %v9130_v60 = vpop.f32.mrb[83].mxu1  ;;  %v9138_v23 = vpop.f32.mrb[87].mxu0  ;;  %v4812_v2 = vpack.c.bf16 %v4235_v53, %v4235_v53  ;;  %v4813_v4 = vpack.c.bf16 %v4287_v50, %v4287_v50  ;;  %v7941_v21 = vld [vmem:[%s11587_s4 + $0x15] ss:$0 sm:$0xff] }
 0xb14   : > { %v4338_v24 = vpop.f32.mrb[84].mxu1  ;;  %v4390_v25 = vpop.f32.mrb[88].mxu0 }
 0xb15   : > { %v9145_v46 = vpop.f32.mrb[85].mxu1  ;;  %v9153_v6 = vpop.f32.mrb[89].mxu0  ;;  %v4339_v22 = vadd.f32 %v7934_v14, %v4338_v24  ;;  %v4391_v60 = vadd.f32 %v7935_v15, %v4390_v25 }
 0xb16   : > { %v4341_v26 = vpop.f32.mrb[86].mxu1  ;;  %v4393_v27 = vpop.f32.mrb[90].mxu0 }
 0xb17   : > { %v9146_v28 = vpop.f32.mrb[87].mxu1  ;;  %v9154_v29 = vpop.f32.mrb[91].mxu0  ;;  %v4814_v24 = vpack.c.bf16 %v4339_v22, %v4339_v22  ;;  %v4815_v25 = vpack.c.bf16 %v4391_v60, %v4391_v60 }
 0xb1c   : > { %v4442_v33 = vpop.f32.mrb[88].mxu1  ;;  %v4494_v8 = vpop.f32.mrb[92].mxu0 }
 0xb1d   : > { %v4443_v19 = vadd.f32 %v7936_v30, %v4442_v33  ;;  %v4495_v42 = vadd.f32 %v7937_v32, %v4494_v8  ;;  %v9161_v31 = vpop.f32.mrb[89].mxu1  ;;  %v9169_v20 = vpop.f32.mrb[93].mxu0 }
 0xb1e   : > { %v4445_v34 = vpop.f32.mrb[90].mxu1  ;;  %v4497_v51 = vpop.f32.mrb[94].mxu0 }
 0xb1f   : > { %v4816_v35 = vpack.c.bf16 %v4443_v19, %v4443_v19  ;;  %v4817_v36 = vpack.c.bf16 %v4495_v42, %v4495_v42  ;;  %v9162_v9 = vpop.f32.mrb[91].mxu1  ;;  %v9170_v11 = vpop.f32.mrb[95].mxu0 }
 0xb21   : > { %v4824_v40 = vsel %vm1369_vm3, %v4816_v35, 0  ;;  %v4870_v41 = vsel %vm1369_vm3, %v4817_v36, 0 }
 0xb22   : > { %9220 = vmatpush3.bf16.xpose.msra.mxu1 %v4824_v40  ;;  %9226 = vmatpush3.bf16.xpose.msra.mxu0 %v4870_v41 }
 0xb23   : > { %9231 = vmatprep.subr.bf16.mxu1 %v9665_v1  ;;  %9237 = vmatprep.subr.bf16.mxu0 %v9665_v1 }
 0xb24   : > { %v4546_v54 = vpop.f32.mrb[92].mxu1  ;;  %v4598_v55 = vpop.f32.mrb[96].mxu0 }
 0xb25   : > { %v4547_v57 = vadd.f32 %v7938_v52, %v4546_v54  ;;  %v4599_v58 = vadd.f32 %v7939_v49, %v4598_v55  ;;  %v9177_v10 = vpop.f32.mrb[93].mxu1  ;;  %v9185_v59 = vpop.f32.mrb[97].mxu0 }
 0xb26   : > { %v4549_v61 = vpop.f32.mrb[94].mxu1  ;;  %v4601_v0 = vpop.f32.mrb[98].mxu0 }
 0xb27   : > { %v4818_v5 = vpack.c.bf16 %v4547_v57, %v4547_v57  ;;  %v4819_v7 = vpack.c.bf16 %v4599_v58, %v4599_v58  ;;  %v9178_v43 = vpop.f32.mrb[95].mxu1  ;;  %v9186_v12 = vpop.f32.mrb[99].mxu0 }
 0xb29   : > { %v4916_v16 = vsel %vm1369_vm3, %v4818_v5, 0  ;;  %v4962_v17 = vsel %vm1369_vm3, %v4819_v7, 0  ;;  %9222 = vmatmul.mubr.msk.bf16.vlgmr.msra.gmra.mrb[104].mxu1 %vm1369_vm3, %v4812_v2  ;;  %9228 = vmatmul.mubr.msk.bf16.vlgmr.msra.gmra.mrb[108].mxu0 %vm1369_vm3, %v4813_v4 }
 0xb2a   : > { %9232 = vmatpush3.bf16.xpose.msra.mxu1 %v4916_v16  ;;  %9238 = vmatpush3.bf16.xpose.msra.mxu0 %v4962_v17 }
 0xb2b   : > { %9233 = vmatprep.mubr.msk.bf16.mxu1 %vm9666_vm0, %v9665_v1  ;;  %9239 = vmatprep.mubr.msk.bf16.mxu0 %vm9666_vm0, %v9665_v1 }
 0xb2c   : > { %v4650_v23 = vpop.f32.mrb[96].mxu1  ;;  %v4702_v46 = vpop.f32.mrb[100].mxu0  ;;  %9243 = vmatprep.subr.bf16.mxu1 %v9665_v1  ;;  %9249 = vmatprep.subr.bf16.mxu0 %v9665_v1 }
 0xb2d   : > { %v4651_v6 = vadd.f32 %v7940_v18, %v4650_v23  ;;  %v4703_v26 = vadd.f32 %v7941_v21, %v4702_v46  ;;  %v9193_v27 = vpop.f32.mrb[97].mxu1  ;;  %v9201_v28 = vpop.f32.mrb[101].mxu0 }
 0xb2e   : > { %v4653_v29 = vpop.f32.mrb[98].mxu1  ;;  %v4705_v30 = vpop.f32.mrb[102].mxu0 }
 0xb2f   : > { %v5052_v32 = vpack.c.bf16 %v4651_v6, %v4651_v6  ;;  %v5053_v33 = vpack.c.bf16 %v4703_v26, %v4703_v26  ;;  %v9194_v8 = vpop.f32.mrb[99].mxu1  ;;  %v9202_v19 = vpop.f32.mrb[103].mxu0 }
 0xb30   : > { %v7943_v19 = vld [vmem:[%s11587_s4 + $0x17] ss:$0 sm:$0xff] }
 0xb31   : > { %v5060_v42 = vsel %vm1609_vm4, %v5052_v32, 0  ;;  %v5106_v31 = vsel %vm1609_vm4, %v5053_v33, 0  ;;  %9234 = vmatmul.mubr.msk.bf16.vlgmr.msra.gmra.mrb[108].mxu1 %vm1369_vm3, %v4814_v24  ;;  %9240 = vmatmul.mubr.msk.bf16.vlgmr.msra.gmra.mrb[112].mxu0 %vm1369_vm3, %v4815_v25 }
 0xb32   : > { %9244 = vmatpush3.bf16.msra.mxu1 %v5060_v42  ;;  %9250 = vmatpush3.bf16.msra.mxu0 %v5106_v31  ;;  %v7942_v42 = vld [vmem:[%s11587_s4 + $0x16] ss:$0 sm:$0xff] }
 0xb33   : > { %9245 = vmatprep.mubr.msk.bf16.mxu1 %vm9666_vm0, %v9665_v1  ;;  %9251 = vmatprep.mubr.msk.bf16.mxu0 %vm9666_vm0, %v9665_v1 }
 0xb34   : > { %v10893_v20 = vpop.f32.mrb[100].mxu1  ;;  %v10895_v34 = vpop.f32.mrb[104].mxu0  ;;  %9255 = vmatprep.subr.bf16.mxu1 %v9665_v1  ;;  %9261 = vmatprep.subr.bf16.mxu0 %v9665_v1 }
 0xb35   : > { %v9209_v51 = vpop.f32.mrb[101].mxu1  ;;  %v9217_v35 = vpop.f32.mrb[105].mxu0  ;;  %v4807_v31 = vadd.f32 %v7943_v19, %v10895_v34 }
 0xb36   : > { %v4757_v36 = vpop.f32.mrb[102].mxu1  ;;  %v4809_v9 = vpop.f32.mrb[106].mxu0  ;;  %v4755_v35 = vadd.f32 %v7942_v42, %v10893_v20 }
 0xb37   : > { %v9210_v11 = vpop.f32.mrb[103].mxu1  ;;  %v9218_v37 = vpop.f32.mrb[107].mxu0 }
 0xb38   : > { %v5055_v37 = vpack.c.bf16 %v4807_v31, %v4807_v31 }
 0xbfc   : > { %v4860_v38 = vpop.f32.mrb[104].mxu1  ;;  %v4906_v40 = vpop.f32.mrb[108].mxu0 }
 0xbfd   : > { %v9223_v41 = vpop.f32.mrb[105].mxu1  ;;  %v9229_v52 = vpop.f32.mrb[109].mxu0  ;;  %v5007_v49 = vsel %vm1369_vm3, %v4906_v40, -inf  ;;  %v5004_v53 = vsel %vm1369_vm3, %v4860_v38, -inf }
 0xbfe   : > { %5008 = vmax.xlane.f32.xlu1 %v5007_v49  ;;  %v4909_v50 = vpop.f32.mrb[110].mxu0  ;;  %5005 = vmax.xlane.f32.xlu0 %v5004_v53  ;;  %v4863_v54 = vpop.f32.mrb[106].mxu1  ;;  %v5198_v53 = vsel %vm1609_vm4, %v5055_v37, 0 }
 0xbff   : > { %v9224_v55 = vpop.f32.mrb[107].mxu1  ;;  %v9230_v57 = vpop.f32.mrb[111].mxu0  ;;  %v7989_v50 = vld [vmem:[%s11588_s5 + $0x14] sm:$0xf] }
 0xc00   : > { %v7988_v57 = vld [vmem:[%s11588_s5 + $0x10] sm:$0xf] }
 0xc04   : > { %v4952_v58 = vpop.f32.mrb[108].mxu1  ;;  %v4998_v10 = vpop.f32.mrb[112].mxu0 }
 0xc05   : > { %v9235_v59 = vpop.f32.mrb[109].mxu1  ;;  %v9241_v61 = vpop.f32.mrb[113].mxu0  ;;  %v5013_v0 = vsel %vm1369_vm3, %v4998_v10, -inf  ;;  %v5010_v2 = vsel %vm1369_vm3, %v4952_v58, -inf }
 0xc06   : > { %5014 = vmax.xlane.f32.xlu1 %v5013_v0  ;;  %v5001_v4 = vpop.f32.mrb[114].mxu0  ;;  %5011 = vmax.xlane.f32.xlu0 %v5010_v2  ;;  %v4955_v5 = vpop.f32.mrb[110].mxu1  ;;  %v5299_v59 = vsel %vm1609_vm4, %v7989_v50, 0  ;;  %v5253_v0 = vsel %vm1609_vm4, %v7988_v57, 0  ;;  %v7991_v2 = vld [vmem:[%s11588_s5 + $0x1c] sm:$0xf] }
 0xc07   : > { %v9236_v7 = vpop.f32.mrb[111].mxu1  ;;  %v9242_v43 = vpop.f32.mrb[115].mxu0  ;;  %v7990_v4 = vld [vmem:[%s11588_s5 + $0x18] sm:$0xf]  ;;  %v7997_v57 = vld [vmem:[%s11589_s6 + $0x1] ss:$0 sm:$0xff] }
 0xc8b   : > { %v5009_v12 = vpop.xlane.xlu1 %5008  ;;  %v5006_v14 = vpop.xlane.xlu0 %5005 }
 0xc8c   : > { %v5017_v15 = vsub.f32 %v4906_v40, %v5009_v12  ;;  %v5016_v16 = vsub.f32 %v4860_v38, %v5006_v14  ;;  %v5054_v40 = vpack.c.bf16 %v4755_v35, %v4755_v35  ;;  %v5391_v14 = vsel %vm1609_vm4, %v7991_v2, 0 }
 0xc8e   : > { %v5022_v17 = vmul.f32 1.442695, %v5017_v15  ;;  %v5020_v18 = vmul.f32 1.442695, %v5016_v16  ;;  %v5152_v34 = vsel %vm1609_vm4, %v5054_v40, 0 }
 0xc90   : > { %9637 = vpow2.f32 %v5022_v17 }
 0xc91   : > { %9639 = vpow2.f32 %v5020_v18  ;;  %v5345_v18 = vsel %vm1609_vm4, %v7990_v4, 0 }
 0xc93   : > { %v5015_v21 = vpop.xlane.xlu1 %5014  ;;  %v5012_v22 = vpop.xlane.xlu0 %5011 }
 0xc94   : > { %v5019_v60 = vsub.f32 %v4998_v10, %v5015_v21  ;;  %v5018_v23 = vsub.f32 %v4952_v58, %v5012_v22 }
 0xc96   : > { %v5026_v46 = vmul.f32 1.442695, %v5019_v60  ;;  %v5024_v6 = vmul.f32 1.442695, %v5018_v23 }
 0xc98   : > { %9641 = vpow2.f32 %v5026_v46 }
 0xc99   : > { %9643 = vpow2.f32 %v5024_v6 }
 0xc9a   : > { %v9638_v26 = vpop.eup %9637 }
 0xc9b   : > { %v9640_v27 = vpop.eup %9639  ;;  %v5031_v28 = vsel %vm1369_vm3, %v9638_v26, 0.0 }
 0xc9c   : > { %5032 = vadd.xlane.f32.xlu1 %v5031_v28  ;;  %v5028_v29 = vsel %vm1369_vm3, %v9640_v27, 0.0 }
 0xc9d   : > { %5029 = vadd.xlane.f32.xlu0 %v5028_v29 }
 0xca2   : > { %v9642_v30 = vpop.eup %9641 }
 0xca3   : > { %v9644_v24 = vpop.eup %9643  ;;  %v5037_v25 = vsel %vm1369_vm3, %v9642_v30, 0.0 }
 0xca4   : > { %5038 = vadd.xlane.f32.xlu1 %v5037_v25  ;;  %v5034_v32 = vsel %vm1369_vm3, %v9644_v24, 0.0 }
 0xca5   : > { %5035 = vadd.xlane.f32.xlu0 %v5034_v32 }
 0xd29   : > { %v5033_v33 = vpop.xlane.xlu1 %5032 }
 0xd2a   : > { %9645 = vrcp.f32 %v5033_v33  ;;  %v5030_v8 = vpop.xlane.xlu0 %5029 }
 0xd2b   : > { %9647 = vrcp.f32 %v5030_v8 }
 0xd31   : > { %v5039_v51 = vpop.xlane.xlu1 %5038 }
 0xd32   : > { %9649 = vrcp.f32 %v5039_v51  ;;  %v5036_v36 = vpop.xlane.xlu0 %5035 }
 0xd33   : > { %9651 = vrcp.f32 %v5036_v36 }
 0xd34   : > { %v9646_v9 = vpop.eup %9645 }
 0xd35   : > { %v9648_v11 = vpop.eup %9647  ;;  %v5045_v38 = vmul.f32 %v9646_v9, %v9638_v26 }
 0xd36   : > { %v5044_v41 = vmul.f32 %v9648_v11, %v9640_v27 }
 0xd37   : > { %v5049_v52 = vpack.c.bf16 %v5045_v38, %v5045_v38 }
 0xd38   : > { %v5048_v49 = vpack.c.bf16 %v5044_v41, %v5044_v41 }
 0xd39   : > { %9252 = vmatmul.mubr.msk.bf16.vlgmr.msra.gmra.mrb[116].mxu0 %vm1369_vm3, %v5049_v52 }
 0xd3a   : > { %9246 = vmatmul.mubr.msk.bf16.vlgmr.msra.gmra.mrb[112].mxu1 %vm1369_vm3, %v5048_v49  ;;  %9262 = vmatpush3.bf16.msra.mxu0 %v5198_v53 }
 0xd3b   : > { %9256 = vmatpush3.bf16.msra.mxu1 %v5152_v34  ;;  %9257 = vmatprep.mubr.msk.bf16.mxu1 %vm9666_vm0, %v9665_v1 }
 0xd3c   : > { %v9650_v20 = vpop.eup %9649  ;;  %9263 = vmatprep.mubr.msk.bf16.mxu0 %vm9666_vm0, %v9665_v1  ;;  %9267 = vmatprep.subr.bf16.mxu1 %v9665_v1 }
 0xd3d   : > { %v9652_v54 = vpop.eup %9651  ;;  %v5047_v55 = vmul.f32 %v9650_v20, %v9642_v30  ;;  %9273 = vmatprep.subr.bf16.mxu0 %v9665_v1 }
 0xd3e   : > { %v5046_v58 = vmul.f32 %v9652_v54, %v9644_v24 }
 0xd3f   : > { %v5051_v10 = vpack.c.bf16 %v5047_v55, %v5047_v55 }
 0xd40   : > { %v5050_v61 = vpack.c.bf16 %v5046_v58, %v5046_v58 }
 0xd41   : > { %9264 = vmatmul.mubr.msk.bf16.vlgmr.msra.gmra.mrb[120].mxu0 %vm1369_vm3, %v5051_v10 }
 0xd42   : > { %9258 = vmatmul.mubr.msk.bf16.vlgmr.msra.gmra.mrb[116].mxu1 %vm1369_vm3, %v5050_v61  ;;  %9274 = vmatpush3.bf16.msra.mxu0 %v5299_v59 }
 0xd43   : > { %9268 = vmatpush3.bf16.msra.mxu1 %v5253_v0  ;;  %9269 = vmatprep.mubr.msk.bf16.mxu1 %vm9666_vm0, %v9665_v1 }
 0xd44   : > { %9275 = vmatprep.mubr.msk.bf16.mxu0 %vm9666_vm0, %v9665_v1  ;;  %9279 = vmatprep.subr.bf16.mxu1 %v9665_v1 }
 0xd45   : > { %9285 = vmatprep.subr.bf16.mxu0 %v9665_v1 }
 0xe0c   : > { %v5142_v5 = vpop.f32.mrb[116].mxu0 }
 0xe0d   : > { %v5096_v7 = vpop.f32.mrb[112].mxu1  ;;  %v5241_v43 = vpack.c.bf16 %v5142_v5, %v5142_v5  ;;  %v9253_v12 = vpop.f32.mrb[117].mxu0 }
 0xe0e   : > { %v5240_v15 = vpack.c.bf16 %v5096_v7, %v5096_v7  ;;  %v9247_v16 = vpop.f32.mrb[113].mxu1  ;;  %v5145_v17 = vpop.f32.mrb[118].mxu0  ;;  %v8002_v7 = vld [vmem:[%s11592_s9 + $0x100] sm:$0xff] }
 0xe0f   : > { %v5099_v21 = vpop.f32.mrb[114].mxu1  ;;  %v9254_v22 = vpop.f32.mrb[119].mxu0  ;;  %9276 = vmatmul.mubr.msk.bf16.vlgmr.msra.gmra.mrb[124].mxu0 %vm1369_vm3, %v5241_v43  ;;  %v8010_v43 = vld [vmem:[%s11592_s9 + $0x140] sm:$0xff] }
 0xe10   : > { %v9248_v60 = vpop.f32.mrb[115].mxu1  ;;  %9270 = vmatmul.mubr.msk.bf16.vlgmr.msra.gmra.mrb[120].mxu1 %vm1369_vm3, %v5240_v15  ;;  %9286 = vmatpush3.bf16.msra.mxu0 %v5391_v14  ;;  %v8037_v12 = vcombine.high %v8002_v7, %v8010_v43  ;;  %v8011_v14 = vld [vmem:[%s11592_s9 + $0x148] sm:$0xff]  ;;  %v8036_v15 = vcombine.low %v8002_v7, %v8010_v43  ;;  %v8026_v21 = vld [vmem:[%s11592_s9 + $0x1c0] sm:$0xff] }
 0xe11   : > { %9280 = vmatpush3.bf16.msra.mxu1 %v5345_v18  ;;  %9281 = vmatprep.mubr.msk.bf16.mxu1 %vm9666_vm0, %v9665_v1  ;;  %v8018_v18 = vld [vmem:[%s11592_s9 + $0x180] sm:$0xff]  ;;  %v8019_v22 = vld [vmem:[%s11592_s9 + $0x188] sm:$0xff] }
 0xe12   : > { %9287 = vmatprep.mubr.msk.bf16.mxu0 %vm9666_vm0, %v9665_v1  ;;  %5763 = vmatprep.subr.bf16.mxu1 %v8037_v12  ;;  %v8053_v60 = vcombine.high %v8018_v18, %v8026_v21  ;;  %v8016_v12 = vld [vmem:[%s11592_s9 + $0x170] sm:$0xff] }
 0xe14   : > { %v5234_v23 = vpop.f32.mrb[120].mxu0 }
 0xe15   : > { %v5188_v46 = vpop.f32.mrb[116].mxu1  ;;  %v5243_v6 = vpack.c.bf16 %v5234_v23, %v5234_v23  ;;  %v9265_v26 = vpop.f32.mrb[121].mxu0  ;;  %v8027_v23 = vld [vmem:[%s11592_s9 + $0x1c8] sm:$0xff] }
 0xe16   : > { %v5242_v27 = vpack.c.bf16 %v5188_v46, %v5188_v46  ;;  %v9259_v28 = vpop.f32.mrb[117].mxu1  ;;  %v5237_v29 = vpop.f32.mrb[122].mxu0  ;;  %v8052_v46 = vcombine.low %v8018_v18, %v8026_v21  ;;  %v8055_v26 = vcombine.high %v8019_v22, %v8027_v23 }
 0xe17   : > { %v5191_v30 = vpop.f32.mrb[118].mxu1  ;;  %v9266_v24 = vpop.f32.mrb[123].mxu0  ;;  %9288 = vmatmul.mubr.msk.bf16.vlgmr.msra.gmra.mrb[128].mxu0 %vm1369_vm3, %v5243_v6  ;;  %v8054_v6 = vcombine.low %v8019_v22, %v8027_v23  ;;  %v8012_v28 = vld [vmem:[%s11592_s9 + $0x150] sm:$0xff]  ;;  %v8005_v29 = vld [vmem:[%s11592_s9 + $0x118] sm:$0xff] }
 0xe18   : > { %v9260_v25 = vpop.f32.mrb[119].mxu1  ;;  %9282 = vmatmul.mubr.msk.bf16.vlgmr.msra.gmra.mrb[124].mxu1 %vm1369_vm3, %v5242_v27  ;;  %5836 = vmatprep.mubr.bf16.mxu0 %v9667_v13  ;;  %v8004_v27 = vld [vmem:[%s11592_s9 + $0x110] sm:$0xff]  ;;  %v8013_v24 = vld [vmem:[%s11592_s9 + $0x158] sm:$0xff] }
 0xe19   : > { %5795 = vmatprep.mubr.bf16.mxu1 %v9667_v13  ;;  %5764 = vmatpush1.bf16.msra.mxu1 %v8036_v15  ;;  %v8041_v30 = vcombine.high %v8004_v27, %v8012_v28  ;;  %v8040_v25 = vcombine.low %v8004_v27, %v8012_v28  ;;  %v8017_v15 = vld [vmem:[%s11592_s9 + $0x178] sm:$0xff]  ;;  %v8024_v22 = vld [vmem:[%s11592_s9 + $0x1b0] sm:$0xff] }
 0xe1a   : > { %5765 = vmatprep.subr.bf16.mxu1 %v8053_v60  ;;  %v8032_v60 = vld [vmem:[%s11592_s9 + $0x1f0] sm:$0xff]  ;;  %v8025_v23 = vld [vmem:[%s11592_s9 + $0x1b8] sm:$0xff] }
 0xe1b   : > { %v8065_v27 = vcombine.high %v8024_v22, %v8032_v60 }
 0xe1d   : > { %5766 = vmatpush1.bf16.msra.mxu1 %v8052_v46  ;;  %v8033_v46 = vld [vmem:[%s11592_s9 + $0x1f8] sm:$0xff] }
 0xe1e   : > { %5845 = vmatprep.subr.bf16.mxu1 %v8041_v30  ;;  %v8067_v28 = vcombine.high %v8025_v23, %v8033_v46  ;;  %v8066_v30 = vcombine.low %v8025_v23, %v8033_v46 }
 0xee2   : > { %v5335_v32 = vpop.f32.mrb[124].mxu0 }
 0xee3   : > { %v5289_v33 = vpop.f32.mrb[120].mxu1  ;;  %v5434_v8 = vsel %vm745_vm2, %v5335_v32, 0.0  ;;  %v9277_v19 = vpop.f32.mrb[125].mxu0  ;;  %v8042_v32 = vcombine.low %v8005_v29, %v8013_v24 }
 0xee4   : > { %v5433_v42 = vsel %vm745_vm2, %v5289_v33, 0.0  ;;  %v9271_v31 = vpop.f32.mrb[121].mxu1  ;;  %v5338_v51 = vpop.f32.mrb[126].mxu0  ;;  %v8043_v33 = vcombine.high %v8005_v29, %v8013_v24  ;;  %v8064_v29 = vcombine.low %v8024_v22, %v8032_v60  ;;  %v9487_v24 = vld [vmem:[%s11594_s11 + $0x440] sm:$0xff]  }
 0xee5   : > { %v5435_v35 = vadd.f32 %v5434_v8, %v5433_v42  ;;  %v5292_v36 = vpop.f32.mrb[122].mxu1  ;;  %v9278_v9 = vpop.f32.mrb[127].mxu0  ;;  %v8000_v51 = vld [vmem:[%s11590_s7 + $0x1] ss:$0 sm:$0xff] }
 0xee6   : > { %v9272_v11 = vpop.f32.mrb[123].mxu1  ;;  %v8001_v36 = vld [vmem:[%s11591_s8 + $0x1] ss:$0 sm:$0xff] }
 0xee7   : > { %v8020_v11 = vld [vmem:[%s11592_s9 + $0x190] sm:$0xff] }
 0xeea   : > { %v5427_v37 = vpop.f32.mrb[128].mxu0 }
 0xeeb   : > { %v5381_v38 = vpop.f32.mrb[124].mxu1  ;;  %v9289_v40 = vpop.f32.mrb[129].mxu0  ;;  %v5438_v50 = vsel %vm745_vm2, %v5427_v37, 0.0  ;;  %v8028_v37 = vld [vmem:[%s11592_s9 + $0x1d0] sm:$0xff] }
 0xeec   : > { %v5436_v41 = vsel %vm745_vm2, %v5381_v38, 0.0  ;;  %v9283_v52 = vpop.f32.mrb[125].mxu1  ;;  %v5430_v49 = vpop.f32.mrb[130].mxu0  ;;  %v8021_v38 = vld [vmem:[%s11592_s9 + $0x198] sm:$0xff] }
 0xeed   : > { %v5437_v53 = vadd.f32 %v5436_v41, %v5435_v35  ;;  %v5384_v34 = vpop.f32.mrb[126].mxu1  ;;  %v9290_v20 = vpop.f32.mrb[131].mxu0  ;;  %v8029_v40 = vld [vmem:[%s11592_s9 + $0x1d8] sm:$0xff]  ;;  %v8057_v49 = vcombine.high %v8020_v11, %v8028_v37 }
 0xeee   : > { %v9284_v54 = vpop.f32.mrb[127].mxu1  ;;  %v8006_v34 = vld [vmem:[%s11592_s9 + $0x120] sm:$0xff] }
 0xeef   : > { %v5439_v55 = vadd.f32 %v5438_v50, %v5437_v53  ;;  %v8059_v53 = vcombine.high %v8021_v38, %v8029_v40  ;;  %v8014_v20 = vld [vmem:[%s11592_s9 + $0x160] sm:$0xff]  ;;  %v8007_v50 = vld [vmem:[%s11592_s9 + $0x128] sm:$0xff] }
 0xef0   : > { %v8015_v54 = vld [vmem:[%s11592_s9 + $0x168] sm:$0xff] }
 0xef1   : > { %v5440_v58 = vadd.f32 %v5439_v55, %v10707_v39  ;;  %v8003_v39 = vld [vmem:[%s11592_s9 + $0x108] sm:$0xff]  ;;  %v8056_v55 = vcombine.low %v8020_v11, %v8028_v37  ;;  %v9500_v11 = vld [vmem:[%s11594_s11 + $0x4d8] sm:$0xff]  }
 0xef2   : > { %v8038_v16 = vcombine.low %v8003_v39, %v8011_v14  ;;  %v8039_v17 = vcombine.high %v8003_v39, %v8011_v14  ;;  %v8008_v39 = vld [vmem:[%s11592_s9 + $0x130] sm:$0xff]  ;;  %v8009_v14 = vld [vmem:[%s11592_s9 + $0x138] sm:$0xff] }
 0xef3   : > { %v5449_v10 = vadd.f32 %v7997_v57, %v5440_v58  ;;  %v8058_v57 = vcombine.low %v8021_v38, %v8029_v40  ;;  %v8045_v58 = vcombine.high %v8006_v34, %v8014_v20  ;;  %v8049_v18 = vcombine.high %v8008_v39, %v8016_v12  ;;  %v9501_v37 = vld [vmem:[%s11594_s11 + $0x418] sm:$0xff]   ;;  %v9503_v40 = vld [vmem:[%s11594_s11 + $0x460] sm:$0xff]  }
 0xef4   : > { %5804 = vmatprep.subr.bf16.mxu0 %v8039_v17  ;;  %v8051_v21 = vcombine.high %v8009_v14, %v8017_v15  ;;  %v9502_v38 = vld [vmem:[%s11594_s11 + $0x498] sm:$0xff]  }
 0xef5   : > { %v5454_v59 = vsel %vm745_vm2, %v5449_v10, 0.0  ;;  %5805 = vmatpush1.bf16.msra.mxu0 %v8038_v16 }
 0xef6   : > { %5455 = vadd.xlane.f32.xlu0 %v5454_v59  ;;  %5806 = vmatprep.subr.bf16.mxu0 %v8055_v26  ;;  %v8022_v59 = vld [vmem:[%s11592_s9 + $0x1a0] sm:$0xff]  ;;  %v8050_v26 = vcombine.low %v8009_v14, %v8017_v15 }
 0xef9   : > { %5807 = vmatpush1.bf16.msra.mxu0 %v8054_v6  ;;  %v8048_v6 = vcombine.low %v8008_v39, %v8016_v12 }
 0xefa   : > { %5886 = vmatprep.subr.bf16.mxu0 %v8043_v33  ;;  %v9490_v33 = vld [vmem:[%s11594_s11 + $0x480] sm:$0xff]  }
 0xf83   : > { %v5456_v61 = vpop.xlane.xlu0 %5455 }
 0xf84   : > { %v5457_v0 = vmul.f32 0.03125, %v5456_v61  ;;  %v8030_v61 = vld [vmem:[%s11592_s9 + $0x1e0] sm:$0xff] }
 0xf85   : > { %v8061_v7 = vcombine.high %v8022_v59, %v8030_v61  ;;  %v8060_v16 = vcombine.low %v8022_v59, %v8030_v61  ;;  %v9515_v59 = vld [vmem:[%s11594_s11 + $0x478] sm:$0xff]  }
 0xf86   : > { %v5458_v2 = vsub.f32 %v5449_v10, %v5457_v0  ;;  %v8047_v10 = vcombine.high %v8007_v50, %v8015_v54  ;;  %v8023_v0 = vld [vmem:[%s11592_s9 + $0x1a8] sm:$0xff]  ;;  %v9516_v61 = vld [vmem:[%s11594_s11 + $0x4f8] sm:$0xff]  }
 0xf88   : > { %v5459_v4 = vmul.f32 %v5458_v2, %v5458_v2 }
 0xf8a   : > { %v5460_v5 = vsel %vm745_vm2, %v5459_v4, 0.0  ;;  %v8044_v4 = vcombine.low %v8006_v34, %v8014_v20  ;;  %v9507_v34 = vld [vmem:[%s11594_s11 + $0x468] sm:$0xff]  }
 0xf8b   : > { %5461 = vadd.xlane.f32.xlu1 %v5460_v5  ;;  %v8046_v5 = vcombine.low %v8007_v50, %v8015_v54  ;;  %v9508_v20 = vld [vmem:[%s11594_s11 + $0x4e8] sm:$0xff]  }
 0xf8c   : > { %v9509_v50 = vld [vmem:[%s11594_s11 + $0x428] sm:$0xff]  }
 0xf8d   : > { %v9510_v54 = vld [vmem:[%s11594_s11 + $0x4a8] sm:$0xff]  }
0x1018   : > { %v5462_v8 = vpop.xlane.xlu1 %5461 }
0x1019   : > { %v5463_v19 = vmul.f32 0.03125, %v5462_v8  ;;  %v9491_v8 = vld [vmem:[%s11594_s11 + $0x448] sm:$0xff]  }
0x101b   : > { %v5464_v42 = vadd.f32 1e-05, %v5463_v19  ;;  %v9493_v19 = vld [vmem:[%s11594_s11 + $0x408] sm:$0xff]  }
0x101d   : > { %9653 = vrsqrt.f32 %v5464_v42  ;;  %v9494_v42 = vld [vmem:[%s11594_s11 + $0x488] sm:$0xff]  }
0x1027   : > { %v9654_v31 = vpop.eup %9653 }
0x1028   : > { %v5466_v35 = vmul.f32 %v9654_v31, %v5458_v2  ;;  %v8031_v2 = vld [vmem:[%s11592_s9 + $0x1e8] sm:$0xff]  ;;  %v9495_v31 = vld [vmem:[%s11594_s11 + $0x450] sm:$0xff]  }
0x1029   : > { %v8063_v43 = vcombine.high %v8023_v0, %v8031_v2  ;;  %v8062_v17 = vcombine.low %v8023_v0, %v8031_v2  ;;  %v9517_v0 = vld [vmem:[%s11594_s11 + $0x438] sm:$0xff]  }
0x102a   : > { %v5473_v9 = vmul.f32 %v8000_v51, %v5466_v35  ;;  %v9496_v51 = vld [vmem:[%s11594_s11 + $0x4d0] sm:$0xff]   ;;  %v9518_v2 = vld [vmem:[%s11594_s11 + $0x4b8] sm:$0xff]  }
0x102b   : > { %v9497_v35 = vld [vmem:[%s11594_s11 + $0x410] sm:$0xff]  }
0x102c   : > { %v11023_v41 = vadd.f32 %v8001_v36, %v5473_v9  ;;  %v9498_v36 = vld [vmem:[%s11594_s11 + $0x490] sm:$0xff]   ;;  %v9499_v9 = vld [vmem:[%s11594_s11 + $0x458] sm:$0xff]  }
0x102e   : > { %v11027_v52 = vpack.c.bf16 %v11023_v41, %v11023_v41 }
0x1030   : > { %8068 = vmatmul.mubr.msk.bf16.vlgmr.msra.gmra.mrb[128].mxu1 %vm745_vm2, %v11027_v52  ;;  %8069 = vmatmul.mubr.msk.bf16.vlgmr.msra.gmra.mrb[132].mxu0 %vm745_vm2, %v11027_v52 }
0x1031   : > { %5846 = vmatpush1.bf16.msra.mxu1 %v8040_v25  ;;  %5887 = vmatpush1.bf16.msra.mxu0 %v8042_v32  ;;  %v9488_v25 = vld [vmem:[%s11594_s11 + $0x4c0] sm:$0xff]  }
0x1032   : > { %5847 = vmatprep.subr.bf16.mxu1 %v8057_v49  ;;  %5888 = vmatprep.subr.bf16.mxu0 %v8059_v53  ;;  %v9489_v32 = vld [vmem:[%s11594_s11 + $0x400] sm:$0xff]  }
0x1033   : > { %5877 = vmatprep.mubr.bf16.mxu1 %v9667_v13  ;;  %5918 = vmatprep.mubr.bf16.mxu0 %v9667_v13  ;;  %v9505_v49 = vld [vmem:[%s11594_s11 + $0x420] sm:$0xff]  }
0x1034   : > { %v9506_v53 = vld [vmem:[%s11594_s11 + $0x4a0] sm:$0xff]  }
0x1035   : > { %5848 = vmatpush1.bf16.msra.mxu1 %v8056_v55  ;;  %5889 = vmatpush1.bf16.msra.mxu0 %v8058_v57  ;;  %v9511_v55 = vld [vmem:[%s11594_s11 + $0x470] sm:$0xff]  }
0x1036   : > { %5927 = vmatprep.subr.bf16.mxu1 %v8045_v58  ;;  %5968 = vmatprep.subr.bf16.mxu0 %v8047_v10  ;;  %v9512_v57 = vld [vmem:[%s11594_s11 + $0x4f0] sm:$0xff]  }
0x1037   : > { %v9513_v58 = vld [vmem:[%s11594_s11 + $0x430] sm:$0xff]  }
0x1038   : > { %8070 = vmatmul.mubr.msk.bf16.vlgmr.msra.gmra.mrb[132].mxu1 %vm745_vm2, %v11027_v52  ;;  %8071 = vmatmul.mubr.msk.bf16.vlgmr.msra.gmra.mrb[136].mxu0 %vm745_vm2, %v11027_v52  ;;  %v9514_v10 = vld [vmem:[%s11594_s11 + $0x4b0] sm:$0xff]  }
0x1039   : > { %5928 = vmatpush1.bf16.msra.mxu1 %v8044_v4  ;;  %5969 = vmatpush1.bf16.msra.mxu0 %v8046_v5  ;;  %v9519_v4 = vld [vmem:[%s11594_s11 + $0x540] sm:$0xff]  }
0x103a   : > { %5929 = vmatprep.subr.bf16.mxu1 %v8061_v7  ;;  %5970 = vmatprep.subr.bf16.mxu0 %v8063_v43  ;;  %v9520_v5 = vld [vmem:[%s11594_s11 + $0x5c0] sm:$0xff]   ;;  %v11204_v7 = vld [vmem:[%s11593_s10 + $0x10] sm:$0xff] }
0x103b   : > { %5959 = vmatprep.mubr.bf16.mxu1 %v9667_v13  ;;  %6000 = vmatprep.mubr.bf16.mxu0 %v9667_v13  ;;  %v5523_v43 = vrot.slane %v11204_v7, %v10302_v44  ;;  %v5531_v39 = vrot.slane %v11204_v7, %v10305_v45  ;;  %v5527_v12 = vrot.slane %v11204_v7, %v10313_v47 }
0x103c   : > { %v5535_v14 = vrot.slane %v11204_v7, %v10316_v48 }
0x103d   : > { %5930 = vmatpush1.bf16.msra.mxu1 %v8060_v16  ;;  %5971 = vmatpush1.bf16.msra.mxu0 %v8062_v17 }
0x103e   : > { %6009 = vmatprep.subr.bf16.mxu1 %v8049_v18  ;;  %6050 = vmatprep.subr.bf16.mxu0 %v8051_v21 }
0x1040   : > { %8072 = vmatmul.mubr.msk.bf16.vlgmr.msra.gmra.mrb[136].mxu1 %vm745_vm2, %v11027_v52  ;;  %8073 = vmatmul.mubr.msk.bf16.vlgmr.msra.gmra.mrb[140].mxu0 %vm745_vm2, %v11027_v52 }
0x1041   : > { %6010 = vmatpush1.bf16.msra.mxu1 %v8048_v6  ;;  %6051 = vmatpush1.bf16.msra.mxu0 %v8050_v26 }
0x1042   : > { %6011 = vmatprep.subr.bf16.mxu1 %v8065_v27  ;;  %6052 = vmatprep.subr.bf16.mxu0 %v8067_v28 }
0x1043   : > { %6041 = vmatprep.mubr.bf16.mxu1 %v9667_v13  ;;  %6082 = vmatprep.mubr.bf16.mxu0 %v9667_v13  ;;  %v9492_v13 = vld [vmem:[%s11594_s11 + $0x4c8] sm:$0xff]  }
0x1045   : > { %6012 = vmatpush1.bf16.msra.mxu1 %v8064_v29  ;;  %6053 = vmatpush1.bf16.msra.mxu0 %v8066_v30 }
0x1046   : > { %8770 = vmatprep.subr.bf16.mxu1 %v9487_v24  ;;  %8792 = vmatprep.subr.bf16.mxu0 %v9488_v25 }
0x1048   : > { %8074 = vmatmul.mubr.msk.bf16.vlgmr.msra.gmra.mrb[140].mxu1 %vm745_vm2, %v11027_v52  ;;  %8075 = vmatmul.mubr.msk.bf16.vlgmr.msra.gmra.mrb[144].mxu0 %vm745_vm2, %v11027_v52  ;;  %v9504_v52 = vld [vmem:[%s11594_s11 + $0x4e0] sm:$0xff]  }
0x1049   : > { %8771 = vmatpush3.bf16.msra.mxu1 %v9489_v32  ;;  %8793 = vmatpush3.bf16.msra.mxu0 %v9490_v33  ;;  %v5543_v33 = vrot.slane %v11204_v7, %v10327_v62 }
0x104a   : > { %8772 = vmatprep.subr.bf16.mxu1 %v9491_v8  ;;  %8794 = vmatprep.subr.bf16.mxu0 %v9492_v13  ;;  %v5551_v8 = vrot.slane %v11204_v7, %v10330_v63  ;;  %v9521_v13 = vld [vmem:[%s11594_s11 + $0x500] sm:$0xff]  }
0x104d   : > { %8773 = vmatpush3.bf16.msra.mxu1 %v9493_v19  ;;  %8795 = vmatpush3.bf16.msra.mxu0 %v9494_v42  ;;  %v9522_v19 = vld [vmem:[%s11594_s11 + $0x580] sm:$0xff]  }
0x104e   : > { %8774 = vmatprep.subr.bf16.mxu1 %v9495_v31  ;;  %8796 = vmatprep.subr.bf16.mxu0 %v9496_v51  ;;  %v9523_v51 = vld [vmem:[%s11594_s11 + $0x548] sm:$0xff]  }
0x1051   : > { %8775 = vmatpush3.bf16.msra.mxu1 %v9497_v35  ;;  %8797 = vmatpush3.bf16.msra.mxu0 %v9498_v36  ;;  %v9524_v35 = vld [vmem:[%s11594_s11 + $0x5c8] sm:$0xff]  }
0x1052   : > { %8776 = vmatprep.subr.bf16.mxu1 %v9499_v9  ;;  %8798 = vmatprep.subr.bf16.mxu0 %v9500_v11 }
0x1055   : > { %8777 = vmatpush3.bf16.msra.mxu1 %v9501_v37  ;;  %8799 = vmatpush3.bf16.msra.mxu0 %v9502_v38 }
0x1056   : > { %8778 = vmatprep.subr.bf16.mxu1 %v9503_v40  ;;  %8800 = vmatprep.subr.bf16.mxu0 %v9504_v52 }
0x1059   : > { %8779 = vmatpush3.bf16.msra.mxu1 %v9505_v49  ;;  %8801 = vmatpush3.bf16.msra.mxu0 %v9506_v53  ;;  %v9525_v53 = vld [vmem:[%s11594_s11 + $0x508] sm:$0xff]  }
0x105a   : > { %8780 = vmatprep.subr.bf16.mxu1 %v9507_v34  ;;  %8802 = vmatprep.subr.bf16.mxu0 %v9508_v20  ;;  %v9526_v34 = vld [vmem:[%s11594_s11 + $0x588] sm:$0xff]  }
0x105d   : > { %8781 = vmatpush3.bf16.msra.mxu1 %v9509_v50  ;;  %8803 = vmatpush3.bf16.msra.mxu0 %v9510_v54  ;;  %v9527_v54 = vld [vmem:[%s11594_s11 + $0x550] sm:$0xff]  }
0x105e   : > { %8782 = vmatprep.subr.bf16.mxu1 %v9511_v55  ;;  %8804 = vmatprep.subr.bf16.mxu0 %v9512_v57  ;;  %v9528_v55 = vld [vmem:[%s11594_s11 + $0x5d0] sm:$0xff]  }
0x1061   : > { %8783 = vmatpush3.bf16.msra.mxu1 %v9513_v58  ;;  %8805 = vmatpush3.bf16.msra.mxu0 %v9514_v10 }
0x1062   : > { %8784 = vmatprep.subr.bf16.mxu1 %v9515_v59  ;;  %8806 = vmatprep.subr.bf16.mxu0 %v9516_v61  ;;  %v9529_v61 = vld [vmem:[%s11594_s11 + $0x510] sm:$0xff]  }
0x1065   : > { %8785 = vmatpush3.bf16.msra.mxu1 %v9517_v0  ;;  %8807 = vmatpush3.bf16.msra.mxu0 %v9518_v2  ;;  %v9530_v0 = vld [vmem:[%s11594_s11 + $0x590] sm:$0xff]   ;;  %v9531_v2 = vld [vmem:[%s11594_s11 + $0x558] sm:$0xff]  }
0x1066   : > { %8814 = vmatprep.subr.bf16.mxu1 %v9519_v4  ;;  %8836 = vmatprep.subr.bf16.mxu0 %v9520_v5  ;;  %v9532_v4 = vld [vmem:[%s11594_s11 + $0x5d8] sm:$0xff]  }
0x1103   : > { %v5797_v15 = vpop.f32.mrb[128].mxu1  ;;  %v5838_v16 = vpop.f32.mrb[132].mxu0 }
0x1104   : > { %v5798_v17 = vadd.f32 %v5797_v15, %v5523_v43  ;;  %v5839_v18 = vadd.f32 %v5838_v16, %v5531_v39  ;;  %v5799_v21 = vpop.f32.mrb[129].mxu1  ;;  %v5840_v22 = vpop.f32.mrb[133].mxu0  ;;  %v9533_v16 = vld [vmem:[%s11594_s11 + $0x518] sm:$0xff]  }
0x1105   : > { %v5800_v60 = vadd.f32 %v5799_v21, %v5527_v12  ;;  %v5841_v23 = vadd.f32 %v5840_v22, %v5535_v14  ;;  %v5801_v46 = vpop.f32.mrb[130].mxu1  ;;  %v5842_v6 = vpop.f32.mrb[134].mxu0  ;;  %v9535_v22 = vld [vmem:[%s11594_s11 + $0x560] sm:$0xff]  }
0x1106   : > { %v6091_v26 = vmax.f32 %v5798_v17, 0.0  ;;  %v6093_v27 = vmax.f32 %v5839_v18, 0.0  ;;  %v5802_v28 = vpop.f32.mrb[131].mxu1  ;;  %v5843_v29 = vpop.f32.mrb[135].mxu0  ;;  %v9534_v17 = vld [vmem:[%s11594_s11 + $0x598] sm:$0xff]   ;;  %v9537_v6 = vld [vmem:[%s11594_s11 + $0x520] sm:$0xff]  }
0x1107   : > { %v6092_v30 = vmax.f32 %v5800_v60, 0.0  ;;  %v6094_v24 = vmax.f32 %v5841_v23, 0.0  ;;  %v9536_v60 = vld [vmem:[%s11594_s11 + $0x5e0] sm:$0xff]   ;;  %v11277_v23 = vld [vmem:[%s11593_s10 + $0x18] sm:$0xff]  ;;  %v9540_v28 = vld [vmem:[%s11594_s11 + $0x5e8] sm:$0xff]  }
0x1108   : > { %v6107_v42 = vpack.c.bf16 %v6091_v26, %v6091_v26  ;;  %v6109_v31 = vpack.c.bf16 %v6093_v27, %v6093_v27  ;;  %v5579_v46 = vrot.slane %v11277_v23, %v10387_v56  ;;  %v9538_v26 = vld [vmem:[%s11594_s11 + $0x5a0] sm:$0xff]   ;;  %v9539_v27 = vld [vmem:[%s11594_s11 + $0x568] sm:$0xff]  }
0x1109   : > { %v6108_v25 = vpack.c.bf16 %v6092_v30, %v6092_v30  ;;  %v6110_v32 = vpack.c.bf16 %v6094_v24, %v6094_v24 }
0x110b   : > { %v11230_v36 = vpop.f32.mrb[132].mxu1  ;;  %v11232_v9 = vpop.f32.mrb[136].mxu0  ;;  %7188 = vmatprep.mubr.bf16.mxu1 %v6108_v25  ;;  %7228 = vmatprep.mubr.bf16.mxu0 %v6110_v32 }
0x110c   : > { %v5881_v11 = vpop.f32.mrb[133].mxu1  ;;  %v5922_v37 = vpop.f32.mrb[137].mxu0  ;;  %7189 = vmatmul.mubr.bf16.vlgmr.msra.gmra.mrb[144].mxu1 %v6107_v42  ;;  %7229 = vmatmul.mubr.bf16.vlgmr.msra.gmra.mrb[148].mxu0 %v6109_v31  ;;  %v5539_v42 = vrot.slane %v11204_v7, %v10409_v3  ;;  %v5547_v31 = vrot.slane %v11204_v7, %v10387_v56  ;;  %v9545_v56 = vld [vmem:[%s11594_s11 + $0x530] sm:$0xff]  }
0x110d   : > { %v5882_v38 = vadd.f32 %v5881_v11, %v5543_v33  ;;  %v5923_v40 = vadd.f32 %v5922_v37, %v5551_v8  ;;  %8815 = vmatpush3.bf16.msra.mxu1 %v9521_v13  ;;  %8837 = vmatpush3.bf16.msra.mxu0 %v9522_v19  ;;  %v5883_v52 = vpop.f32.mrb[134].mxu1  ;;  %v5924_v49 = vpop.f32.mrb[138].mxu0  ;;  %v9541_v13 = vld [vmem:[%s11594_s11 + $0x528] sm:$0xff]   ;;  %v9543_v11 = vld [vmem:[%s11594_s11 + $0x570] sm:$0xff]  }
0x110e   : > { %v5884_v20 = vpop.f32.mrb[135].mxu1  ;;  %v5925_v50 = vpop.f32.mrb[139].mxu0  ;;  %8816 = vmatprep.subr.bf16.mxu1 %v9523_v51  ;;  %8838 = vmatprep.subr.bf16.mxu0 %v9524_v35  ;;  %v9542_v19 = vld [vmem:[%s11594_s11 + $0x5a8] sm:$0xff]   ;;  %v9544_v37 = vld [vmem:[%s11594_s11 + $0x5f0] sm:$0xff]   ;;  %v5880_v52 = vadd.f32 %v11230_v36, %v5539_v42  ;;  %v5921_v49 = vadd.f32 %v11232_v9, %v5547_v31  ;;  %v9549_v36 = vld [vmem:[%s11594_s11 + $0x538] sm:$0xff]  }
0x110f   : > { %v6096_v57 = vmax.f32 %v5882_v38, 0.0  ;;  %v6098_v58 = vmax.f32 %v5923_v40, 0.0  ;;  %v5559_v38 = vrot.slane %v11277_v23, %v10313_v47  ;;  %v5567_v40 = vrot.slane %v11277_v23, %v10316_v48  ;;  %v9546_v7 = vld [vmem:[%s11594_s11 + $0x5b0] sm:$0xff]   ;;  %v9547_v47 = vld [vmem:[%s11594_s11 + $0x578] sm:$0xff]   ;;  %v9574_v42 = vld [vmem:[%s11594_s11 + $0x6a8] sm:$0xff]  }
0x1110   : > { %v9548_v48 = vld [vmem:[%s11594_s11 + $0x5f8] sm:$0xff]   ;;  %v6095_v20 = vmax.f32 %v5880_v52, 0.0  ;;  %v6097_v50 = vmax.f32 %v5921_v49, 0.0  ;;  %v9575_v31 = vld [vmem:[%s11594_s11 + $0x670] sm:$0xff]   ;;  %v9583_v49 = vld [vmem:[%s11594_s11 + $0x740] sm:$0xff]  }
0x1111   : > { %v6112_v10 = vpack.c.bf16 %v6096_v57, %v6096_v57  ;;  %v6114_v59 = vpack.c.bf16 %v6098_v58, %v6098_v58  ;;  %8817 = vmatpush3.bf16.msra.mxu1 %v9525_v53  ;;  %8839 = vmatpush3.bf16.msra.mxu0 %v9526_v34  ;;  %v9550_v9 = vld [vmem:[%s11594_s11 + $0x5b8] sm:$0xff]  }
0x1112   : > { %8818 = vmatprep.subr.bf16.mxu1 %v9527_v54  ;;  %8840 = vmatprep.subr.bf16.mxu0 %v9528_v55  ;;  %v9551_v54 = vld [vmem:[%s11594_s11 + $0x640] sm:$0xff]  }
0x1113   : > { %v11258_v5 = vpop.f32.mrb[136].mxu1  ;;  %v11260_v43 = vpop.f32.mrb[140].mxu0  ;;  %7268 = vmatprep.mubr.bf16.mxu1 %v6112_v10  ;;  %7308 = vmatprep.mubr.bf16.mxu0 %v6114_v59  ;;  %v9552_v55 = vld [vmem:[%s11594_s11 + $0x6c0] sm:$0xff]   ;;  %v6111_v59 = vpack.c.bf16 %v6095_v20, %v6095_v20  ;;  %v9587_v20 = vld [vmem:[%s11594_s11 + $0x748] sm:$0xff]  }
0x1114   : > { %v5963_v39 = vpop.f32.mrb[137].mxu1  ;;  %v6004_v12 = vpop.f32.mrb[141].mxu0  ;;  %v9553_v10 = vld [vmem:[%s11594_s11 + $0x600] sm:$0xff]  }
0x1115   : > { %8819 = vmatpush3.bf16.msra.mxu1 %v9529_v61  ;;  %8841 = vmatpush3.bf16.msra.mxu0 %v9530_v0  ;;  %v5965_v14 = vpop.f32.mrb[138].mxu1  ;;  %v6006_v15 = vpop.f32.mrb[142].mxu0  ;;  %v5964_v53 = vadd.f32 %v5963_v39, %v5559_v38  ;;  %v6005_v34 = vadd.f32 %v6004_v12, %v5567_v40  ;;  %v6113_v61 = vpack.c.bf16 %v6097_v50, %v6097_v50  ;;  %v9554_v0 = vld [vmem:[%s11594_s11 + $0x680] sm:$0xff]   ;;  %v9556_v39 = vld [vmem:[%s11594_s11 + $0x6c8] sm:$0xff]  }
0x1116   : > { %v5966_v18 = vpop.f32.mrb[139].mxu1  ;;  %v6007_v21 = vpop.f32.mrb[143].mxu0  ;;  %8820 = vmatprep.subr.bf16.mxu1 %v9531_v2  ;;  %8842 = vmatprep.subr.bf16.mxu0 %v9532_v4  ;;  %v9555_v4 = vld [vmem:[%s11594_s11 + $0x648] sm:$0xff]  }
0x1117   : > { %v6100_v57 = vmax.f32 %v5964_v53, 0.0  ;;  %v6102_v58 = vmax.f32 %v6005_v34, 0.0  ;;  %v9557_v14 = vld [vmem:[%s11594_s11 + $0x608] sm:$0xff]   ;;  %v9561_v18 = vld [vmem:[%s11594_s11 + $0x610] sm:$0xff]   ;;  %v9585_v53 = vld [vmem:[%s11594_s11 + $0x700] sm:$0xff]  }
0x1118   : > { %v9558_v15 = vld [vmem:[%s11594_s11 + $0x688] sm:$0xff]   ;;  %v9562_v21 = vld [vmem:[%s11594_s11 + $0x690] sm:$0xff]  }
0x1119   : > { %8821 = vmatpush3.bf16.msra.mxu1 %v9533_v16  ;;  %8843 = vmatpush3.bf16.msra.mxu0 %v9534_v17  ;;  %v6116_v2 = vpack.c.bf16 %v6100_v57, %v6100_v57  ;;  %v6118_v12 = vpack.c.bf16 %v6102_v58, %v6102_v58  ;;  %v9559_v16 = vld [vmem:[%s11594_s11 + $0x650] sm:$0xff]   ;;  %v9589_v57 = vld [vmem:[%s11594_s11 + $0x708] sm:$0xff]  }
0x111a   : > { %8822 = vmatprep.subr.bf16.mxu1 %v9535_v22  ;;  %8844 = vmatprep.subr.bf16.mxu0 %v9536_v60  ;;  %v9560_v17 = vld [vmem:[%s11594_s11 + $0x6d0] sm:$0xff]   ;;  %v9563_v22 = vld [vmem:[%s11594_s11 + $0x658] sm:$0xff]   ;;  %v9590_v58 = vld [vmem:[%s11594_s11 + $0x788] sm:$0xff]  }
0x111b   : > { %v11293_v29 = vpop.f32.mrb[140].mxu1  ;;  %v6084_v30 = vpop.f32.mrb[144].mxu0  ;;  %v9564_v60 = vld [vmem:[%s11594_s11 + $0x6d8] sm:$0xff]  }
0x111c   : > { %v11295_v24 = vadd.f32 %v6084_v30, %v5579_v46  ;;  %v11297_v25 = vpop.f32.mrb[141].mxu1  ;;  %v11299_v32 = vpop.f32.mrb[145].mxu0  ;;  %v9565_v46 = vld [vmem:[%s11594_s11 + $0x618] sm:$0xff]   ;;  %v9570_v30 = vld [vmem:[%s11594_s11 + $0x6a0] sm:$0xff]  }
0x111d   : > { %8823 = vmatpush3.bf16.msra.mxu1 %v9537_v6  ;;  %8845 = vmatpush3.bf16.msra.mxu0 %v9538_v26  ;;  %v6047_v33 = vpop.f32.mrb[142].mxu1  ;;  %v6088_v8 = vpop.f32.mrb[146].mxu0  ;;  %v9566_v6 = vld [vmem:[%s11594_s11 + $0x698] sm:$0xff]   ;;  %v9567_v26 = vld [vmem:[%s11594_s11 + $0x660] sm:$0xff]  }
0x111e   : > { %v6048_v51 = vpop.f32.mrb[143].mxu1  ;;  %v6089_v35 = vpop.f32.mrb[147].mxu0  ;;  %8824 = vmatprep.subr.bf16.mxu1 %v9539_v27  ;;  %8846 = vmatprep.subr.bf16.mxu0 %v9540_v28  ;;  %v9568_v27 = vld [vmem:[%s11594_s11 + $0x6e0] sm:$0xff]   ;;  %v9571_v33 = vld [vmem:[%s11594_s11 + $0x668] sm:$0xff]  }
0x111f   : > { %v9569_v28 = vld [vmem:[%s11594_s11 + $0x620] sm:$0xff]   ;;  %v9572_v8 = vld [vmem:[%s11594_s11 + $0x6e8] sm:$0xff]   ;;  %v5563_v51 = vrot.slane %v11277_v23, %v10305_v45  ;;  %v9576_v35 = vld [vmem:[%s11594_s11 + $0x6f0] sm:$0xff]  }
0x1120   : > { %v9578_v45 = vld [vmem:[%s11594_s11 + $0x6b0] sm:$0xff]  }
0x1121   : > { %8825 = vmatpush3.bf16.msra.mxu1 %v9541_v13  ;;  %8847 = vmatpush3.bf16.msra.mxu0 %v9542_v19  ;;  %v9573_v13 = vld [vmem:[%s11594_s11 + $0x628] sm:$0xff]   ;;  %v5555_v19 = vrot.slane %v11277_v23, %v10302_v44  ;;  %v5575_v44 = vrot.slane %v11277_v23, %v10327_v62  ;;  %v9579_v62 = vld [vmem:[%s11594_s11 + $0x678] sm:$0xff]   ;;  %v6003_v40 = vadd.f32 %v11260_v43, %v5563_v51 }
0x1122   : > { %8826 = vmatprep.subr.bf16.mxu1 %v9543_v11  ;;  %8848 = vmatprep.subr.bf16.mxu0 %v9544_v37  ;;  %v5583_v11 = vrot.slane %v11277_v23, %v10330_v63  ;;  %v9577_v37 = vld [vmem:[%s11594_s11 + $0x630] sm:$0xff]   ;;  %v9580_v63 = vld [vmem:[%s11594_s11 + $0x6f8] sm:$0xff]  }
0x1123   : > { %v5962_v38 = vadd.f32 %v11258_v5, %v5555_v19  ;;  %v9582_v43 = vld [vmem:[%s11594_s11 + $0x6b8] sm:$0xff]  }
0x1124   : > { %v6087_v5 = vadd.f32 %v11299_v32, %v5583_v11 }
0x1125   : > { %8827 = vmatpush3.bf16.msra.mxu1 %v9545_v56  ;;  %8849 = vmatpush3.bf16.msra.mxu0 %v9546_v7  ;;  %v6046_v56 = vadd.f32 %v11297_v25, %v5575_v44  ;;  %v9581_v7 = vld [vmem:[%s11594_s11 + $0x638] sm:$0xff]   ;;  %v6099_v52 = vmax.f32 %v5962_v38, 0.0  ;;  %v9584_v25 = vld [vmem:[%s11594_s11 + $0x7c0] sm:$0xff]  }
0x1126   : > { %8828 = vmatprep.subr.bf16.mxu1 %v9547_v47  ;;  %8850 = vmatprep.subr.bf16.mxu0 %v9548_v48  ;;  %v6101_v47 = vmax.f32 %v6003_v40, 0.0  ;;  %v6106_v48 = vmax.f32 %v6087_v5, 0.0 }
0x1127   : > { %v6104_v32 = vmax.f32 %v6046_v56, 0.0  ;;  %v6115_v34 = vpack.c.bf16 %v6099_v52, %v6099_v52 }
0x1129   : > { %8829 = vmatpush3.bf16.msra.mxu1 %v9549_v36  ;;  %8851 = vmatpush3.bf16.msra.mxu0 %v9550_v9  ;;  %v9586_v36 = vld [vmem:[%s11594_s11 + $0x780] sm:$0xff]   ;;  %v6117_v9 = vpack.c.bf16 %v6101_v47, %v6101_v47  ;;  %v6120_v50 = vpack.c.bf16 %v6104_v32, %v6104_v32 }
0x112a   : > { %8858 = vmatprep.subr.bf16.mxu1 %v9551_v54  ;;  %8880 = vmatprep.subr.bf16.mxu0 %v9552_v55  ;;  %v9588_v54 = vld [vmem:[%s11594_s11 + $0x7c8] sm:$0xff]   ;;  %v6122_v55 = vpack.c.bf16 %v6106_v48, %v6106_v48 }
0x112c   : > { %7269 = vmatmul.mubr.bf16.vlgmr.msra.gmra.mrb[148].mxu1 %v6111_v59  ;;  %7309 = vmatmul.mubr.bf16.vlgmr.msra.gmra.mrb[152].mxu0 %v6113_v61  ;;  %v9592_v59 = vld [vmem:[%s11594_s11 + $0x7d0] sm:$0xff]  }
0x112d   : > { %8859 = vmatpush3.bf16.msra.mxu1 %v9553_v10  ;;  %7348 = vmatprep.mubr.bf16.mxu1 %v6116_v2  ;;  %v9591_v10 = vld [vmem:[%s11594_s11 + $0x750] sm:$0xff]   ;;  %v9595_v2 = vld [vmem:[%s11594_s11 + $0x758] sm:$0xff]  }
0x112e   : > { %8881 = vmatpush3.bf16.msra.mxu0 %v9554_v0  ;;  %7388 = vmatprep.mubr.bf16.mxu0 %v6118_v12  ;;  %v9593_v61 = vld [vmem:[%s11594_s11 + $0x710] sm:$0xff]   ;;  %v9598_v12 = vld [vmem:[%s11594_s11 + $0x798] sm:$0xff]  }
0x112f   : > { %8860 = vmatprep.subr.bf16.mxu1 %v9555_v4  ;;  %8882 = vmatprep.subr.bf16.mxu0 %v9556_v39  ;;  %v9594_v0 = vld [vmem:[%s11594_s11 + $0x790] sm:$0xff]   ;;  %v9596_v4 = vld [vmem:[%s11594_s11 + $0x7d8] sm:$0xff]  }
0x1130   : > { %v9597_v39 = vld [vmem:[%s11594_s11 + $0x718] sm:$0xff]  }
0x1131   : > { %8861 = vmatpush3.bf16.msra.mxu1 %v9557_v14  ;;  %v9599_v14 = vld [vmem:[%s11594_s11 + $0x760] sm:$0xff]  }
0x1132   : > { %8883 = vmatpush3.bf16.msra.mxu0 %v9558_v15  ;;  %8862 = vmatprep.subr.bf16.mxu1 %v9559_v16  ;;  %v9600_v15 = vld [vmem:[%s11594_s11 + $0x7e0] sm:$0xff]  }
0x1133   : > { %8884 = vmatprep.subr.bf16.mxu0 %v9560_v17  ;;  %v9601_v16 = vld [vmem:[%s11594_s11 + $0x720] sm:$0xff]  }
0x1134   : > { %v9602_v17 = vld [vmem:[%s11594_s11 + $0x7a0] sm:$0xff]  }
0x1135   : > { %8863 = vmatpush3.bf16.msra.mxu1 %v9561_v18  ;;  %v9603_v18 = vld [vmem:[%s11594_s11 + $0x768] sm:$0xff]  }
0x1136   : > { %8885 = vmatpush3.bf16.msra.mxu0 %v9562_v21  ;;  %8864 = vmatprep.subr.bf16.mxu1 %v9563_v22  ;;  %v9604_v21 = vld [vmem:[%s11594_s11 + $0x7e8] sm:$0xff]  }
0x1137   : > { %8886 = vmatprep.subr.bf16.mxu0 %v9564_v60  ;;  %v9605_v22 = vld [vmem:[%s11594_s11 + $0x728] sm:$0xff]   ;;  %v5571_v60 = vrot.slane %v11277_v23, %v10409_v3  ;;  %v9609_v3 = vld [vmem:[%s11594_s11 + $0x730] sm:$0xff]  }
0x1139   : > { %8865 = vmatpush3.bf16.msra.mxu1 %v9565_v46  ;;  %v9606_v46 = vld [vmem:[%s11594_s11 + $0x7a8] sm:$0xff]   ;;  %v6044_v23 = vadd.f32 %v11293_v29, %v5571_v60  ;;  %v9613_v29 = vld [vmem:[%s11594_s11 + $0x738] sm:$0xff]  }
0x113a   : > { %8887 = vmatpush3.bf16.msra.mxu0 %v9566_v6  ;;  %8866 = vmatprep.subr.bf16.mxu1 %v9567_v26  ;;  %v9607_v6 = vld [vmem:[%s11594_s11 + $0x770] sm:$0xff]  }
0x113b   : > { %8888 = vmatprep.subr.bf16.mxu0 %v9568_v27  ;;  %v9608_v26 = vld [vmem:[%s11594_s11 + $0x7f0] sm:$0xff]  }
0x113c   : > { %v9610_v27 = vld [vmem:[%s11594_s11 + $0x7b0] sm:$0xff]  }
0x113d   : > { %8867 = vmatpush3.bf16.msra.mxu1 %v9569_v28  ;;  %v9611_v28 = vld [vmem:[%s11594_s11 + $0x778] sm:$0xff]  }
0x113e   : > { %8889 = vmatpush3.bf16.msra.mxu0 %v9570_v30  ;;  %8868 = vmatprep.subr.bf16.mxu1 %v9571_v33  ;;  %v9612_v30 = vld [vmem:[%s11594_s11 + $0x7f8] sm:$0xff]   ;;  %v6103_v33 = vmax.f32 %v6044_v23, 0.0 }
0x113f   : > { %8890 = vmatprep.subr.bf16.mxu0 %v9572_v8  ;;  %v9614_v8 = vld [vmem:[%s11594_s11 + $0x7b8] sm:$0xff]  }
0x1140   : > { %v6119_v19 = vpack.c.bf16 %v6103_v33, %v6103_v33  ;;  %v9616_v33 = vld [vmem:[%s11598_s15 + $0x8] sm:$0xff]  }
0x1141   : > { %8869 = vmatpush3.bf16.msra.mxu1 %v9573_v13  ;;  %v6105_v13 = vmax.f32 %v11295_v24, 0.0 }
0x1142   : > { %8891 = vmatpush3.bf16.msra.mxu0 %v9574_v42  ;;  %8870 = vmatprep.subr.bf16.mxu1 %v9575_v31 }
0x1143   : > { %8892 = vmatprep.subr.bf16.mxu0 %v9576_v35  ;;  %v6121_v42 = vpack.c.bf16 %v6105_v13, %v6105_v13  ;;  %v8333_v35 = vld [vmem:[%s11595_s12 + $0x1] ss:$0 sm:$0xff] }
0x1145   : > { %8871 = vmatpush3.bf16.msra.mxu1 %v9577_v37 }
0x1146   : > { %8893 = vmatpush3.bf16.msra.mxu0 %v9578_v45  ;;  %8872 = vmatprep.subr.bf16.mxu1 %v9579_v62 }
0x1147   : > { %8894 = vmatprep.subr.bf16.mxu0 %v9580_v63 }
0x1149   : > { %8873 = vmatpush3.bf16.msra.mxu1 %v9581_v7 }
0x114a   : > { %8895 = vmatpush3.bf16.msra.mxu0 %v9582_v43  ;;  %8902 = vmatprep.subr.bf16.mxu1 %v9583_v49 }
0x114b   : > { %8924 = vmatprep.subr.bf16.mxu0 %v9584_v25 }
0x114c   : > { %7349 = vmatmul.mubr.bf16.vlgmr.msra.gmra.mrb[152].mxu1 %v6115_v34 }
0x114d   : > { %7389 = vmatmul.mubr.bf16.vlgmr.msra.gmra.mrb[156].mxu0 %v6117_v9  ;;  %8903 = vmatpush3.bf16.msra.mxu1 %v9585_v53 }
0x114e   : > { %7428 = vmatprep.mubr.bf16.mxu1 %v6120_v50  ;;  %8925 = vmatpush3.bf16.msra.mxu0 %v9586_v36 }
0x114f   : > { %7468 = vmatprep.mubr.bf16.mxu0 %v6122_v55  ;;  %8904 = vmatprep.subr.bf16.mxu1 %v9587_v20 }
0x1150   : > { %8926 = vmatprep.subr.bf16.mxu0 %v9588_v54 }
0x1151   : > { %8905 = vmatpush3.bf16.msra.mxu1 %v9589_v57 }
0x1152   : > { %8927 = vmatpush3.bf16.msra.mxu0 %v9590_v58  ;;  %8906 = vmatprep.subr.bf16.mxu1 %v9591_v10 }
0x1153   : > { %8928 = vmatprep.subr.bf16.mxu0 %v9592_v59 }
0x1155   : > { %8907 = vmatpush3.bf16.msra.mxu1 %v9593_v61 }
0x1156   : > { %8929 = vmatpush3.bf16.msra.mxu0 %v9594_v0  ;;  %8908 = vmatprep.subr.bf16.mxu1 %v9595_v2 }
0x1157   : > { %8930 = vmatprep.subr.bf16.mxu0 %v9596_v4 }
0x1159   : > { %8909 = vmatpush3.bf16.msra.mxu1 %v9597_v39 }
0x115a   : > { %8931 = vmatpush3.bf16.msra.mxu0 %v9598_v12  ;;  %8910 = vmatprep.subr.bf16.mxu1 %v9599_v14 }
0x115b   : > { %8932 = vmatprep.subr.bf16.mxu0 %v9600_v15 }
0x115d   : > { %8911 = vmatpush3.bf16.msra.mxu1 %v9601_v16 }
0x115e   : > { %8933 = vmatpush3.bf16.msra.mxu0 %v9602_v17  ;;  %8912 = vmatprep.subr.bf16.mxu1 %v9603_v18 }
0x115f   : > { %8934 = vmatprep.subr.bf16.mxu0 %v9604_v21 }
0x1161   : > { %8913 = vmatpush3.bf16.msra.mxu1 %v9605_v22 }
0x1162   : > { %8935 = vmatpush3.bf16.msra.mxu0 %v9606_v46  ;;  %8914 = vmatprep.subr.bf16.mxu1 %v9607_v6 }
0x1163   : > { %8936 = vmatprep.subr.bf16.mxu0 %v9608_v26 }
0x1165   : > { %8915 = vmatpush3.bf16.msra.mxu1 %v9609_v3 }
0x1166   : > { %8937 = vmatpush3.bf16.msra.mxu0 %v9610_v27  ;;  %8916 = vmatprep.subr.bf16.mxu1 %v9611_v28 }
0x1167   : > { %8938 = vmatprep.subr.bf16.mxu0 %v9612_v30 }
0x1169   : > { %8917 = vmatpush3.bf16.msra.mxu1 %v9613_v29  ;;  %v9615_v29 = vld [vmem:[%s11598_s15] sm:$0xff]  }
0x116a   : > { %8939 = vmatpush3.bf16.msra.mxu0 %v9614_v8  ;;  %9291 = vmatprep.subr.bf16.mxu1 %v9665_v1 }
0x116c   : > { %7429 = vmatmul.mubr.bf16.vlgmr.msra.gmra.mrb[156].mxu1 %v6119_v19 }
0x116d   : > { %7469 = vmatmul.mubr.bf16.vlgmr.msra.gmra.mrb[160].mxu0 %v6121_v42  ;;  %9295 = vmatprep.mubr.msk.bf16.mxu1 %vm9666_vm0, %v9665_v1  ;;  %v8464_v42 = vld [vmem:[%s11596_s13 + $0x1] ss:$0 sm:$0xff] }
0x116e   : > { %9292 = vmatpush3.bf16.msra.mxu1 %v9615_v29 }
0x116f   : > { %9293 = vmatprep.subr.bf16.mxu1 %v9665_v1  ;;  %v8466_v1 = vld [vmem:[%s11599_s16] ss:$0 sm:$0xff] }
0x1172   : > { %9294 = vmatpush3.bf16.msra.mxu1 %v9616_v33 }
0x11df   : > { %v8786_v31 = vpop.f32.mrb[144].mxu1  ;;  %v8808_v51 = vpop.f32.mrb[148].mxu0 }
0x11e0   : > { %v8787_v44 = vpop.f32.mrb[145].mxu1  ;;  %v8809_v24 = vpop.f32.mrb[149].mxu0 }
0x11e1   : > { %v8788_v11 = vadd.f32 %v8787_v44, %v8786_v31  ;;  %v8810_v37 = vadd.f32 %v8809_v24, %v8808_v51  ;;  %v8789_v38 = vpop.f32.mrb[146].mxu1  ;;  %v8811_v45 = vpop.f32.mrb[150].mxu0  ;;  %v8465_v51 = vld [vmem:[%s11597_s14 + $0x1] ss:$0 sm:$0xff] }
0x11e2   : > { %v8790_v62 = vpop.f32.mrb[147].mxu1  ;;  %v8812_v40 = vpop.f32.mrb[151].mxu0 }
0x11e3   : > { %v7191_v63 = vadd.f32 %v8788_v11, %v8333_v35 }
0x11e5   : > { %v7231_v56 = vadd.f32 %v8810_v37, %v7191_v63 }
0x11ff   : > { %v8830_v5 = vpop.f32.mrb[148].mxu1  ;;  %v8852_v7 = vpop.f32.mrb[152].mxu0 }
0x1200   : > { %v8831_v52 = vpop.f32.mrb[149].mxu1  ;;  %v8853_v43 = vpop.f32.mrb[153].mxu0 }
0x1201   : > { %v8832_v49 = vadd.f32 %v8831_v52, %v8830_v5  ;;  %v8854_v47 = vadd.f32 %v8853_v43, %v8852_v7  ;;  %v8833_v25 = vpop.f32.mrb[150].mxu1  ;;  %v8855_v32 = vpop.f32.mrb[154].mxu0 }
0x1202   : > { %v8834_v48 = vpop.f32.mrb[151].mxu1  ;;  %v8856_v53 = vpop.f32.mrb[155].mxu0 }
0x1203   : > { %v7271_v34 = vadd.f32 %v8832_v49, %v7231_v56 }
0x1205   : > { %v7311_v36 = vadd.f32 %v8854_v47, %v7271_v34 }
0x121f   : > { %v8874_v9 = vpop.f32.mrb[152].mxu1 }
0x1220   : > { %v8896_v20 = vpop.f32.mrb[156].mxu0  ;;  %v8875_v50 = vpop.f32.mrb[153].mxu1 }
0x1221   : > { %v8876_v54 = vadd.f32 %v8875_v50, %v8874_v9  ;;  %v8897_v55 = vpop.f32.mrb[157].mxu0  ;;  %v8877_v57 = vpop.f32.mrb[154].mxu1 }
0x1222   : > { %v8898_v58 = vadd.f32 %v8897_v55, %v8896_v20  ;;  %v8899_v10 = vpop.f32.mrb[158].mxu0  ;;  %v8878_v59 = vpop.f32.mrb[155].mxu1 }
0x1223   : > { %v7351_v61 = vadd.f32 %v8876_v54, %v7311_v36  ;;  %v8900_v0 = vpop.f32.mrb[159].mxu0 }
0x1225   : > { %v7391_v2 = vadd.f32 %v8898_v58, %v7351_v61 }
0x123f   : > { %v8918_v4 = vpop.f32.mrb[156].mxu1 }
0x1240   : > { %v8940_v39 = vpop.f32.mrb[160].mxu0  ;;  %v8919_v12 = vpop.f32.mrb[157].mxu1 }
0x1241   : > { %v8920_v14 = vadd.f32 %v8919_v12, %v8918_v4  ;;  %v8941_v15 = vpop.f32.mrb[161].mxu0  ;;  %v8921_v16 = vpop.f32.mrb[158].mxu1 }
0x1242   : > { %v8942_v17 = vadd.f32 %v8941_v15, %v8940_v39  ;;  %v8943_v18 = vpop.f32.mrb[162].mxu0  ;;  %v8922_v21 = vpop.f32.mrb[159].mxu1 }
0x1243   : > { %v7431_v22 = vadd.f32 %v8920_v14, %v7391_v2  ;;  %v8944_v60 = vpop.f32.mrb[163].mxu0 }
0x1245   : > { %v7471_v46 = vadd.f32 %v8942_v17, %v7431_v22 }
0x1247   : > { %v7476_v6 = vadd.f32 %v7471_v46, %v11023_v41 }
0x1249   : > { %v7481_v26 = vsel %vm745_vm2, %v7476_v6, 0.0 }
0x124a   : > { %7482 = vadd.xlane.f32.xlu0 %v7481_v26 }
0x12d7   : > { %v7483_v3 = vpop.xlane.xlu0 %7482 }
0x12d8   : > { %v7484_v23 = vmul.f32 0.03125, %v7483_v3 }
0x12da   : > { %v7485_v27 = vsub.f32 %v7476_v6, %v7484_v23 }
0x12dc   : > { %v7486_v28 = vmul.f32 %v7485_v27, %v7485_v27 }
0x12de   : > { %v7487_v30 = vsel %vm745_vm2, %v7486_v28, 0.0 }
0x12df   : > { %7488 = vadd.xlane.f32.xlu1 %v7487_v30 }
0x136c   : > { %v7489_v41 = vpop.xlane.xlu1 %7488 }
0x136d   : > { %v7490_v8 = vmul.f32 0.03125, %v7489_v41 }
0x136f   : > { %v7491_v13 = vadd.f32 1e-05, %v7490_v8 }
0x1371   : > { %9655 = vrsqrt.f32 %v7491_v13 }
0x137b   : > { %v9656_v19 = vpop.eup %9655 }
0x137c   : > { %v7493_v31 = vmul.f32 %v9656_v19, %v7485_v27 }
0x137e   : > { %v7500_v35 = vmul.f32 %v8464_v42, %v7493_v31 }
0x1380   : > { %v7507_v44 = vadd.f32 %v8465_v51, %v7500_v35 }
0x1382   : > { %v7508_v24 = vpack.c.bf16 %v7507_v44, %v7507_v44 }
0x1384   : > { %9296 = vmatmul.mubr.msk.bf16.vlgmr.msra.gmra.mrb[160].mxu1 %vm745_vm2, %v7508_v24 }
0x1457   : > { %v7569_v11 = vpop.f32.mrb[160].mxu1 }
0x1458   : > { %v7570_v37 = vadd.f32 %v8466_v1, %v7569_v11  ;;  %v9297_v38 = vpop.f32.mrb[161].mxu1 }
0x1459   : > { %v7572_v45 = vpop.f32.mrb[162].mxu1 }
0x145a   : > { %7575 = vst [vmem:[%s543_s21] sm:$0xff] %v7570_v37  ;;  %v9298_v62 = vpop.f32.mrb[163].mxu1 }
0x145b PF: > { %s27_s24 = sadd.s32 1, %s9663_s24  }
0x145c   : > { %p24_p4 = scmp.ge.s32.totalorder %s27_s24, 4  }
0x145e   :  { %26 = sbr.rel (!%p24_p4) target bundleno = 3 (0x3), region = 130 }

</bundles_post_ra>
